<compile_context>
chip_gen: v7x
topology: tpu7x:2x2x1
jax: 0.10.0
libtpu: 0.0.40
codegen_flags: <defaults>
</compile_context>

<pallas_src>
import functools

import jax
import jax.numpy as jnp
from jax.experimental import pallas as pl
from jax.experimental.pallas import tpu as pltpu

D_MODEL = 32
N_HEADS = 4
HEAD_DIM = D_MODEL // N_HEADS
FFN_DIM = 64
VOCAB = 64
NEG_INF = -1e9


# ----------------------------- fused Pallas kernel -----------------------------

def _fused_forward_kernel(
    # activations / masks
    xs_ref, xt_ref, tm_ref, sp_ref, tp_ref,
    # encoder weights
    e_qkv_w, e_qkv_b, e_wo, e_bo, e_ln1_g, e_ln1_b,
    e_w1, e_b1, e_w2, e_b2, e_ln2_g, e_ln2_b,
    # decoder weights
    d_sa_qkv_w, d_sa_qkv_b, d_sa_wo, d_sa_bo, d_ln1_g, d_ln1_b,
    d_ca_q_w, d_ca_q_b, d_ca_kv_w, d_ca_kv_b, d_ca_wo, d_ca_bo, d_ln2_g, d_ln2_b,
    d_w1, d_b1, d_w2, d_b2, d_ln3_g, d_ln3_b, d_out_w, d_out_b,
    # output
    logits_ref,
    # scratch
    ctx_ref,
):
    B, Ss = sp_ref.shape
    St = tp_ref.shape[1]
    D = xs_ref.shape[1]
    H = N_HEADS
    dh = D // H
    scale = 1.0 / (dh ** 0.5)

    def linear(x, w_ref, b_ref, relu=False):
        y = jnp.dot(x, w_ref[...], preferred_element_type=jnp.float32) + b_ref[...]
        return jnp.maximum(y, 0.0) if relu else y

    def layer_norm(x, g_ref, b_ref):
        mu = jnp.mean(x, axis=-1, keepdims=True)
        var = jnp.mean((x - mu) ** 2, axis=-1, keepdims=True)
        return (x - mu) * jax.lax.rsqrt(var + 1e-5) * g_ref[...] + b_ref[...]

    def mha(q, k, v, wo_ref, bo_ref, mask_fn, Sq, Sk):
        """q: [B*Sq, D]; k, v: [B*Sk, D]. mask_fn(b) -> additive mask broadcastable to [Sq, Sk].
        Output projection is folded into the per-head accumulation."""
        for b in range(B):
            qb = q[b * Sq:(b + 1) * Sq, :]
            kb = k[b * Sk:(b + 1) * Sk, :]
            vb = v[b * Sk:(b + 1) * Sk, :]
            mb = mask_fn(b)
            acc = jnp.zeros((Sq, D), jnp.float32)
            for h in range(H):
                c0, c1 = h * dh, (h + 1) * dh
                # scores: contract the head dim directly (no explicit transpose)
                s = jax.lax.dot_general(
                    qb[:, c0:c1], kb[:, c0:c1],
                    (((1,), (1,)), ((), ())),
                    preferred_element_type=jnp.float32) * scale + mb
                s = s - jnp.max(s, axis=-1, keepdims=True)
                p = jnp.exp(s)
                p = p * pl.reciprocal(jnp.sum(p, axis=-1, keepdims=True), approx=True)
                ctx_h = jnp.dot(p, vb[:, c0:c1], preferred_element_type=jnp.float32)
                # fold output projection: ctx @ Wo == sum_h ctx_h @ Wo[h*dh:(h+1)*dh, :]
                acc = acc + jnp.dot(ctx_h, wo_ref[c0:c1, :],
                                    preferred_element_type=jnp.float32)
            ctx_ref[b * Sq:(b + 1) * Sq, :] = acc + bo_ref[...]
        return ctx_ref[0:B * Sq, :]

    # ---------------- encoder layer (post-LN) ----------------
    xs = xs_ref[...]                                          # [B*Ss, D]
    qkv = linear(xs, e_qkv_w, e_qkv_b)                        # [B*Ss, 3D]
    q, k, v = qkv[:, 0:D], qkv[:, D:2 * D], qkv[:, 2 * D:3 * D]
    a = mha(q, k, v, e_wo, e_bo, lambda b: sp_ref[b:b + 1, :], Ss, Ss)
    x = layer_norm(xs + a, e_ln1_g, e_ln1_b)
    ff = linear(linear(x, e_w1, e_b1, relu=True), e_w2, e_b2)
    mem = layer_norm(x + ff, e_ln2_g, e_ln2_b)                # src_features [B*Ss, D]

    # ---------------- decoder layer ----------------
    xt = xt_ref[...]                                          # [B*St, D] (embedded tokens)
    qkv = linear(xt, d_sa_qkv_w, d_sa_qkv_b)
    q, k, v = qkv[:, 0:D], qkv[:, D:2 * D], qkv[:, 2 * D:3 * D]
    a = mha(q, k, v, d_sa_wo, d_sa_bo,
            lambda b: tm_ref[...] + tp_ref[b:b + 1, :], St, St)
    x = layer_norm(xt + a, d_ln1_g, d_ln1_b)

    qx = linear(x, d_ca_q_w, d_ca_q_b)
    kv = linear(mem, d_ca_kv_w, d_ca_kv_b)                    # fused K|V for cross-attn
    kx, vx = kv[:, 0:D], kv[:, D:2 * D]
    a = mha(qx, kx, vx, d_ca_wo, d_ca_bo, lambda b: sp_ref[b:b + 1, :], St, Ss)
    x = layer_norm(x + a, d_ln2_g, d_ln2_b)

    ff = linear(linear(x, d_w1, d_b1, relu=True), d_w2, d_b2)
    x = layer_norm(x + ff, d_ln3_g, d_ln3_b)

    logits_ref[...] = linear(x, d_out_w, d_out_b)             # [B*St, VOCAB]


# ----------------------------- wrapper / glue -----------------------------

def pack_params(params):
    """Pack the per-matrix params into the fused layout the kernel expects (done once)."""
    e, d = params["enc"], params["dec"]
    row = lambda v: v.reshape(1, -1)

    def qkv(blk):
        w = jnp.concatenate([blk["wq"], blk["wk"], blk["wv"]], axis=1)
        b = jnp.concatenate([blk["bq"], blk["bk"], blk["bv"]]).reshape(1, -1)
        return w, b

    e_qkv_w, e_qkv_b = qkv(e["sa"])
    d_qkv_w, d_qkv_b = qkv(d["sa"])
    d_kv_w = jnp.concatenate([d["ca"]["wk"], d["ca"]["wv"]], axis=1)
    d_kv_b = jnp.concatenate([d["ca"]["bk"], d["ca"]["bv"]]).reshape(1, -1)

    return (
        # encoder
        e_qkv_w, e_qkv_b, e["sa"]["wo"], row(e["sa"]["bo"]), row(e["ln1_g"]), row(e["ln1_b"]),
        e["w1"], row(e["b1"]), e["w2"], row(e["b2"]), row(e["ln2_g"]), row(e["ln2_b"]),
        # decoder self-attn
        d_qkv_w, d_qkv_b, d["sa"]["wo"], row(d["sa"]["bo"]), row(d["ln1_g"]), row(d["ln1_b"]),
        # decoder cross-attn
        d["ca"]["wq"], row(d["ca"]["bq"]), d_kv_w, d_kv_b, d["ca"]["wo"], row(d["ca"]["bo"]),
        row(d["ln2_g"]), row(d["ln2_b"]),
        # decoder FFN + out
        d["w1"], row(d["b1"]), d["w2"], row(d["b2"]), row(d["ln3_g"]), row(d["ln3_b"]),
        d["out_w"], row(d["out_b"]),
    )


def pallas_forward(packed, embed, X_tgt, X_src, tgt_mask, tgt_kpm, src_kpm):
    B, Ss, D = X_src.shape
    St = X_tgt.shape[1]
    xs = X_src.reshape(B * Ss, D).astype(jnp.float32)
    xt = jnp.take(embed, X_tgt, axis=0).reshape(B * St, D)        # embedding gather stays in XLA
    sp = jnp.where(src_kpm, NEG_INF, 0.0).astype(jnp.float32)     # [B, Ss] additive
    tp = jnp.where(tgt_kpm, NEG_INF, 0.0).astype(jnp.float32)     # [B, St] additive

    args = (xs, xt, tgt_mask.astype(jnp.float32), sp, tp) + tuple(packed)
    logits = pl.pallas_call(
        _fused_forward_kernel,
        out_shape=jax.ShapeDtypeStruct((B * St, VOCAB), jnp.float32),
        grid=(1,),
        in_specs=[pl.BlockSpec(a.shape, lambda i: (0, 0)) for a in args],
        out_specs=pl.BlockSpec((B * St, VOCAB), lambda i: (0, 0)),
        scratch_shapes=[pltpu.VMEM((B * max(Ss, St), D), jnp.float32)],
        compiler_params=pltpu.CompilerParams(dimension_semantics=("arbitrary",)),
    )(*args)
    return logits.reshape(B, St, VOCAB)


# TODO(synk): generate() beam search / KV-cache reorder is a host-side control loop (topk,
# dynamic beam reindexing) and is not kernelized; only the forward pass is.


# ----------------------------- pure-JAX reference -----------------------------

def ref_forward(params, X_tgt, X_src, tgt_mask, tgt_kpm, src_kpm):
    e, d = params["enc"], params["dec"]
    B, Ss, D = X_src.shape
    St = X_tgt.shape[1]
    H, dh = N_HEADS, HEAD_DIM

    def ln(x, g, b):
        mu = x.mean(-1, keepdims=True)
        var = ((x - mu) ** 2).mean(-1, keepdims=True)
        return (x - mu) * jax.lax.rsqrt(var + 1e-5) * g + b

    def mha(xq, xkv, w, mask_add):
        Sq, Sk = xq.shape[1], xkv.shape[1]
        def split(t, wn, bn, S):
            return (t @ w[wn] + w[bn]).reshape(B, S, H, dh).transpose(0, 2, 1, 3)
        q, k, v = split(xq, "wq", "bq", Sq), split(xkv, "wk", "bk", Sk), split(xkv, "wv", "bv", Sk)
        s = jnp.einsum("bhqd,bhkd->bhqk", q, k) / (dh ** 0.5) + mask_add[:, None, :, :]
        p = jax.nn.softmax(s, axis=-1)
        ctx = jnp.einsum("bhqk,bhkd->bhqd", p, v).transpose(0, 2, 1, 3).reshape(B, Sq, D)
        return ctx @ w["wo"] + w["bo"]

    pad_s = jnp.where(src_kpm, NEG_INF, 0.0)
    pad_t = jnp.where(tgt_kpm, NEG_INF, 0.0)

    enc_mask = jnp.broadcast_to(pad_s[:, None, :], (B, Ss, Ss))
    x = ln(X_src + mha(X_src, X_src, e["sa"], enc_mask), e["ln1_g"], e["ln1_b"])
    ffn = jnp.maximum(x @ e["w1"] + e["b1"], 0.0) @ e["w2"] + e["b2"]
    mem = ln(x + ffn, e["ln2_g"], e["ln2_b"])

    xt = jnp.take(d["embed"], X_tgt, axis=0)
    self_mask = tgt_mask[None, :, :] + pad_t[:, None, :]
    x = ln(xt + mha(xt, xt, d["sa"], self_mask), d["ln1_g"], d["ln1_b"])
    cross_mask = jnp.broadcast_to(pad_s[:, None, :], (B, St, Ss))
    x = ln(x + mha(x, mem, d["ca"], cross_mask), d["ln2_g"], d["ln2_b"])
    ffn = jnp.maximum(x @ d["w1"] + d["b1"], 0.0) @ d["w2"] + d["b2"]
    x = ln(x + ffn, d["ln3_g"], d["ln3_b"])
    return x @ d["out_w"] + d["out_b"]


# ----------------------------- parameter init -----------------------------

def init_params(key):
    keys = iter(jax.random.split(key, 64))

    def w(shape):
        return (0.02 * jax.random.normal(next(keys), shape)).astype(jnp.float32)

    def zeros(n):
        return jnp.zeros((n,), jnp.float32)

    def attn_block():
        return {
            "wq": w((D_MODEL, D_MODEL)), "bq": zeros(D_MODEL),
            "wk": w((D_MODEL, D_MODEL)), "bk": zeros(D_MODEL),
            "wv": w((D_MODEL, D_MODEL)), "bv": zeros(D_MODEL),
            "wo": w((D_MODEL, D_MODEL)), "bo": zeros(D_MODEL),
        }

    enc = {
        "sa": attn_block(),
        "ln1_g": jnp.ones((D_MODEL,), jnp.float32), "ln1_b": zeros(D_MODEL),
        "w1": w((D_MODEL, FFN_DIM)), "b1": zeros(FFN_DIM),
        "w2": w((FFN_DIM, D_MODEL)), "b2": zeros(D_MODEL),
        "ln2_g": jnp.ones((D_MODEL,), jnp.float32), "ln2_b": zeros(D_MODEL),
    }
    dec = {
        "embed": w((VOCAB, D_MODEL)),
        "sa": attn_block(),
        "ln1_g": jnp.ones((D_MODEL,), jnp.float32), "ln1_b": zeros(D_MODEL),
        "ca": attn_block(),
        "ln2_g": jnp.ones((D_MODEL,), jnp.float32), "ln2_b": zeros(D_MODEL),
        "w1": w((D_MODEL, FFN_DIM)), "b1": zeros(FFN_DIM),
        "w2": w((FFN_DIM, D_MODEL)), "b2": zeros(D_MODEL),
        "ln3_g": jnp.ones((D_MODEL,), jnp.float32), "ln3_b": zeros(D_MODEL),
        "out_w": w((D_MODEL, VOCAB)), "out_b": zeros(VOCAB),
    }
    return {"enc": enc, "dec": dec}


# ----------------------------------- main -----------------------------------

if __name__ == "__main__":
    key = jax.random.PRNGKey(0)
    k_param, k_src, k_tgt = jax.random.split(key, 3)

    B, S_SRC, S_TGT = 2, 8, 8
    params = init_params(k_param)

    X_src = jax.random.normal(k_src, (B, S_SRC, D_MODEL), jnp.float32)
    X_tgt = jax.random.randint(k_tgt, (B, S_TGT), 0, VOCAB, jnp.int32)

    # Causal additive target mask (PyTorch generate_square_subsequent_mask semantics, -inf -> -1e9).
    tgt_mask = jnp.where(jnp.triu(jnp.ones((S_TGT, S_TGT), bool), k=1),
                         NEG_INF, 0.0).astype(jnp.float32)
    # Boolean key-padding masks, True = padding.
    src_kpm = jnp.zeros((B, S_SRC), bool).at[1, -2:].set(True)
    tgt_kpm = jnp.zeros((B, S_TGT), bool).at[1, -1:].set(True)

    packed = pack_params(params)          # fuse Q|K|V (and K|V for cross-attn) once, outside jit

    fwd = jax.jit(pallas_forward)
    logits = fwd(packed, params["dec"]["embed"], X_tgt, X_src, tgt_mask, tgt_kpm, src_kpm)
    logits = jax.block_until_ready(logits)

    ref_logits = ref_forward(params, X_tgt, X_src, tgt_mask, tgt_kpm, src_kpm)
    ref_logits = jax.block_until_ready(ref_logits)

    assert logits.shape == (B, S_TGT, VOCAB), logits.shape
    assert bool(jnp.all(jnp.isfinite(logits)))
    # tolerance slightly above 1e-3 to cover the EUP approximate reciprocal in the softmax
    max_err = float(jnp.max(jnp.abs(logits - ref_logits)))
    assert max_err < 2e-3, max_err
    print("KERNEL_OK")
</pallas_src>

<mosaic_0001>
module attributes {stable_mosaic.version = 11 : i64} {
  func.func @_fused_forward_kernel(%arg0: i32, %arg1: memref<16x32xf32, #tpu.memory_space<vmem>>, %arg2: memref<16x32xf32, #tpu.memory_space<vmem>>, %arg3: memref<8x8xf32, #tpu.memory_space<vmem>>, %arg4: memref<2x8xf32, #tpu.memory_space<vmem>>, %arg5: memref<2x8xf32, #tpu.memory_space<vmem>>, %arg6: memref<32x96xf32, #tpu.memory_space<vmem>>, %arg7: memref<1x96xf32, #tpu.memory_space<vmem>>, %arg8: memref<32x32xf32, #tpu.memory_space<vmem>>, %arg9: memref<1x32xf32, #tpu.memory_space<vmem>>, %arg10: memref<1x32xf32, #tpu.memory_space<vmem>>, %arg11: memref<1x32xf32, #tpu.memory_space<vmem>>, %arg12: memref<32x64xf32, #tpu.memory_space<vmem>>, %arg13: memref<1x64xf32, #tpu.memory_space<vmem>>, %arg14: memref<64x32xf32, #tpu.memory_space<vmem>>, %arg15: memref<1x32xf32, #tpu.memory_space<vmem>>, %arg16: memref<1x32xf32, #tpu.memory_space<vmem>>, %arg17: memref<1x32xf32, #tpu.memory_space<vmem>>, %arg18: memref<32x96xf32, #tpu.memory_space<vmem>>, %arg19: memref<1x96xf32, #tpu.memory_space<vmem>>, %arg20: memref<32x32xf32, #tpu.memory_space<vmem>>, %arg21: memref<1x32xf32, #tpu.memory_space<vmem>>, %arg22: memref<1x32xf32, #tpu.memory_space<vmem>>, %arg23: memref<1x32xf32, #tpu.memory_space<vmem>>, %arg24: memref<32x32xf32, #tpu.memory_space<vmem>>, %arg25: memref<1x32xf32, #tpu.memory_space<vmem>>, %arg26: memref<32x64xf32, #tpu.memory_space<vmem>>, %arg27: memref<1x64xf32, #tpu.memory_space<vmem>>, %arg28: memref<32x32xf32, #tpu.memory_space<vmem>>, %arg29: memref<1x32xf32, #tpu.memory_space<vmem>>, %arg30: memref<1x32xf32, #tpu.memory_space<vmem>>, %arg31: memref<1x32xf32, #tpu.memory_space<vmem>>, %arg32: memref<32x64xf32, #tpu.memory_space<vmem>>, %arg33: memref<1x64xf32, #tpu.memory_space<vmem>>, %arg34: memref<64x32xf32, #tpu.memory_space<vmem>>, %arg35: memref<1x32xf32, #tpu.memory_space<vmem>>, %arg36: memref<1x32xf32, #tpu.memory_space<vmem>>, %arg37: memref<1x32xf32, #tpu.memory_space<vmem>>, %arg38: memref<32x64xf32, #tpu.memory_space<vmem>>, %arg39: memref<1x64xf32, #tpu.memory_space<vmem>>, %arg40: memref<16x64xf32, #tpu.memory_space<vmem>>, %arg41: memref<16x32xf32, #tpu.memory_space<vmem>>) attributes {dimension_semantics = [#tpu.dimension_semantics<arbitrary>], iteration_bounds = array<i64: 1>, scalar_prefetch = 0 : i64, scratch_operands = 1 : i64, tpu.core_type = #tpu.core_type<tc>, window_params = [{pipeline_mode = #tpu.pipeline_mode<synchronous>, transform_indices = @transform_0, window_bounds = array<i64: 16, 32>}, {pipeline_mode = #tpu.pipeline_mode<synchronous>, transform_indices = @transform_1, window_bounds = array<i64: 16, 32>}, {pipeline_mode = #tpu.pipeline_mode<synchronous>, transform_indices = @transform_2, window_bounds = array<i64: 8, 8>}, {pipeline_mode = #tpu.pipeline_mode<synchronous>, transform_indices = @transform_3, window_bounds = array<i64: 2, 8>}, {pipeline_mode = #tpu.pipeline_mode<synchronous>, transform_indices = @transform_4, window_bounds = array<i64: 2, 8>}, {pipeline_mode = #tpu.pipeline_mode<synchronous>, transform_indices = @transform_5, window_bounds = array<i64: 32, 96>}, {pipeline_mode = #tpu.pipeline_mode<synchronous>, transform_indices = @transform_6, window_bounds = array<i64: 1, 96>}, {pipeline_mode = #tpu.pipeline_mode<synchronous>, transform_indices = @transform_7, window_bounds = array<i64: 32, 32>}, {pipeline_mode = #tpu.pipeline_mode<synchronous>, transform_indices = @transform_8, window_bounds = array<i64: 1, 32>}, {pipeline_mode = #tpu.pipeline_mode<synchronous>, transform_indices = @transform_9, window_bounds = array<i64: 1, 32>}, {pipeline_mode = #tpu.pipeline_mode<synchronous>, transform_indices = @transform_10, window_bounds = array<i64: 1, 32>}, {pipeline_mode = #tpu.pipeline_mode<synchronous>, transform_indices = @transform_11, window_bounds = array<i64: 32, 64>}, {pipeline_mode = #tpu.pipeline_mode<synchronous>, transform_indices = @transform_12, window_bounds = array<i64: 1, 64>}, {pipeline_mode = #tpu.pipeline_mode<synchronous>, transform_indices = @transform_13, window_bounds = array<i64: 64, 32>}, {pipeline_mode = #tpu.pipeline_mode<synchronous>, transform_indices = @transform_14, window_bounds = array<i64: 1, 32>}, {pipeline_mode = #tpu.pipeline_mode<synchronous>, transform_indices = @transform_15, window_bounds = array<i64: 1, 32>}, {pipeline_mode = #tpu.pipeline_mode<synchronous>, transform_indices = @transform_16, window_bounds = array<i64: 1, 32>}, {pipeline_mode = #tpu.pipeline_mode<synchronous>, transform_indices = @transform_17, window_bounds = array<i64: 32, 96>}, {pipeline_mode = #tpu.pipeline_mode<synchronous>, transform_indices = @transform_18, window_bounds = array<i64: 1, 96>}, {pipeline_mode = #tpu.pipeline_mode<synchronous>, transform_indices = @transform_19, window_bounds = array<i64: 32, 32>}, {pipeline_mode = #tpu.pipeline_mode<synchronous>, transform_indices = @transform_20, window_bounds = array<i64: 1, 32>}, {pipeline_mode = #tpu.pipeline_mode<synchronous>, transform_indices = @transform_21, window_bounds = array<i64: 1, 32>}, {pipeline_mode = #tpu.pipeline_mode<synchronous>, transform_indices = @transform_22, window_bounds = array<i64: 1, 32>}, {pipeline_mode = #tpu.pipeline_mode<synchronous>, transform_indices = @transform_23, window_bounds = array<i64: 32, 32>}, {pipeline_mode = #tpu.pipeline_mode<synchronous>, transform_indices = @transform_24, window_bounds = array<i64: 1, 32>}, {pipeline_mode = #tpu.pipeline_mode<synchronous>, transform_indices = @transform_25, window_bounds = array<i64: 32, 64>}, {pipeline_mode = #tpu.pipeline_mode<synchronous>, transform_indices = @transform_26, window_bounds = array<i64: 1, 64>}, {pipeline_mode = #tpu.pipeline_mode<synchronous>, transform_indices = @transform_27, window_bounds = array<i64: 32, 32>}, {pipeline_mode = #tpu.pipeline_mode<synchronous>, transform_indices = @transform_28, window_bounds = array<i64: 1, 32>}, {pipeline_mode = #tpu.pipeline_mode<synchronous>, transform_indices = @transform_29, window_bounds = array<i64: 1, 32>}, {pipeline_mode = #tpu.pipeline_mode<synchronous>, transform_indices = @transform_30, window_bounds = array<i64: 1, 32>}, {pipeline_mode = #tpu.pipeline_mode<synchronous>, transform_indices = @transform_31, window_bounds = array<i64: 32, 64>}, {pipeline_mode = #tpu.pipeline_mode<synchronous>, transform_indices = @transform_32, window_bounds = array<i64: 1, 64>}, {pipeline_mode = #tpu.pipeline_mode<synchronous>, transform_indices = @transform_33, window_bounds = array<i64: 64, 32>}, {pipeline_mode = #tpu.pipeline_mode<synchronous>, transform_indices = @transform_34, window_bounds = array<i64: 1, 32>}, {pipeline_mode = #tpu.pipeline_mode<synchronous>, transform_indices = @transform_35, window_bounds = array<i64: 1, 32>}, {pipeline_mode = #tpu.pipeline_mode<synchronous>, transform_indices = @transform_36, window_bounds = array<i64: 1, 32>}, {pipeline_mode = #tpu.pipeline_mode<synchronous>, transform_indices = @transform_37, window_bounds = array<i64: 32, 64>}, {pipeline_mode = #tpu.pipeline_mode<synchronous>, transform_indices = @transform_38, window_bounds = array<i64: 1, 64>}, {pipeline_mode = #tpu.pipeline_mode<synchronous>, transform_indices = @transform_39, window_bounds = array<i64: 16, 64>}]} {
    %c0 = arith.constant 0 : index
    %c0_0 = arith.constant 0 : index
    %0 = vector.load %arg1[%c0, %c0_0] : memref<16x32xf32, #tpu.memory_space<vmem>>, vector<16x32xf32>
    %c0_1 = arith.constant 0 : index
    %c0_2 = arith.constant 0 : index
    %1 = vector.load %arg6[%c0_1, %c0_2] : memref<32x96xf32, #tpu.memory_space<vmem>>, vector<32x96xf32>
    %cst = arith.constant dense<0.000000e+00> : vector<16x96xf32>
    %2 = tpu.matmul %0, %1, %cst {dimension_numbers = #tpu.dot_dimension_numbers<[1], [0], [0], [1], [0, 0, 1, 1], [], []>} : vector<16x32xf32>, vector<32x96xf32>, vector<16x96xf32> -> vector<16x96xf32>
    %c0_3 = arith.constant 0 : index
    %c0_4 = arith.constant 0 : index
    %3 = vector.load %arg7[%c0_3, %c0_4] : memref<1x96xf32, #tpu.memory_space<vmem>>, vector<1x96xf32>
    %4 = vector.broadcast %3 : vector<1x96xf32> to vector<16x96xf32>
    %5 = arith.addf %2, %4 : vector<16x96xf32>
    %6 = vector.extract_strided_slice %5 {offsets = [0, 0], sizes = [16, 32], strides = [1, 1]} : vector<16x96xf32> to vector<16x32xf32>
    %7 = vector.extract_strided_slice %5 {offsets = [0, 32], sizes = [16, 32], strides = [1, 1]} : vector<16x96xf32> to vector<16x32xf32>
    %8 = vector.extract_strided_slice %5 {offsets = [0, 64], sizes = [16, 32], strides = [1, 1]} : vector<16x96xf32> to vector<16x32xf32>
    %9 = vector.extract_strided_slice %6 {offsets = [0, 0], sizes = [8, 32], strides = [1, 1]} : vector<16x32xf32> to vector<8x32xf32>
    %10 = vector.extract_strided_slice %7 {offsets = [0, 0], sizes = [8, 32], strides = [1, 1]} : vector<16x32xf32> to vector<8x32xf32>
    %11 = vector.extract_strided_slice %8 {offsets = [0, 0], sizes = [8, 32], strides = [1, 1]} : vector<16x32xf32> to vector<8x32xf32>
    %c0_5 = arith.constant 0 : index
    %c0_6 = arith.constant 0 : index
    %12 = vector.load %arg4[%c0_5, %c0_6] : memref<2x8xf32, #tpu.memory_space<vmem>>, vector<1x8xf32>
    %cst_7 = arith.constant 0.000000e+00 : f32
    %13 = vector.broadcast %cst_7 : f32 to vector<8x32xf32>
    %14 = vector.extract_strided_slice %9 {offsets = [0, 0], sizes = [8, 8], strides = [1, 1]} : vector<8x32xf32> to vector<8x8xf32>
    %15 = vector.extract_strided_slice %10 {offsets = [0, 0], sizes = [8, 8], strides = [1, 1]} : vector<8x32xf32> to vector<8x8xf32>
    %cst_8 = arith.constant dense<0.000000e+00> : vector<8x8xf32>
    %16 = tpu.matmul %14, %15, %cst_8 {dimension_numbers = #tpu.dot_dimension_numbers<[1], [1], [0], [0], [0, 0, 1, 0], [], []>} : vector<8x8xf32>, vector<8x8xf32>, vector<8x8xf32> -> vector<8x8xf32>
    %cst_9 = arith.constant 0.353553385 : f32
    %17 = vector.broadcast %cst_9 : f32 to vector<8x8xf32>
    %18 = arith.mulf %16, %17 : vector<8x8xf32>
    %19 = vector.broadcast %12 : vector<1x8xf32> to vector<8x8xf32>
    %20 = arith.addf %18, %19 : vector<8x8xf32>
    %cst_10 = arith.constant dense<0xFF800000> : vector<8xf32>
    %21 = vector.multi_reduction <maximumf>, %20, %cst_10 [1] : vector<8x8xf32> to vector<8xf32>
    %22 = vector.shape_cast %21 : vector<8xf32> to vector<8x1xf32>
    %23 = vector.broadcast %22 : vector<8x1xf32> to vector<8x8xf32>
    %24 = arith.subf %20, %23 : vector<8x8xf32>
    %25 = math.exp %24 : vector<8x8xf32>
    %cst_11 = arith.constant dense<0.000000e+00> : vector<8xf32>
    %26 = vector.multi_reduction <add>, %25, %cst_11 [1] : vector<8x8xf32> to vector<8xf32>
    %27 = vector.shape_cast %26 : vector<8xf32> to vector<8x1xf32>
    %28 = tpu.reciprocal %27 {approx = true} : vector<8x1xf32> -> vector<8x1xf32>
    %29 = vector.broadcast %28 : vector<8x1xf32> to vector<8x8xf32>
    %30 = arith.mulf %25, %29 : vector<8x8xf32>
    %31 = vector.extract_strided_slice %11 {offsets = [0, 0], sizes = [8, 8], strides = [1, 1]} : vector<8x32xf32> to vector<8x8xf32>
    %cst_12 = arith.constant dense<0.000000e+00> : vector<8x8xf32>
    %32 = tpu.matmul %30, %31, %cst_12 {dimension_numbers = #tpu.dot_dimension_numbers<[1], [0], [0], [1], [0, 0, 1, 1], [], []>} : vector<8x8xf32>, vector<8x8xf32>, vector<8x8xf32> -> vector<8x8xf32>
    %c0_13 = arith.constant 0 : index
    %c0_14 = arith.constant 0 : index
    %33 = vector.load %arg8[%c0_13, %c0_14] : memref<32x32xf32, #tpu.memory_space<vmem>>, vector<8x32xf32>
    %cst_15 = arith.constant dense<0.000000e+00> : vector<8x32xf32>
    %34 = tpu.matmul %32, %33, %cst_15 {dimension_numbers = #tpu.dot_dimension_numbers<[1], [0], [0], [1], [0, 0, 1, 1], [], []>} : vector<8x8xf32>, vector<8x32xf32>, vector<8x32xf32> -> vector<8x32xf32>
    %35 = arith.addf %13, %34 : vector<8x32xf32>
    %36 = vector.extract_strided_slice %9 {offsets = [0, 8], sizes = [8, 8], strides = [1, 1]} : vector<8x32xf32> to vector<8x8xf32>
    %37 = vector.extract_strided_slice %10 {offsets = [0, 8], sizes = [8, 8], strides = [1, 1]} : vector<8x32xf32> to vector<8x8xf32>
    %cst_16 = arith.constant dense<0.000000e+00> : vector<8x8xf32>
    %38 = tpu.matmul %36, %37, %cst_16 {dimension_numbers = #tpu.dot_dimension_numbers<[1], [1], [0], [0], [0, 0, 1, 0], [], []>} : vector<8x8xf32>, vector<8x8xf32>, vector<8x8xf32> -> vector<8x8xf32>
    %cst_17 = arith.constant 0.353553385 : f32
    %39 = vector.broadcast %cst_17 : f32 to vector<8x8xf32>
    %40 = arith.mulf %38, %39 : vector<8x8xf32>
    %41 = vector.broadcast %12 : vector<1x8xf32> to vector<8x8xf32>
    %42 = arith.addf %40, %41 : vector<8x8xf32>
    %cst_18 = arith.constant dense<0xFF800000> : vector<8xf32>
    %43 = vector.multi_reduction <maximumf>, %42, %cst_18 [1] : vector<8x8xf32> to vector<8xf32>
    %44 = vector.shape_cast %43 : vector<8xf32> to vector<8x1xf32>
    %45 = vector.broadcast %44 : vector<8x1xf32> to vector<8x8xf32>
    %46 = arith.subf %42, %45 : vector<8x8xf32>
    %47 = math.exp %46 : vector<8x8xf32>
    %cst_19 = arith.constant dense<0.000000e+00> : vector<8xf32>
    %48 = vector.multi_reduction <add>, %47, %cst_19 [1] : vector<8x8xf32> to vector<8xf32>
    %49 = vector.shape_cast %48 : vector<8xf32> to vector<8x1xf32>
    %50 = tpu.reciprocal %49 {approx = true} : vector<8x1xf32> -> vector<8x1xf32>
    %51 = vector.broadcast %50 : vector<8x1xf32> to vector<8x8xf32>
    %52 = arith.mulf %47, %51 : vector<8x8xf32>
    %53 = vector.extract_strided_slice %11 {offsets = [0, 8], sizes = [8, 8], strides = [1, 1]} : vector<8x32xf32> to vector<8x8xf32>
    %cst_20 = arith.constant dense<0.000000e+00> : vector<8x8xf32>
    %54 = tpu.matmul %52, %53, %cst_20 {dimension_numbers = #tpu.dot_dimension_numbers<[1], [0], [0], [1], [0, 0, 1, 1], [], []>} : vector<8x8xf32>, vector<8x8xf32>, vector<8x8xf32> -> vector<8x8xf32>
    %c8 = arith.constant 8 : index
    %c0_21 = arith.constant 0 : index
    %55 = vector.load %arg8[%c8, %c0_21] : memref<32x32xf32, #tpu.memory_space<vmem>>, vector<8x32xf32>
    %cst_22 = arith.constant dense<0.000000e+00> : vector<8x32xf32>
    %56 = tpu.matmul %54, %55, %cst_22 {dimension_numbers = #tpu.dot_dimension_numbers<[1], [0], [0], [1], [0, 0, 1, 1], [], []>} : vector<8x8xf32>, vector<8x32xf32>, vector<8x32xf32> -> vector<8x32xf32>
    %57 = arith.addf %35, %56 : vector<8x32xf32>
    %58 = vector.extract_strided_slice %9 {offsets = [0, 16], sizes = [8, 8], strides = [1, 1]} : vector<8x32xf32> to vector<8x8xf32>
    %59 = vector.extract_strided_slice %10 {offsets = [0, 16], sizes = [8, 8], strides = [1, 1]} : vector<8x32xf32> to vector<8x8xf32>
    %cst_23 = arith.constant dense<0.000000e+00> : vector<8x8xf32>
    %60 = tpu.matmul %58, %59, %cst_23 {dimension_numbers = #tpu.dot_dimension_numbers<[1], [1], [0], [0], [0, 0, 1, 0], [], []>} : vector<8x8xf32>, vector<8x8xf32>, vector<8x8xf32> -> vector<8x8xf32>
    %cst_24 = arith.constant 0.353553385 : f32
    %61 = vector.broadcast %cst_24 : f32 to vector<8x8xf32>
    %62 = arith.mulf %60, %61 : vector<8x8xf32>
    %63 = vector.broadcast %12 : vector<1x8xf32> to vector<8x8xf32>
    %64 = arith.addf %62, %63 : vector<8x8xf32>
    %cst_25 = arith.constant dense<0xFF800000> : vector<8xf32>
    %65 = vector.multi_reduction <maximumf>, %64, %cst_25 [1] : vector<8x8xf32> to vector<8xf32>
    %66 = vector.shape_cast %65 : vector<8xf32> to vector<8x1xf32>
    %67 = vector.broadcast %66 : vector<8x1xf32> to vector<8x8xf32>
    %68 = arith.subf %64, %67 : vector<8x8xf32>
    %69 = math.exp %68 : vector<8x8xf32>
    %cst_26 = arith.constant dense<0.000000e+00> : vector<8xf32>
    %70 = vector.multi_reduction <add>, %69, %cst_26 [1] : vector<8x8xf32> to vector<8xf32>
    %71 = vector.shape_cast %70 : vector<8xf32> to vector<8x1xf32>
    %72 = tpu.reciprocal %71 {approx = true} : vector<8x1xf32> -> vector<8x1xf32>
    %73 = vector.broadcast %72 : vector<8x1xf32> to vector<8x8xf32>
    %74 = arith.mulf %69, %73 : vector<8x8xf32>
    %75 = vector.extract_strided_slice %11 {offsets = [0, 16], sizes = [8, 8], strides = [1, 1]} : vector<8x32xf32> to vector<8x8xf32>
    %cst_27 = arith.constant dense<0.000000e+00> : vector<8x8xf32>
    %76 = tpu.matmul %74, %75, %cst_27 {dimension_numbers = #tpu.dot_dimension_numbers<[1], [0], [0], [1], [0, 0, 1, 1], [], []>} : vector<8x8xf32>, vector<8x8xf32>, vector<8x8xf32> -> vector<8x8xf32>
    %c16 = arith.constant 16 : index
    %c0_28 = arith.constant 0 : index
    %77 = vector.load %arg8[%c16, %c0_28] : memref<32x32xf32, #tpu.memory_space<vmem>>, vector<8x32xf32>
    %cst_29 = arith.constant dense<0.000000e+00> : vector<8x32xf32>
    %78 = tpu.matmul %76, %77, %cst_29 {dimension_numbers = #tpu.dot_dimension_numbers<[1], [0], [0], [1], [0, 0, 1, 1], [], []>} : vector<8x8xf32>, vector<8x32xf32>, vector<8x32xf32> -> vector<8x32xf32>
    %79 = arith.addf %57, %78 : vector<8x32xf32>
    %80 = vector.extract_strided_slice %9 {offsets = [0, 24], sizes = [8, 8], strides = [1, 1]} : vector<8x32xf32> to vector<8x8xf32>
    %81 = vector.extract_strided_slice %10 {offsets = [0, 24], sizes = [8, 8], strides = [1, 1]} : vector<8x32xf32> to vector<8x8xf32>
    %cst_30 = arith.constant dense<0.000000e+00> : vector<8x8xf32>
    %82 = tpu.matmul %80, %81, %cst_30 {dimension_numbers = #tpu.dot_dimension_numbers<[1], [1], [0], [0], [0, 0, 1, 0], [], []>} : vector<8x8xf32>, vector<8x8xf32>, vector<8x8xf32> -> vector<8x8xf32>
    %cst_31 = arith.constant 0.353553385 : f32
    %83 = vector.broadcast %cst_31 : f32 to vector<8x8xf32>
    %84 = arith.mulf %82, %83 : vector<8x8xf32>
    %85 = vector.broadcast %12 : vector<1x8xf32> to vector<8x8xf32>
    %86 = arith.addf %84, %85 : vector<8x8xf32>
    %cst_32 = arith.constant dense<0xFF800000> : vector<8xf32>
    %87 = vector.multi_reduction <maximumf>, %86, %cst_32 [1] : vector<8x8xf32> to vector<8xf32>
    %88 = vector.shape_cast %87 : vector<8xf32> to vector<8x1xf32>
    %89 = vector.broadcast %88 : vector<8x1xf32> to vector<8x8xf32>
    %90 = arith.subf %86, %89 : vector<8x8xf32>
    %91 = math.exp %90 : vector<8x8xf32>
    %cst_33 = arith.constant dense<0.000000e+00> : vector<8xf32>
    %92 = vector.multi_reduction <add>, %91, %cst_33 [1] : vector<8x8xf32> to vector<8xf32>
    %93 = vector.shape_cast %92 : vector<8xf32> to vector<8x1xf32>
    %94 = tpu.reciprocal %93 {approx = true} : vector<8x1xf32> -> vector<8x1xf32>
    %95 = vector.broadcast %94 : vector<8x1xf32> to vector<8x8xf32>
    %96 = arith.mulf %91, %95 : vector<8x8xf32>
    %97 = vector.extract_strided_slice %11 {offsets = [0, 24], sizes = [8, 8], strides = [1, 1]} : vector<8x32xf32> to vector<8x8xf32>
    %cst_34 = arith.constant dense<0.000000e+00> : vector<8x8xf32>
    %98 = tpu.matmul %96, %97, %cst_34 {dimension_numbers = #tpu.dot_dimension_numbers<[1], [0], [0], [1], [0, 0, 1, 1], [], []>} : vector<8x8xf32>, vector<8x8xf32>, vector<8x8xf32> -> vector<8x8xf32>
    %c24 = arith.constant 24 : index
    %c0_35 = arith.constant 0 : index
    %99 = vector.load %arg8[%c24, %c0_35] : memref<32x32xf32, #tpu.memory_space<vmem>>, vector<8x32xf32>
    %cst_36 = arith.constant dense<0.000000e+00> : vector<8x32xf32>
    %100 = tpu.matmul %98, %99, %cst_36 {dimension_numbers = #tpu.dot_dimension_numbers<[1], [0], [0], [1], [0, 0, 1, 1], [], []>} : vector<8x8xf32>, vector<8x32xf32>, vector<8x32xf32> -> vector<8x32xf32>
    %101 = arith.addf %79, %100 : vector<8x32xf32>
    %c0_37 = arith.constant 0 : index
    %c0_38 = arith.constant 0 : index
    %102 = vector.load %arg9[%c0_37, %c0_38] : memref<1x32xf32, #tpu.memory_space<vmem>>, vector<1x32xf32>
    %103 = vector.broadcast %102 : vector<1x32xf32> to vector<8x32xf32>
    %104 = arith.addf %101, %103 : vector<8x32xf32>
    %c0_39 = arith.constant 0 : index
    %c0_40 = arith.constant 0 : index
    %105 = vector.load %arg41[%c0_39, %c0_40] : memref<16x32xf32, #tpu.memory_space<vmem>>, vector<8x32xf32>
    tpu.vector_store %arg41[%c0_39, %c0_40], %104 {strides = array<i32>} : memref<16x32xf32, #tpu.memory_space<vmem>>, vector<8x32xf32>,
    %106 = vector.extract_strided_slice %6 {offsets = [8, 0], sizes = [8, 32], strides = [1, 1]} : vector<16x32xf32> to vector<8x32xf32>
    %107 = vector.extract_strided_slice %7 {offsets = [8, 0], sizes = [8, 32], strides = [1, 1]} : vector<16x32xf32> to vector<8x32xf32>
    %108 = vector.extract_strided_slice %8 {offsets = [8, 0], sizes = [8, 32], strides = [1, 1]} : vector<16x32xf32> to vector<8x32xf32>
    %c1 = arith.constant 1 : index
    %c0_41 = arith.constant 0 : index
    %109 = vector.load %arg4[%c1, %c0_41] : memref<2x8xf32, #tpu.memory_space<vmem>>, vector<1x8xf32>
    %cst_42 = arith.constant 0.000000e+00 : f32
    %110 = vector.broadcast %cst_42 : f32 to vector<8x32xf32>
    %111 = vector.extract_strided_slice %106 {offsets = [0, 0], sizes = [8, 8], strides = [1, 1]} : vector<8x32xf32> to vector<8x8xf32>
    %112 = vector.extract_strided_slice %107 {offsets = [0, 0], sizes = [8, 8], strides = [1, 1]} : vector<8x32xf32> to vector<8x8xf32>
    %cst_43 = arith.constant dense<0.000000e+00> : vector<8x8xf32>
    %113 = tpu.matmul %111, %112, %cst_43 {dimension_numbers = #tpu.dot_dimension_numbers<[1], [1], [0], [0], [0, 0, 1, 0], [], []>} : vector<8x8xf32>, vector<8x8xf32>, vector<8x8xf32> -> vector<8x8xf32>
    %cst_44 = arith.constant 0.353553385 : f32
    %114 = vector.broadcast %cst_44 : f32 to vector<8x8xf32>
    %115 = arith.mulf %113, %114 : vector<8x8xf32>
    %116 = vector.broadcast %109 : vector<1x8xf32> to vector<8x8xf32>
    %117 = arith.addf %115, %116 : vector<8x8xf32>
    %cst_45 = arith.constant dense<0xFF800000> : vector<8xf32>
    %118 = vector.multi_reduction <maximumf>, %117, %cst_45 [1] : vector<8x8xf32> to vector<8xf32>
    %119 = vector.shape_cast %118 : vector<8xf32> to vector<8x1xf32>
    %120 = vector.broadcast %119 : vector<8x1xf32> to vector<8x8xf32>
    %121 = arith.subf %117, %120 : vector<8x8xf32>
    %122 = math.exp %121 : vector<8x8xf32>
    %cst_46 = arith.constant dense<0.000000e+00> : vector<8xf32>
    %123 = vector.multi_reduction <add>, %122, %cst_46 [1] : vector<8x8xf32> to vector<8xf32>
    %124 = vector.shape_cast %123 : vector<8xf32> to vector<8x1xf32>
    %125 = tpu.reciprocal %124 {approx = true} : vector<8x1xf32> -> vector<8x1xf32>
    %126 = vector.broadcast %125 : vector<8x1xf32> to vector<8x8xf32>
    %127 = arith.mulf %122, %126 : vector<8x8xf32>
    %128 = vector.extract_strided_slice %108 {offsets = [0, 0], sizes = [8, 8], strides = [1, 1]} : vector<8x32xf32> to vector<8x8xf32>
    %cst_47 = arith.constant dense<0.000000e+00> : vector<8x8xf32>
    %129 = tpu.matmul %127, %128, %cst_47 {dimension_numbers = #tpu.dot_dimension_numbers<[1], [0], [0], [1], [0, 0, 1, 1], [], []>} : vector<8x8xf32>, vector<8x8xf32>, vector<8x8xf32> -> vector<8x8xf32>
    %c0_48 = arith.constant 0 : index
    %c0_49 = arith.constant 0 : index
    %130 = vector.load %arg8[%c0_48, %c0_49] : memref<32x32xf32, #tpu.memory_space<vmem>>, vector<8x32xf32>
    %cst_50 = arith.constant dense<0.000000e+00> : vector<8x32xf32>
    %131 = tpu.matmul %129, %130, %cst_50 {dimension_numbers = #tpu.dot_dimension_numbers<[1], [0], [0], [1], [0, 0, 1, 1], [], []>} : vector<8x8xf32>, vector<8x32xf32>, vector<8x32xf32> -> vector<8x32xf32>
    %132 = arith.addf %110, %131 : vector<8x32xf32>
    %133 = vector.extract_strided_slice %106 {offsets = [0, 8], sizes = [8, 8], strides = [1, 1]} : vector<8x32xf32> to vector<8x8xf32>
    %134 = vector.extract_strided_slice %107 {offsets = [0, 8], sizes = [8, 8], strides = [1, 1]} : vector<8x32xf32> to vector<8x8xf32>
    %cst_51 = arith.constant dense<0.000000e+00> : vector<8x8xf32>
    %135 = tpu.matmul %133, %134, %cst_51 {dimension_numbers = #tpu.dot_dimension_numbers<[1], [1], [0], [0], [0, 0, 1, 0], [], []>} : vector<8x8xf32>, vector<8x8xf32>, vector<8x8xf32> -> vector<8x8xf32>
    %cst_52 = arith.constant 0.353553385 : f32
    %136 = vector.broadcast %cst_52 : f32 to vector<8x8xf32>
    %137 = arith.mulf %135, %136 : vector<8x8xf32>
    %138 = vector.broadcast %109 : vector<1x8xf32> to vector<8x8xf32>
    %139 = arith.addf %137, %138 : vector<8x8xf32>
    %cst_53 = arith.constant dense<0xFF800000> : vector<8xf32>
    %140 = vector.multi_reduction <maximumf>, %139, %cst_53 [1] : vector<8x8xf32> to vector<8xf32>
    %141 = vector.shape_cast %140 : vector<8xf32> to vector<8x1xf32>
    %142 = vector.broadcast %141 : vector<8x1xf32> to vector<8x8xf32>
    %143 = arith.subf %139, %142 : vector<8x8xf32>
    %144 = math.exp %143 : vector<8x8xf32>
    %cst_54 = arith.constant dense<0.000000e+00> : vector<8xf32>
    %145 = vector.multi_reduction <add>, %144, %cst_54 [1] : vector<8x8xf32> to vector<8xf32>
    %146 = vector.shape_cast %145 : vector<8xf32> to vector<8x1xf32>
    %147 = tpu.reciprocal %146 {approx = true} : vector<8x1xf32> -> vector<8x1xf32>
    %148 = vector.broadcast %147 : vector<8x1xf32> to vector<8x8xf32>
    %149 = arith.mulf %144, %148 : vector<8x8xf32>
    %150 = vector.extract_strided_slice %108 {offsets = [0, 8], sizes = [8, 8], strides = [1, 1]} : vector<8x32xf32> to vector<8x8xf32>
    %cst_55 = arith.constant dense<0.000000e+00> : vector<8x8xf32>
    %151 = tpu.matmul %149, %150, %cst_55 {dimension_numbers = #tpu.dot_dimension_numbers<[1], [0], [0], [1], [0, 0, 1, 1], [], []>} : vector<8x8xf32>, vector<8x8xf32>, vector<8x8xf32> -> vector<8x8xf32>
    %c8_56 = arith.constant 8 : index
    %c0_57 = arith.constant 0 : index
    %152 = vector.load %arg8[%c8_56, %c0_57] : memref<32x32xf32, #tpu.memory_space<vmem>>, vector<8x32xf32>
    %cst_58 = arith.constant dense<0.000000e+00> : vector<8x32xf32>
    %153 = tpu.matmul %151, %152, %cst_58 {dimension_numbers = #tpu.dot_dimension_numbers<[1], [0], [0], [1], [0, 0, 1, 1], [], []>} : vector<8x8xf32>, vector<8x32xf32>, vector<8x32xf32> -> vector<8x32xf32>
    %154 = arith.addf %132, %153 : vector<8x32xf32>
    %155 = vector.extract_strided_slice %106 {offsets = [0, 16], sizes = [8, 8], strides = [1, 1]} : vector<8x32xf32> to vector<8x8xf32>
    %156 = vector.extract_strided_slice %107 {offsets = [0, 16], sizes = [8, 8], strides = [1, 1]} : vector<8x32xf32> to vector<8x8xf32>
    %cst_59 = arith.constant dense<0.000000e+00> : vector<8x8xf32>
    %157 = tpu.matmul %155, %156, %cst_59 {dimension_numbers = #tpu.dot_dimension_numbers<[1], [1], [0], [0], [0, 0, 1, 0], [], []>} : vector<8x8xf32>, vector<8x8xf32>, vector<8x8xf32> -> vector<8x8xf32>
    %cst_60 = arith.constant 0.353553385 : f32
    %158 = vector.broadcast %cst_60 : f32 to vector<8x8xf32>
    %159 = arith.mulf %157, %158 : vector<8x8xf32>
    %160 = vector.broadcast %109 : vector<1x8xf32> to vector<8x8xf32>
    %161 = arith.addf %159, %160 : vector<8x8xf32>
    %cst_61 = arith.constant dense<0xFF800000> : vector<8xf32>
    %162 = vector.multi_reduction <maximumf>, %161, %cst_61 [1] : vector<8x8xf32> to vector<8xf32>
    %163 = vector.shape_cast %162 : vector<8xf32> to vector<8x1xf32>
    %164 = vector.broadcast %163 : vector<8x1xf32> to vector<8x8xf32>
    %165 = arith.subf %161, %164 : vector<8x8xf32>
    %166 = math.exp %165 : vector<8x8xf32>
    %cst_62 = arith.constant dense<0.000000e+00> : vector<8xf32>
    %167 = vector.multi_reduction <add>, %166, %cst_62 [1] : vector<8x8xf32> to vector<8xf32>
    %168 = vector.shape_cast %167 : vector<8xf32> to vector<8x1xf32>
    %169 = tpu.reciprocal %168 {approx = true} : vector<8x1xf32> -> vector<8x1xf32>
    %170 = vector.broadcast %169 : vector<8x1xf32> to vector<8x8xf32>
    %171 = arith.mulf %166, %170 : vector<8x8xf32>
    %172 = vector.extract_strided_slice %108 {offsets = [0, 16], sizes = [8, 8], strides = [1, 1]} : vector<8x32xf32> to vector<8x8xf32>
    %cst_63 = arith.constant dense<0.000000e+00> : vector<8x8xf32>
    %173 = tpu.matmul %171, %172, %cst_63 {dimension_numbers = #tpu.dot_dimension_numbers<[1], [0], [0], [1], [0, 0, 1, 1], [], []>} : vector<8x8xf32>, vector<8x8xf32>, vector<8x8xf32> -> vector<8x8xf32>
    %c16_64 = arith.constant 16 : index
    %c0_65 = arith.constant 0 : index
    %174 = vector.load %arg8[%c16_64, %c0_65] : memref<32x32xf32, #tpu.memory_space<vmem>>, vector<8x32xf32>
    %cst_66 = arith.constant dense<0.000000e+00> : vector<8x32xf32>
    %175 = tpu.matmul %173, %174, %cst_66 {dimension_numbers = #tpu.dot_dimension_numbers<[1], [0], [0], [1], [0, 0, 1, 1], [], []>} : vector<8x8xf32>, vector<8x32xf32>, vector<8x32xf32> -> vector<8x32xf32>
    %176 = arith.addf %154, %175 : vector<8x32xf32>
    %177 = vector.extract_strided_slice %106 {offsets = [0, 24], sizes = [8, 8], strides = [1, 1]} : vector<8x32xf32> to vector<8x8xf32>
    %178 = vector.extract_strided_slice %107 {offsets = [0, 24], sizes = [8, 8], strides = [1, 1]} : vector<8x32xf32> to vector<8x8xf32>
    %cst_67 = arith.constant dense<0.000000e+00> : vector<8x8xf32>
    %179 = tpu.matmul %177, %178, %cst_67 {dimension_numbers = #tpu.dot_dimension_numbers<[1], [1], [0], [0], [0, 0, 1, 0], [], []>} : vector<8x8xf32>, vector<8x8xf32>, vector<8x8xf32> -> vector<8x8xf32>
    %cst_68 = arith.constant 0.353553385 : f32
    %180 = vector.broadcast %cst_68 : f32 to vector<8x8xf32>
    %181 = arith.mulf %179, %180 : vector<8x8xf32>
    %182 = vector.broadcast %109 : vector<1x8xf32> to vector<8x8xf32>
    %183 = arith.addf %181, %182 : vector<8x8xf32>
    %cst_69 = arith.constant dense<0xFF800000> : vector<8xf32>
    %184 = vector.multi_reduction <maximumf>, %183, %cst_69 [1] : vector<8x8xf32> to vector<8xf32>
    %185 = vector.shape_cast %184 : vector<8xf32> to vector<8x1xf32>
    %186 = vector.broadcast %185 : vector<8x1xf32> to vector<8x8xf32>
    %187 = arith.subf %183, %186 : vector<8x8xf32>
    %188 = math.exp %187 : vector<8x8xf32>
    %cst_70 = arith.constant dense<0.000000e+00> : vector<8xf32>
    %189 = vector.multi_reduction <add>, %188, %cst_70 [1] : vector<8x8xf32> to vector<8xf32>
    %190 = vector.shape_cast %189 : vector<8xf32> to vector<8x1xf32>
    %191 = tpu.reciprocal %190 {approx = true} : vector<8x1xf32> -> vector<8x1xf32>
    %192 = vector.broadcast %191 : vector<8x1xf32> to vector<8x8xf32>
    %193 = arith.mulf %188, %192 : vector<8x8xf32>
    %194 = vector.extract_strided_slice %108 {offsets = [0, 24], sizes = [8, 8], strides = [1, 1]} : vector<8x32xf32> to vector<8x8xf32>
    %cst_71 = arith.constant dense<0.000000e+00> : vector<8x8xf32>
    %195 = tpu.matmul %193, %194, %cst_71 {dimension_numbers = #tpu.dot_dimension_numbers<[1], [0], [0], [1], [0, 0, 1, 1], [], []>} : vector<8x8xf32>, vector<8x8xf32>, vector<8x8xf32> -> vector<8x8xf32>
    %c24_72 = arith.constant 24 : index
    %c0_73 = arith.constant 0 : index
    %196 = vector.load %arg8[%c24_72, %c0_73] : memref<32x32xf32, #tpu.memory_space<vmem>>, vector<8x32xf32>
    %cst_74 = arith.constant dense<0.000000e+00> : vector<8x32xf32>
    %197 = tpu.matmul %195, %196, %cst_74 {dimension_numbers = #tpu.dot_dimension_numbers<[1], [0], [0], [1], [0, 0, 1, 1], [], []>} : vector<8x8xf32>, vector<8x32xf32>, vector<8x32xf32> -> vector<8x32xf32>
    %198 = arith.addf %176, %197 : vector<8x32xf32>
    %c0_75 = arith.constant 0 : index
    %c0_76 = arith.constant 0 : index
    %199 = vector.load %arg9[%c0_75, %c0_76] : memref<1x32xf32, #tpu.memory_space<vmem>>, vector<1x32xf32>
    %200 = vector.broadcast %199 : vector<1x32xf32> to vector<8x32xf32>
    %201 = arith.addf %198, %200 : vector<8x32xf32>
    %c8_77 = arith.constant 8 : index
    %c0_78 = arith.constant 0 : index
    %202 = vector.load %arg41[%c8_77, %c0_78] : memref<16x32xf32, #tpu.memory_space<vmem>>, vector<8x32xf32>
    tpu.vector_store %arg41[%c8_77, %c0_78], %201 {strides = array<i32>} : memref<16x32xf32, #tpu.memory_space<vmem>>, vector<8x32xf32>,
    %c0_79 = arith.constant 0 : index
    %c0_80 = arith.constant 0 : index
    %203 = vector.load %arg41[%c0_79, %c0_80] : memref<16x32xf32, #tpu.memory_space<vmem>>, vector<16x32xf32>
    %204 = arith.addf %0, %203 : vector<16x32xf32>
    %cst_81 = arith.constant dense<0.000000e+00> : vector<16xf32>
    %205 = vector.multi_reduction <add>, %204, %cst_81 [1] : vector<16x32xf32> to vector<16xf32>
    %206 = vector.shape_cast %205 : vector<16xf32> to vector<16x1xf32>
    %cst_82 = arith.constant 3.200000e+01 : f32
    %207 = vector.broadcast %cst_82 : f32 to vector<16x1xf32>
    %208 = arith.divf %206, %207 : vector<16x1xf32>
    %209 = vector.broadcast %208 : vector<16x1xf32> to vector<16x32xf32>
    %210 = arith.subf %204, %209 : vector<16x32xf32>
    %211 = arith.mulf %210, %210 : vector<16x32xf32>
    %cst_83 = arith.constant dense<0.000000e+00> : vector<16xf32>
    %212 = vector.multi_reduction <add>, %211, %cst_83 [1] : vector<16x32xf32> to vector<16xf32>
    %213 = vector.shape_cast %212 : vector<16xf32> to vector<16x1xf32>
    %cst_84 = arith.constant 3.200000e+01 : f32
    %214 = vector.broadcast %cst_84 : f32 to vector<16x1xf32>
    %215 = arith.divf %213, %214 : vector<16x1xf32>
    %216 = vector.broadcast %208 : vector<16x1xf32> to vector<16x32xf32>
    %217 = arith.subf %204, %216 : vector<16x32xf32>
    %cst_85 = arith.constant 9.99999974E-6 : f32
    %218 = vector.broadcast %cst_85 : f32 to vector<16x1xf32>
    %219 = arith.addf %215, %218 : vector<16x1xf32>
    %220 = math.rsqrt %219 : vector<16x1xf32>
    %221 = vector.broadcast %220 : vector<16x1xf32> to vector<16x32xf32>
    %222 = arith.mulf %217, %221 : vector<16x32xf32>
    %c0_86 = arith.constant 0 : index
    %c0_87 = arith.constant 0 : index
    %223 = vector.load %arg10[%c0_86, %c0_87] : memref<1x32xf32, #tpu.memory_space<vmem>>, vector<1x32xf32>
    %224 = vector.broadcast %223 : vector<1x32xf32> to vector<16x32xf32>
    %225 = arith.mulf %222, %224 : vector<16x32xf32>
    %c0_88 = arith.constant 0 : index
    %c0_89 = arith.constant 0 : index
    %226 = vector.load %arg11[%c0_88, %c0_89] : memref<1x32xf32, #tpu.memory_space<vmem>>, vector<1x32xf32>
    %227 = vector.broadcast %226 : vector<1x32xf32> to vector<16x32xf32>
    %228 = arith.addf %225, %227 : vector<16x32xf32>
    %c0_90 = arith.constant 0 : index
    %c0_91 = arith.constant 0 : index
    %229 = vector.load %arg12[%c0_90, %c0_91] : memref<32x64xf32, #tpu.memory_space<vmem>>, vector<32x64xf32>
    %cst_92 = arith.constant dense<0.000000e+00> : vector<16x64xf32>
    %230 = tpu.matmul %228, %229, %cst_92 {dimension_numbers = #tpu.dot_dimension_numbers<[1], [0], [0], [1], [0, 0, 1, 1], [], []>} : vector<16x32xf32>, vector<32x64xf32>, vector<16x64xf32> -> vector<16x64xf32>
    %c0_93 = arith.constant 0 : index
    %c0_94 = arith.constant 0 : index
    %231 = vector.load %arg13[%c0_93, %c0_94] : memref<1x64xf32, #tpu.memory_space<vmem>>, vector<1x64xf32>
    %232 = vector.broadcast %231 : vector<1x64xf32> to vector<16x64xf32>
    %233 = arith.addf %230, %232 : vector<16x64xf32>
    %cst_95 = arith.constant 0.000000e+00 : f32
    %234 = vector.broadcast %cst_95 : f32 to vector<16x64xf32>
    %235 = arith.maximumf %233, %234 : vector<16x64xf32>
    %c0_96 = arith.constant 0 : index
    %c0_97 = arith.constant 0 : index
    %236 = vector.load %arg14[%c0_96, %c0_97] : memref<64x32xf32, #tpu.memory_space<vmem>>, vector<64x32xf32>
    %cst_98 = arith.constant dense<0.000000e+00> : vector<16x32xf32>
    %237 = tpu.matmul %235, %236, %cst_98 {dimension_numbers = #tpu.dot_dimension_numbers<[1], [0], [0], [1], [0, 0, 1, 1], [], []>} : vector<16x64xf32>, vector<64x32xf32>, vector<16x32xf32> -> vector<16x32xf32>
    %c0_99 = arith.constant 0 : index
    %c0_100 = arith.constant 0 : index
    %238 = vector.load %arg15[%c0_99, %c0_100] : memref<1x32xf32, #tpu.memory_space<vmem>>, vector<1x32xf32>
    %239 = vector.broadcast %238 : vector<1x32xf32> to vector<16x32xf32>
    %240 = arith.addf %237, %239 : vector<16x32xf32>
    %241 = arith.addf %228, %240 : vector<16x32xf32>
    %cst_101 = arith.constant dense<0.000000e+00> : vector<16xf32>
    %242 = vector.multi_reduction <add>, %241, %cst_101 [1] : vector<16x32xf32> to vector<16xf32>
    %243 = vector.shape_cast %242 : vector<16xf32> to vector<16x1xf32>
    %cst_102 = arith.constant 3.200000e+01 : f32
    %244 = vector.broadcast %cst_102 : f32 to vector<16x1xf32>
    %245 = arith.divf %243, %244 : vector<16x1xf32>
    %246 = vector.broadcast %245 : vector<16x1xf32> to vector<16x32xf32>
    %247 = arith.subf %241, %246 : vector<16x32xf32>
    %248 = arith.mulf %247, %247 : vector<16x32xf32>
    %cst_103 = arith.constant dense<0.000000e+00> : vector<16xf32>
    %249 = vector.multi_reduction <add>, %248, %cst_103 [1] : vector<16x32xf32> to vector<16xf32>
    %250 = vector.shape_cast %249 : vector<16xf32> to vector<16x1xf32>
    %cst_104 = arith.constant 3.200000e+01 : f32
    %251 = vector.broadcast %cst_104 : f32 to vector<16x1xf32>
    %252 = arith.divf %250, %251 : vector<16x1xf32>
    %253 = vector.broadcast %245 : vector<16x1xf32> to vector<16x32xf32>
    %254 = arith.subf %241, %253 : vector<16x32xf32>
    %cst_105 = arith.constant 9.99999974E-6 : f32
    %255 = vector.broadcast %cst_105 : f32 to vector<16x1xf32>
    %256 = arith.addf %252, %255 : vector<16x1xf32>
    %257 = math.rsqrt %256 : vector<16x1xf32>
    %258 = vector.broadcast %257 : vector<16x1xf32> to vector<16x32xf32>
    %259 = arith.mulf %254, %258 : vector<16x32xf32>
    %c0_106 = arith.constant 0 : index
    %c0_107 = arith.constant 0 : index
    %260 = vector.load %arg16[%c0_106, %c0_107] : memref<1x32xf32, #tpu.memory_space<vmem>>, vector<1x32xf32>
    %261 = vector.broadcast %260 : vector<1x32xf32> to vector<16x32xf32>
    %262 = arith.mulf %259, %261 : vector<16x32xf32>
    %c0_108 = arith.constant 0 : index
    %c0_109 = arith.constant 0 : index
    %263 = vector.load %arg17[%c0_108, %c0_109] : memref<1x32xf32, #tpu.memory_space<vmem>>, vector<1x32xf32>
    %264 = vector.broadcast %263 : vector<1x32xf32> to vector<16x32xf32>
    %265 = arith.addf %262, %264 : vector<16x32xf32>
    %c0_110 = arith.constant 0 : index
    %c0_111 = arith.constant 0 : index
    %266 = vector.load %arg2[%c0_110, %c0_111] : memref<16x32xf32, #tpu.memory_space<vmem>>, vector<16x32xf32>
    %c0_112 = arith.constant 0 : index
    %c0_113 = arith.constant 0 : index
    %267 = vector.load %arg18[%c0_112, %c0_113] : memref<32x96xf32, #tpu.memory_space<vmem>>, vector<32x96xf32>
    %cst_114 = arith.constant dense<0.000000e+00> : vector<16x96xf32>
    %268 = tpu.matmul %266, %267, %cst_114 {dimension_numbers = #tpu.dot_dimension_numbers<[1], [0], [0], [1], [0, 0, 1, 1], [], []>} : vector<16x32xf32>, vector<32x96xf32>, vector<16x96xf32> -> vector<16x96xf32>
    %c0_115 = arith.constant 0 : index
    %c0_116 = arith.constant 0 : index
    %269 = vector.load %arg19[%c0_115, %c0_116] : memref<1x96xf32, #tpu.memory_space<vmem>>, vector<1x96xf32>
    %270 = vector.broadcast %269 : vector<1x96xf32> to vector<16x96xf32>
    %271 = arith.addf %268, %270 : vector<16x96xf32>
    %272 = vector.extract_strided_slice %271 {offsets = [0, 0], sizes = [16, 32], strides = [1, 1]} : vector<16x96xf32> to vector<16x32xf32>
    %273 = vector.extract_strided_slice %271 {offsets = [0, 32], sizes = [16, 32], strides = [1, 1]} : vector<16x96xf32> to vector<16x32xf32>
    %274 = vector.extract_strided_slice %271 {offsets = [0, 64], sizes = [16, 32], strides = [1, 1]} : vector<16x96xf32> to vector<16x32xf32>
    %275 = vector.extract_strided_slice %272 {offsets = [0, 0], sizes = [8, 32], strides = [1, 1]} : vector<16x32xf32> to vector<8x32xf32>
    %276 = vector.extract_strided_slice %273 {offsets = [0, 0], sizes = [8, 32], strides = [1, 1]} : vector<16x32xf32> to vector<8x32xf32>
    %277 = vector.extract_strided_slice %274 {offsets = [0, 0], sizes = [8, 32], strides = [1, 1]} : vector<16x32xf32> to vector<8x32xf32>
    %c0_117 = arith.constant 0 : index
    %c0_118 = arith.constant 0 : index
    %278 = vector.load %arg3[%c0_117, %c0_118] : memref<8x8xf32, #tpu.memory_space<vmem>>, vector<8x8xf32>
    %c0_119 = arith.constant 0 : index
    %c0_120 = arith.constant 0 : index
    %279 = vector.load %arg5[%c0_119, %c0_120] : memref<2x8xf32, #tpu.memory_space<vmem>>, vector<1x8xf32>
    %280 = vector.broadcast %279 : vector<1x8xf32> to vector<8x8xf32>
    %281 = arith.addf %278, %280 : vector<8x8xf32>
    %cst_121 = arith.constant 0.000000e+00 : f32
    %282 = vector.broadcast %cst_121 : f32 to vector<8x32xf32>
    %283 = vector.extract_strided_slice %275 {offsets = [0, 0], sizes = [8, 8], strides = [1, 1]} : vector<8x32xf32> to vector<8x8xf32>
    %284 = vector.extract_strided_slice %276 {offsets = [0, 0], sizes = [8, 8], strides = [1, 1]} : vector<8x32xf32> to vector<8x8xf32>
    %cst_122 = arith.constant dense<0.000000e+00> : vector<8x8xf32>
    %285 = tpu.matmul %283, %284, %cst_122 {dimension_numbers = #tpu.dot_dimension_numbers<[1], [1], [0], [0], [0, 0, 1, 0], [], []>} : vector<8x8xf32>, vector<8x8xf32>, vector<8x8xf32> -> vector<8x8xf32>
    %cst_123 = arith.constant 0.353553385 : f32
    %286 = vector.broadcast %cst_123 : f32 to vector<8x8xf32>
    %287 = arith.mulf %285, %286 : vector<8x8xf32>
    %288 = arith.addf %287, %281 : vector<8x8xf32>
    %cst_124 = arith.constant dense<0xFF800000> : vector<8xf32>
    %289 = vector.multi_reduction <maximumf>, %288, %cst_124 [1] : vector<8x8xf32> to vector<8xf32>
    %290 = vector.shape_cast %289 : vector<8xf32> to vector<8x1xf32>
    %291 = vector.broadcast %290 : vector<8x1xf32> to vector<8x8xf32>
    %292 = arith.subf %288, %291 : vector<8x8xf32>
    %293 = math.exp %292 : vector<8x8xf32>
    %cst_125 = arith.constant dense<0.000000e+00> : vector<8xf32>
    %294 = vector.multi_reduction <add>, %293, %cst_125 [1] : vector<8x8xf32> to vector<8xf32>
    %295 = vector.shape_cast %294 : vector<8xf32> to vector<8x1xf32>
    %296 = tpu.reciprocal %295 {approx = true} : vector<8x1xf32> -> vector<8x1xf32>
    %297 = vector.broadcast %296 : vector<8x1xf32> to vector<8x8xf32>
    %298 = arith.mulf %293, %297 : vector<8x8xf32>
    %299 = vector.extract_strided_slice %277 {offsets = [0, 0], sizes = [8, 8], strides = [1, 1]} : vector<8x32xf32> to vector<8x8xf32>
    %cst_126 = arith.constant dense<0.000000e+00> : vector<8x8xf32>
    %300 = tpu.matmul %298, %299, %cst_126 {dimension_numbers = #tpu.dot_dimension_numbers<[1], [0], [0], [1], [0, 0, 1, 1], [], []>} : vector<8x8xf32>, vector<8x8xf32>, vector<8x8xf32> -> vector<8x8xf32>
    %c0_127 = arith.constant 0 : index
    %c0_128 = arith.constant 0 : index
    %301 = vector.load %arg20[%c0_127, %c0_128] : memref<32x32xf32, #tpu.memory_space<vmem>>, vector<8x32xf32>
    %cst_129 = arith.constant dense<0.000000e+00> : vector<8x32xf32>
    %302 = tpu.matmul %300, %301, %cst_129 {dimension_numbers = #tpu.dot_dimension_numbers<[1], [0], [0], [1], [0, 0, 1, 1], [], []>} : vector<8x8xf32>, vector<8x32xf32>, vector<8x32xf32> -> vector<8x32xf32>
    %303 = arith.addf %282, %302 : vector<8x32xf32>
    %304 = vector.extract_strided_slice %275 {offsets = [0, 8], sizes = [8, 8], strides = [1, 1]} : vector<8x32xf32> to vector<8x8xf32>
    %305 = vector.extract_strided_slice %276 {offsets = [0, 8], sizes = [8, 8], strides = [1, 1]} : vector<8x32xf32> to vector<8x8xf32>
    %cst_130 = arith.constant dense<0.000000e+00> : vector<8x8xf32>
    %306 = tpu.matmul %304, %305, %cst_130 {dimension_numbers = #tpu.dot_dimension_numbers<[1], [1], [0], [0], [0, 0, 1, 0], [], []>} : vector<8x8xf32>, vector<8x8xf32>, vector<8x8xf32> -> vector<8x8xf32>
    %cst_131 = arith.constant 0.353553385 : f32
    %307 = vector.broadcast %cst_131 : f32 to vector<8x8xf32>
    %308 = arith.mulf %306, %307 : vector<8x8xf32>
    %309 = arith.addf %308, %281 : vector<8x8xf32>
    %cst_132 = arith.constant dense<0xFF800000> : vector<8xf32>
    %310 = vector.multi_reduction <maximumf>, %309, %cst_132 [1] : vector<8x8xf32> to vector<8xf32>
    %311 = vector.shape_cast %310 : vector<8xf32> to vector<8x1xf32>
    %312 = vector.broadcast %311 : vector<8x1xf32> to vector<8x8xf32>
    %313 = arith.subf %309, %312 : vector<8x8xf32>
    %314 = math.exp %313 : vector<8x8xf32>
    %cst_133 = arith.constant dense<0.000000e+00> : vector<8xf32>
    %315 = vector.multi_reduction <add>, %314, %cst_133 [1] : vector<8x8xf32> to vector<8xf32>
    %316 = vector.shape_cast %315 : vector<8xf32> to vector<8x1xf32>
    %317 = tpu.reciprocal %316 {approx = true} : vector<8x1xf32> -> vector<8x1xf32>
    %318 = vector.broadcast %317 : vector<8x1xf32> to vector<8x8xf32>
    %319 = arith.mulf %314, %318 : vector<8x8xf32>
    %320 = vector.extract_strided_slice %277 {offsets = [0, 8], sizes = [8, 8], strides = [1, 1]} : vector<8x32xf32> to vector<8x8xf32>
    %cst_134 = arith.constant dense<0.000000e+00> : vector<8x8xf32>
    %321 = tpu.matmul %319, %320, %cst_134 {dimension_numbers = #tpu.dot_dimension_numbers<[1], [0], [0], [1], [0, 0, 1, 1], [], []>} : vector<8x8xf32>, vector<8x8xf32>, vector<8x8xf32> -> vector<8x8xf32>
    %c8_135 = arith.constant 8 : index
    %c0_136 = arith.constant 0 : index
    %322 = vector.load %arg20[%c8_135, %c0_136] : memref<32x32xf32, #tpu.memory_space<vmem>>, vector<8x32xf32>
    %cst_137 = arith.constant dense<0.000000e+00> : vector<8x32xf32>
    %323 = tpu.matmul %321, %322, %cst_137 {dimension_numbers = #tpu.dot_dimension_numbers<[1], [0], [0], [1], [0, 0, 1, 1], [], []>} : vector<8x8xf32>, vector<8x32xf32>, vector<8x32xf32> -> vector<8x32xf32>
    %324 = arith.addf %303, %323 : vector<8x32xf32>
    %325 = vector.extract_strided_slice %275 {offsets = [0, 16], sizes = [8, 8], strides = [1, 1]} : vector<8x32xf32> to vector<8x8xf32>
    %326 = vector.extract_strided_slice %276 {offsets = [0, 16], sizes = [8, 8], strides = [1, 1]} : vector<8x32xf32> to vector<8x8xf32>
    %cst_138 = arith.constant dense<0.000000e+00> : vector<8x8xf32>
    %327 = tpu.matmul %325, %326, %cst_138 {dimension_numbers = #tpu.dot_dimension_numbers<[1], [1], [0], [0], [0, 0, 1, 0], [], []>} : vector<8x8xf32>, vector<8x8xf32>, vector<8x8xf32> -> vector<8x8xf32>
    %cst_139 = arith.constant 0.353553385 : f32
    %328 = vector.broadcast %cst_139 : f32 to vector<8x8xf32>
    %329 = arith.mulf %327, %328 : vector<8x8xf32>
    %330 = arith.addf %329, %281 : vector<8x8xf32>
    %cst_140 = arith.constant dense<0xFF800000> : vector<8xf32>
    %331 = vector.multi_reduction <maximumf>, %330, %cst_140 [1] : vector<8x8xf32> to vector<8xf32>
    %332 = vector.shape_cast %331 : vector<8xf32> to vector<8x1xf32>
    %333 = vector.broadcast %332 : vector<8x1xf32> to vector<8x8xf32>
    %334 = arith.subf %330, %333 : vector<8x8xf32>
    %335 = math.exp %334 : vector<8x8xf32>
    %cst_141 = arith.constant dense<0.000000e+00> : vector<8xf32>
    %336 = vector.multi_reduction <add>, %335, %cst_141 [1] : vector<8x8xf32> to vector<8xf32>
    %337 = vector.shape_cast %336 : vector<8xf32> to vector<8x1xf32>
    %338 = tpu.reciprocal %337 {approx = true} : vector<8x1xf32> -> vector<8x1xf32>
    %339 = vector.broadcast %338 : vector<8x1xf32> to vector<8x8xf32>
    %340 = arith.mulf %335, %339 : vector<8x8xf32>
    %341 = vector.extract_strided_slice %277 {offsets = [0, 16], sizes = [8, 8], strides = [1, 1]} : vector<8x32xf32> to vector<8x8xf32>
    %cst_142 = arith.constant dense<0.000000e+00> : vector<8x8xf32>
    %342 = tpu.matmul %340, %341, %cst_142 {dimension_numbers = #tpu.dot_dimension_numbers<[1], [0], [0], [1], [0, 0, 1, 1], [], []>} : vector<8x8xf32>, vector<8x8xf32>, vector<8x8xf32> -> vector<8x8xf32>
    %c16_143 = arith.constant 16 : index
    %c0_144 = arith.constant 0 : index
    %343 = vector.load %arg20[%c16_143, %c0_144] : memref<32x32xf32, #tpu.memory_space<vmem>>, vector<8x32xf32>
    %cst_145 = arith.constant dense<0.000000e+00> : vector<8x32xf32>
    %344 = tpu.matmul %342, %343, %cst_145 {dimension_numbers = #tpu.dot_dimension_numbers<[1], [0], [0], [1], [0, 0, 1, 1], [], []>} : vector<8x8xf32>, vector<8x32xf32>, vector<8x32xf32> -> vector<8x32xf32>
    %345 = arith.addf %324, %344 : vector<8x32xf32>
    %346 = vector.extract_strided_slice %275 {offsets = [0, 24], sizes = [8, 8], strides = [1, 1]} : vector<8x32xf32> to vector<8x8xf32>
    %347 = vector.extract_strided_slice %276 {offsets = [0, 24], sizes = [8, 8], strides = [1, 1]} : vector<8x32xf32> to vector<8x8xf32>
    %cst_146 = arith.constant dense<0.000000e+00> : vector<8x8xf32>
    %348 = tpu.matmul %346, %347, %cst_146 {dimension_numbers = #tpu.dot_dimension_numbers<[1], [1], [0], [0], [0, 0, 1, 0], [], []>} : vector<8x8xf32>, vector<8x8xf32>, vector<8x8xf32> -> vector<8x8xf32>
    %cst_147 = arith.constant 0.353553385 : f32
    %349 = vector.broadcast %cst_147 : f32 to vector<8x8xf32>
    %350 = arith.mulf %348, %349 : vector<8x8xf32>
    %351 = arith.addf %350, %281 : vector<8x8xf32>
    %cst_148 = arith.constant dense<0xFF800000> : vector<8xf32>
    %352 = vector.multi_reduction <maximumf>, %351, %cst_148 [1] : vector<8x8xf32> to vector<8xf32>
    %353 = vector.shape_cast %352 : vector<8xf32> to vector<8x1xf32>
    %354 = vector.broadcast %353 : vector<8x1xf32> to vector<8x8xf32>
    %355 = arith.subf %351, %354 : vector<8x8xf32>
    %356 = math.exp %355 : vector<8x8xf32>
    %cst_149 = arith.constant dense<0.000000e+00> : vector<8xf32>
    %357 = vector.multi_reduction <add>, %356, %cst_149 [1] : vector<8x8xf32> to vector<8xf32>
    %358 = vector.shape_cast %357 : vector<8xf32> to vector<8x1xf32>
    %359 = tpu.reciprocal %358 {approx = true} : vector<8x1xf32> -> vector<8x1xf32>
    %360 = vector.broadcast %359 : vector<8x1xf32> to vector<8x8xf32>
    %361 = arith.mulf %356, %360 : vector<8x8xf32>
    %362 = vector.extract_strided_slice %277 {offsets = [0, 24], sizes = [8, 8], strides = [1, 1]} : vector<8x32xf32> to vector<8x8xf32>
    %cst_150 = arith.constant dense<0.000000e+00> : vector<8x8xf32>
    %363 = tpu.matmul %361, %362, %cst_150 {dimension_numbers = #tpu.dot_dimension_numbers<[1], [0], [0], [1], [0, 0, 1, 1], [], []>} : vector<8x8xf32>, vector<8x8xf32>, vector<8x8xf32> -> vector<8x8xf32>
    %c24_151 = arith.constant 24 : index
    %c0_152 = arith.constant 0 : index
    %364 = vector.load %arg20[%c24_151, %c0_152] : memref<32x32xf32, #tpu.memory_space<vmem>>, vector<8x32xf32>
    %cst_153 = arith.constant dense<0.000000e+00> : vector<8x32xf32>
    %365 = tpu.matmul %363, %364, %cst_153 {dimension_numbers = #tpu.dot_dimension_numbers<[1], [0], [0], [1], [0, 0, 1, 1], [], []>} : vector<8x8xf32>, vector<8x32xf32>, vector<8x32xf32> -> vector<8x32xf32>
    %366 = arith.addf %345, %365 : vector<8x32xf32>
    %c0_154 = arith.constant 0 : index
    %c0_155 = arith.constant 0 : index
    %367 = vector.load %arg21[%c0_154, %c0_155] : memref<1x32xf32, #tpu.memory_space<vmem>>, vector<1x32xf32>
    %368 = vector.broadcast %367 : vector<1x32xf32> to vector<8x32xf32>
    %369 = arith.addf %366, %368 : vector<8x32xf32>
    %c0_156 = arith.constant 0 : index
    %c0_157 = arith.constant 0 : index
    %370 = vector.load %arg41[%c0_156, %c0_157] : memref<16x32xf32, #tpu.memory_space<vmem>>, vector<8x32xf32>
    tpu.vector_store %arg41[%c0_156, %c0_157], %369 {strides = array<i32>} : memref<16x32xf32, #tpu.memory_space<vmem>>, vector<8x32xf32>,
    %371 = vector.extract_strided_slice %272 {offsets = [8, 0], sizes = [8, 32], strides = [1, 1]} : vector<16x32xf32> to vector<8x32xf32>
    %372 = vector.extract_strided_slice %273 {offsets = [8, 0], sizes = [8, 32], strides = [1, 1]} : vector<16x32xf32> to vector<8x32xf32>
    %373 = vector.extract_strided_slice %274 {offsets = [8, 0], sizes = [8, 32], strides = [1, 1]} : vector<16x32xf32> to vector<8x32xf32>
    %c0_158 = arith.constant 0 : index
    %c0_159 = arith.constant 0 : index
    %374 = vector.load %arg3[%c0_158, %c0_159] : memref<8x8xf32, #tpu.memory_space<vmem>>, vector<8x8xf32>
    %c1_160 = arith.constant 1 : index
    %c0_161 = arith.constant 0 : index
    %375 = vector.load %arg5[%c1_160, %c0_161] : memref<2x8xf32, #tpu.memory_space<vmem>>, vector<1x8xf32>
    %376 = vector.broadcast %375 : vector<1x8xf32> to vector<8x8xf32>
    %377 = arith.addf %374, %376 : vector<8x8xf32>
    %cst_162 = arith.constant 0.000000e+00 : f32
    %378 = vector.broadcast %cst_162 : f32 to vector<8x32xf32>
    %379 = vector.extract_strided_slice %371 {offsets = [0, 0], sizes = [8, 8], strides = [1, 1]} : vector<8x32xf32> to vector<8x8xf32>
    %380 = vector.extract_strided_slice %372 {offsets = [0, 0], sizes = [8, 8], strides = [1, 1]} : vector<8x32xf32> to vector<8x8xf32>
    %cst_163 = arith.constant dense<0.000000e+00> : vector<8x8xf32>
    %381 = tpu.matmul %379, %380, %cst_163 {dimension_numbers = #tpu.dot_dimension_numbers<[1], [1], [0], [0], [0, 0, 1, 0], [], []>} : vector<8x8xf32>, vector<8x8xf32>, vector<8x8xf32> -> vector<8x8xf32>
    %cst_164 = arith.constant 0.353553385 : f32
    %382 = vector.broadcast %cst_164 : f32 to vector<8x8xf32>
    %383 = arith.mulf %381, %382 : vector<8x8xf32>
    %384 = arith.addf %383, %377 : vector<8x8xf32>
    %cst_165 = arith.constant dense<0xFF800000> : vector<8xf32>
    %385 = vector.multi_reduction <maximumf>, %384, %cst_165 [1] : vector<8x8xf32> to vector<8xf32>
    %386 = vector.shape_cast %385 : vector<8xf32> to vector<8x1xf32>
    %387 = vector.broadcast %386 : vector<8x1xf32> to vector<8x8xf32>
    %388 = arith.subf %384, %387 : vector<8x8xf32>
    %389 = math.exp %388 : vector<8x8xf32>
    %cst_166 = arith.constant dense<0.000000e+00> : vector<8xf32>
    %390 = vector.multi_reduction <add>, %389, %cst_166 [1] : vector<8x8xf32> to vector<8xf32>
    %391 = vector.shape_cast %390 : vector<8xf32> to vector<8x1xf32>
    %392 = tpu.reciprocal %391 {approx = true} : vector<8x1xf32> -> vector<8x1xf32>
    %393 = vector.broadcast %392 : vector<8x1xf32> to vector<8x8xf32>
    %394 = arith.mulf %389, %393 : vector<8x8xf32>
    %395 = vector.extract_strided_slice %373 {offsets = [0, 0], sizes = [8, 8], strides = [1, 1]} : vector<8x32xf32> to vector<8x8xf32>
    %cst_167 = arith.constant dense<0.000000e+00> : vector<8x8xf32>
    %396 = tpu.matmul %394, %395, %cst_167 {dimension_numbers = #tpu.dot_dimension_numbers<[1], [0], [0], [1], [0, 0, 1, 1], [], []>} : vector<8x8xf32>, vector<8x8xf32>, vector<8x8xf32> -> vector<8x8xf32>
    %c0_168 = arith.constant 0 : index
    %c0_169 = arith.constant 0 : index
    %397 = vector.load %arg20[%c0_168, %c0_169] : memref<32x32xf32, #tpu.memory_space<vmem>>, vector<8x32xf32>
    %cst_170 = arith.constant dense<0.000000e+00> : vector<8x32xf32>
    %398 = tpu.matmul %396, %397, %cst_170 {dimension_numbers = #tpu.dot_dimension_numbers<[1], [0], [0], [1], [0, 0, 1, 1], [], []>} : vector<8x8xf32>, vector<8x32xf32>, vector<8x32xf32> -> vector<8x32xf32>
    %399 = arith.addf %378, %398 : vector<8x32xf32>
    %400 = vector.extract_strided_slice %371 {offsets = [0, 8], sizes = [8, 8], strides = [1, 1]} : vector<8x32xf32> to vector<8x8xf32>
    %401 = vector.extract_strided_slice %372 {offsets = [0, 8], sizes = [8, 8], strides = [1, 1]} : vector<8x32xf32> to vector<8x8xf32>
    %cst_171 = arith.constant dense<0.000000e+00> : vector<8x8xf32>
    %402 = tpu.matmul %400, %401, %cst_171 {dimension_numbers = #tpu.dot_dimension_numbers<[1], [1], [0], [0], [0, 0, 1, 0], [], []>} : vector<8x8xf32>, vector<8x8xf32>, vector<8x8xf32> -> vector<8x8xf32>
    %cst_172 = arith.constant 0.353553385 : f32
    %403 = vector.broadcast %cst_172 : f32 to vector<8x8xf32>
    %404 = arith.mulf %402, %403 : vector<8x8xf32>
    %405 = arith.addf %404, %377 : vector<8x8xf32>
    %cst_173 = arith.constant dense<0xFF800000> : vector<8xf32>
    %406 = vector.multi_reduction <maximumf>, %405, %cst_173 [1] : vector<8x8xf32> to vector<8xf32>
    %407 = vector.shape_cast %406 : vector<8xf32> to vector<8x1xf32>
    %408 = vector.broadcast %407 : vector<8x1xf32> to vector<8x8xf32>
    %409 = arith.subf %405, %408 : vector<8x8xf32>
    %410 = math.exp %409 : vector<8x8xf32>
    %cst_174 = arith.constant dense<0.000000e+00> : vector<8xf32>
    %411 = vector.multi_reduction <add>, %410, %cst_174 [1] : vector<8x8xf32> to vector<8xf32>
    %412 = vector.shape_cast %411 : vector<8xf32> to vector<8x1xf32>
    %413 = tpu.reciprocal %412 {approx = true} : vector<8x1xf32> -> vector<8x1xf32>
    %414 = vector.broadcast %413 : vector<8x1xf32> to vector<8x8xf32>
    %415 = arith.mulf %410, %414 : vector<8x8xf32>
    %416 = vector.extract_strided_slice %373 {offsets = [0, 8], sizes = [8, 8], strides = [1, 1]} : vector<8x32xf32> to vector<8x8xf32>
    %cst_175 = arith.constant dense<0.000000e+00> : vector<8x8xf32>
    %417 = tpu.matmul %415, %416, %cst_175 {dimension_numbers = #tpu.dot_dimension_numbers<[1], [0], [0], [1], [0, 0, 1, 1], [], []>} : vector<8x8xf32>, vector<8x8xf32>, vector<8x8xf32> -> vector<8x8xf32>
    %c8_176 = arith.constant 8 : index
    %c0_177 = arith.constant 0 : index
    %418 = vector.load %arg20[%c8_176, %c0_177] : memref<32x32xf32, #tpu.memory_space<vmem>>, vector<8x32xf32>
    %cst_178 = arith.constant dense<0.000000e+00> : vector<8x32xf32>
    %419 = tpu.matmul %417, %418, %cst_178 {dimension_numbers = #tpu.dot_dimension_numbers<[1], [0], [0], [1], [0, 0, 1, 1], [], []>} : vector<8x8xf32>, vector<8x32xf32>, vector<8x32xf32> -> vector<8x32xf32>
    %420 = arith.addf %399, %419 : vector<8x32xf32>
    %421 = vector.extract_strided_slice %371 {offsets = [0, 16], sizes = [8, 8], strides = [1, 1]} : vector<8x32xf32> to vector<8x8xf32>
    %422 = vector.extract_strided_slice %372 {offsets = [0, 16], sizes = [8, 8], strides = [1, 1]} : vector<8x32xf32> to vector<8x8xf32>
    %cst_179 = arith.constant dense<0.000000e+00> : vector<8x8xf32>
    %423 = tpu.matmul %421, %422, %cst_179 {dimension_numbers = #tpu.dot_dimension_numbers<[1], [1], [0], [0], [0, 0, 1, 0], [], []>} : vector<8x8xf32>, vector<8x8xf32>, vector<8x8xf32> -> vector<8x8xf32>
    %cst_180 = arith.constant 0.353553385 : f32
    %424 = vector.broadcast %cst_180 : f32 to vector<8x8xf32>
    %425 = arith.mulf %423, %424 : vector<8x8xf32>
    %426 = arith.addf %425, %377 : vector<8x8xf32>
    %cst_181 = arith.constant dense<0xFF800000> : vector<8xf32>
    %427 = vector.multi_reduction <maximumf>, %426, %cst_181 [1] : vector<8x8xf32> to vector<8xf32>
    %428 = vector.shape_cast %427 : vector<8xf32> to vector<8x1xf32>
    %429 = vector.broadcast %428 : vector<8x1xf32> to vector<8x8xf32>
    %430 = arith.subf %426, %429 : vector<8x8xf32>
    %431 = math.exp %430 : vector<8x8xf32>
    %cst_182 = arith.constant dense<0.000000e+00> : vector<8xf32>
    %432 = vector.multi_reduction <add>, %431, %cst_182 [1] : vector<8x8xf32> to vector<8xf32>
    %433 = vector.shape_cast %432 : vector<8xf32> to vector<8x1xf32>
    %434 = tpu.reciprocal %433 {approx = true} : vector<8x1xf32> -> vector<8x1xf32>
    %435 = vector.broadcast %434 : vector<8x1xf32> to vector<8x8xf32>
    %436 = arith.mulf %431, %435 : vector<8x8xf32>
    %437 = vector.extract_strided_slice %373 {offsets = [0, 16], sizes = [8, 8], strides = [1, 1]} : vector<8x32xf32> to vector<8x8xf32>
    %cst_183 = arith.constant dense<0.000000e+00> : vector<8x8xf32>
    %438 = tpu.matmul %436, %437, %cst_183 {dimension_numbers = #tpu.dot_dimension_numbers<[1], [0], [0], [1], [0, 0, 1, 1], [], []>} : vector<8x8xf32>, vector<8x8xf32>, vector<8x8xf32> -> vector<8x8xf32>
    %c16_184 = arith.constant 16 : index
    %c0_185 = arith.constant 0 : index
    %439 = vector.load %arg20[%c16_184, %c0_185] : memref<32x32xf32, #tpu.memory_space<vmem>>, vector<8x32xf32>
    %cst_186 = arith.constant dense<0.000000e+00> : vector<8x32xf32>
    %440 = tpu.matmul %438, %439, %cst_186 {dimension_numbers = #tpu.dot_dimension_numbers<[1], [0], [0], [1], [0, 0, 1, 1], [], []>} : vector<8x8xf32>, vector<8x32xf32>, vector<8x32xf32> -> vector<8x32xf32>
    %441 = arith.addf %420, %440 : vector<8x32xf32>
    %442 = vector.extract_strided_slice %371 {offsets = [0, 24], sizes = [8, 8], strides = [1, 1]} : vector<8x32xf32> to vector<8x8xf32>
    %443 = vector.extract_strided_slice %372 {offsets = [0, 24], sizes = [8, 8], strides = [1, 1]} : vector<8x32xf32> to vector<8x8xf32>
    %cst_187 = arith.constant dense<0.000000e+00> : vector<8x8xf32>
    %444 = tpu.matmul %442, %443, %cst_187 {dimension_numbers = #tpu.dot_dimension_numbers<[1], [1], [0], [0], [0, 0, 1, 0], [], []>} : vector<8x8xf32>, vector<8x8xf32>, vector<8x8xf32> -> vector<8x8xf32>
    %cst_188 = arith.constant 0.353553385 : f32
    %445 = vector.broadcast %cst_188 : f32 to vector<8x8xf32>
    %446 = arith.mulf %444, %445 : vector<8x8xf32>
    %447 = arith.addf %446, %377 : vector<8x8xf32>
    %cst_189 = arith.constant dense<0xFF800000> : vector<8xf32>
    %448 = vector.multi_reduction <maximumf>, %447, %cst_189 [1] : vector<8x8xf32> to vector<8xf32>
    %449 = vector.shape_cast %448 : vector<8xf32> to vector<8x1xf32>
    %450 = vector.broadcast %449 : vector<8x1xf32> to vector<8x8xf32>
    %451 = arith.subf %447, %450 : vector<8x8xf32>
    %452 = math.exp %451 : vector<8x8xf32>
    %cst_190 = arith.constant dense<0.000000e+00> : vector<8xf32>
    %453 = vector.multi_reduction <add>, %452, %cst_190 [1] : vector<8x8xf32> to vector<8xf32>
    %454 = vector.shape_cast %453 : vector<8xf32> to vector<8x1xf32>
    %455 = tpu.reciprocal %454 {approx = true} : vector<8x1xf32> -> vector<8x1xf32>
    %456 = vector.broadcast %455 : vector<8x1xf32> to vector<8x8xf32>
    %457 = arith.mulf %452, %456 : vector<8x8xf32>
    %458 = vector.extract_strided_slice %373 {offsets = [0, 24], sizes = [8, 8], strides = [1, 1]} : vector<8x32xf32> to vector<8x8xf32>
    %cst_191 = arith.constant dense<0.000000e+00> : vector<8x8xf32>
    %459 = tpu.matmul %457, %458, %cst_191 {dimension_numbers = #tpu.dot_dimension_numbers<[1], [0], [0], [1], [0, 0, 1, 1], [], []>} : vector<8x8xf32>, vector<8x8xf32>, vector<8x8xf32> -> vector<8x8xf32>
    %c24_192 = arith.constant 24 : index
    %c0_193 = arith.constant 0 : index
    %460 = vector.load %arg20[%c24_192, %c0_193] : memref<32x32xf32, #tpu.memory_space<vmem>>, vector<8x32xf32>
    %cst_194 = arith.constant dense<0.000000e+00> : vector<8x32xf32>
    %461 = tpu.matmul %459, %460, %cst_194 {dimension_numbers = #tpu.dot_dimension_numbers<[1], [0], [0], [1], [0, 0, 1, 1], [], []>} : vector<8x8xf32>, vector<8x32xf32>, vector<8x32xf32> -> vector<8x32xf32>
    %462 = arith.addf %441, %461 : vector<8x32xf32>
    %c0_195 = arith.constant 0 : index
    %c0_196 = arith.constant 0 : index
    %463 = vector.load %arg21[%c0_195, %c0_196] : memref<1x32xf32, #tpu.memory_space<vmem>>, vector<1x32xf32>
    %464 = vector.broadcast %463 : vector<1x32xf32> to vector<8x32xf32>
    %465 = arith.addf %462, %464 : vector<8x32xf32>
    %c8_197 = arith.constant 8 : index
    %c0_198 = arith.constant 0 : index
    %466 = vector.load %arg41[%c8_197, %c0_198] : memref<16x32xf32, #tpu.memory_space<vmem>>, vector<8x32xf32>
    tpu.vector_store %arg41[%c8_197, %c0_198], %465 {strides = array<i32>} : memref<16x32xf32, #tpu.memory_space<vmem>>, vector<8x32xf32>,
    %c0_199 = arith.constant 0 : index
    %c0_200 = arith.constant 0 : index
    %467 = vector.load %arg41[%c0_199, %c0_200] : memref<16x32xf32, #tpu.memory_space<vmem>>, vector<16x32xf32>
    %468 = arith.addf %266, %467 : vector<16x32xf32>
    %cst_201 = arith.constant dense<0.000000e+00> : vector<16xf32>
    %469 = vector.multi_reduction <add>, %468, %cst_201 [1] : vector<16x32xf32> to vector<16xf32>
    %470 = vector.shape_cast %469 : vector<16xf32> to vector<16x1xf32>
    %cst_202 = arith.constant 3.200000e+01 : f32
    %471 = vector.broadcast %cst_202 : f32 to vector<16x1xf32>
    %472 = arith.divf %470, %471 : vector<16x1xf32>
    %473 = vector.broadcast %472 : vector<16x1xf32> to vector<16x32xf32>
    %474 = arith.subf %468, %473 : vector<16x32xf32>
    %475 = arith.mulf %474, %474 : vector<16x32xf32>
    %cst_203 = arith.constant dense<0.000000e+00> : vector<16xf32>
    %476 = vector.multi_reduction <add>, %475, %cst_203 [1] : vector<16x32xf32> to vector<16xf32>
    %477 = vector.shape_cast %476 : vector<16xf32> to vector<16x1xf32>
    %cst_204 = arith.constant 3.200000e+01 : f32
    %478 = vector.broadcast %cst_204 : f32 to vector<16x1xf32>
    %479 = arith.divf %477, %478 : vector<16x1xf32>
    %480 = vector.broadcast %472 : vector<16x1xf32> to vector<16x32xf32>
    %481 = arith.subf %468, %480 : vector<16x32xf32>
    %cst_205 = arith.constant 9.99999974E-6 : f32
    %482 = vector.broadcast %cst_205 : f32 to vector<16x1xf32>
    %483 = arith.addf %479, %482 : vector<16x1xf32>
    %484 = math.rsqrt %483 : vector<16x1xf32>
    %485 = vector.broadcast %484 : vector<16x1xf32> to vector<16x32xf32>
    %486 = arith.mulf %481, %485 : vector<16x32xf32>
    %c0_206 = arith.constant 0 : index
    %c0_207 = arith.constant 0 : index
    %487 = vector.load %arg22[%c0_206, %c0_207] : memref<1x32xf32, #tpu.memory_space<vmem>>, vector<1x32xf32>
    %488 = vector.broadcast %487 : vector<1x32xf32> to vector<16x32xf32>
    %489 = arith.mulf %486, %488 : vector<16x32xf32>
    %c0_208 = arith.constant 0 : index
    %c0_209 = arith.constant 0 : index
    %490 = vector.load %arg23[%c0_208, %c0_209] : memref<1x32xf32, #tpu.memory_space<vmem>>, vector<1x32xf32>
    %491 = vector.broadcast %490 : vector<1x32xf32> to vector<16x32xf32>
    %492 = arith.addf %489, %491 : vector<16x32xf32>
    %c0_210 = arith.constant 0 : index
    %c0_211 = arith.constant 0 : index
    %493 = vector.load %arg24[%c0_210, %c0_211] : memref<32x32xf32, #tpu.memory_space<vmem>>, vector<32x32xf32>
    %cst_212 = arith.constant dense<0.000000e+00> : vector<16x32xf32>
    %494 = tpu.matmul %492, %493, %cst_212 {dimension_numbers = #tpu.dot_dimension_numbers<[1], [0], [0], [1], [0, 0, 1, 1], [], []>} : vector<16x32xf32>, vector<32x32xf32>, vector<16x32xf32> -> vector<16x32xf32>
    %c0_213 = arith.constant 0 : index
    %c0_214 = arith.constant 0 : index
    %495 = vector.load %arg25[%c0_213, %c0_214] : memref<1x32xf32, #tpu.memory_space<vmem>>, vector<1x32xf32>
    %496 = vector.broadcast %495 : vector<1x32xf32> to vector<16x32xf32>
    %497 = arith.addf %494, %496 : vector<16x32xf32>
    %c0_215 = arith.constant 0 : index
    %c0_216 = arith.constant 0 : index
    %498 = vector.load %arg26[%c0_215, %c0_216] : memref<32x64xf32, #tpu.memory_space<vmem>>, vector<32x64xf32>
    %cst_217 = arith.constant dense<0.000000e+00> : vector<16x64xf32>
    %499 = tpu.matmul %265, %498, %cst_217 {dimension_numbers = #tpu.dot_dimension_numbers<[1], [0], [0], [1], [0, 0, 1, 1], [], []>} : vector<16x32xf32>, vector<32x64xf32>, vector<16x64xf32> -> vector<16x64xf32>
    %c0_218 = arith.constant 0 : index
    %c0_219 = arith.constant 0 : index
    %500 = vector.load %arg27[%c0_218, %c0_219] : memref<1x64xf32, #tpu.memory_space<vmem>>, vector<1x64xf32>
    %501 = vector.broadcast %500 : vector<1x64xf32> to vector<16x64xf32>
    %502 = arith.addf %499, %501 : vector<16x64xf32>
    %503 = vector.extract_strided_slice %502 {offsets = [0, 0], sizes = [16, 32], strides = [1, 1]} : vector<16x64xf32> to vector<16x32xf32>
    %504 = vector.extract_strided_slice %502 {offsets = [0, 32], sizes = [16, 32], strides = [1, 1]} : vector<16x64xf32> to vector<16x32xf32>
    %505 = vector.extract_strided_slice %497 {offsets = [0, 0], sizes = [8, 32], strides = [1, 1]} : vector<16x32xf32> to vector<8x32xf32>
    %506 = vector.extract_strided_slice %503 {offsets = [0, 0], sizes = [8, 32], strides = [1, 1]} : vector<16x32xf32> to vector<8x32xf32>
    %507 = vector.extract_strided_slice %504 {offsets = [0, 0], sizes = [8, 32], strides = [1, 1]} : vector<16x32xf32> to vector<8x32xf32>
    %c0_220 = arith.constant 0 : index
    %c0_221 = arith.constant 0 : index
    %508 = vector.load %arg4[%c0_220, %c0_221] : memref<2x8xf32, #tpu.memory_space<vmem>>, vector<1x8xf32>
    %cst_222 = arith.constant 0.000000e+00 : f32
    %509 = vector.broadcast %cst_222 : f32 to vector<8x32xf32>
    %510 = vector.extract_strided_slice %505 {offsets = [0, 0], sizes = [8, 8], strides = [1, 1]} : vector<8x32xf32> to vector<8x8xf32>
    %511 = vector.extract_strided_slice %506 {offsets = [0, 0], sizes = [8, 8], strides = [1, 1]} : vector<8x32xf32> to vector<8x8xf32>
    %cst_223 = arith.constant dense<0.000000e+00> : vector<8x8xf32>
    %512 = tpu.matmul %510, %511, %cst_223 {dimension_numbers = #tpu.dot_dimension_numbers<[1], [1], [0], [0], [0, 0, 1, 0], [], []>} : vector<8x8xf32>, vector<8x8xf32>, vector<8x8xf32> -> vector<8x8xf32>
    %cst_224 = arith.constant 0.353553385 : f32
    %513 = vector.broadcast %cst_224 : f32 to vector<8x8xf32>
    %514 = arith.mulf %512, %513 : vector<8x8xf32>
    %515 = vector.broadcast %508 : vector<1x8xf32> to vector<8x8xf32>
    %516 = arith.addf %514, %515 : vector<8x8xf32>
    %cst_225 = arith.constant dense<0xFF800000> : vector<8xf32>
    %517 = vector.multi_reduction <maximumf>, %516, %cst_225 [1] : vector<8x8xf32> to vector<8xf32>
    %518 = vector.shape_cast %517 : vector<8xf32> to vector<8x1xf32>
    %519 = vector.broadcast %518 : vector<8x1xf32> to vector<8x8xf32>
    %520 = arith.subf %516, %519 : vector<8x8xf32>
    %521 = math.exp %520 : vector<8x8xf32>
    %cst_226 = arith.constant dense<0.000000e+00> : vector<8xf32>
    %522 = vector.multi_reduction <add>, %521, %cst_226 [1] : vector<8x8xf32> to vector<8xf32>
    %523 = vector.shape_cast %522 : vector<8xf32> to vector<8x1xf32>
    %524 = tpu.reciprocal %523 {approx = true} : vector<8x1xf32> -> vector<8x1xf32>
    %525 = vector.broadcast %524 : vector<8x1xf32> to vector<8x8xf32>
    %526 = arith.mulf %521, %525 : vector<8x8xf32>
    %527 = vector.extract_strided_slice %507 {offsets = [0, 0], sizes = [8, 8], strides = [1, 1]} : vector<8x32xf32> to vector<8x8xf32>
    %cst_227 = arith.constant dense<0.000000e+00> : vector<8x8xf32>
    %528 = tpu.matmul %526, %527, %cst_227 {dimension_numbers = #tpu.dot_dimension_numbers<[1], [0], [0], [1], [0, 0, 1, 1], [], []>} : vector<8x8xf32>, vector<8x8xf32>, vector<8x8xf32> -> vector<8x8xf32>
    %c0_228 = arith.constant 0 : index
    %c0_229 = arith.constant 0 : index
    %529 = vector.load %arg28[%c0_228, %c0_229] : memref<32x32xf32, #tpu.memory_space<vmem>>, vector<8x32xf32>
    %cst_230 = arith.constant dense<0.000000e+00> : vector<8x32xf32>
    %530 = tpu.matmul %528, %529, %cst_230 {dimension_numbers = #tpu.dot_dimension_numbers<[1], [0], [0], [1], [0, 0, 1, 1], [], []>} : vector<8x8xf32>, vector<8x32xf32>, vector<8x32xf32> -> vector<8x32xf32>
    %531 = arith.addf %509, %530 : vector<8x32xf32>
    %532 = vector.extract_strided_slice %505 {offsets = [0, 8], sizes = [8, 8], strides = [1, 1]} : vector<8x32xf32> to vector<8x8xf32>
    %533 = vector.extract_strided_slice %506 {offsets = [0, 8], sizes = [8, 8], strides = [1, 1]} : vector<8x32xf32> to vector<8x8xf32>
    %cst_231 = arith.constant dense<0.000000e+00> : vector<8x8xf32>
    %534 = tpu.matmul %532, %533, %cst_231 {dimension_numbers = #tpu.dot_dimension_numbers<[1], [1], [0], [0], [0, 0, 1, 0], [], []>} : vector<8x8xf32>, vector<8x8xf32>, vector<8x8xf32> -> vector<8x8xf32>
    %cst_232 = arith.constant 0.353553385 : f32
    %535 = vector.broadcast %cst_232 : f32 to vector<8x8xf32>
    %536 = arith.mulf %534, %535 : vector<8x8xf32>
    %537 = vector.broadcast %508 : vector<1x8xf32> to vector<8x8xf32>
    %538 = arith.addf %536, %537 : vector<8x8xf32>
    %cst_233 = arith.constant dense<0xFF800000> : vector<8xf32>
    %539 = vector.multi_reduction <maximumf>, %538, %cst_233 [1] : vector<8x8xf32> to vector<8xf32>
    %540 = vector.shape_cast %539 : vector<8xf32> to vector<8x1xf32>
    %541 = vector.broadcast %540 : vector<8x1xf32> to vector<8x8xf32>
    %542 = arith.subf %538, %541 : vector<8x8xf32>
    %543 = math.exp %542 : vector<8x8xf32>
    %cst_234 = arith.constant dense<0.000000e+00> : vector<8xf32>
    %544 = vector.multi_reduction <add>, %543, %cst_234 [1] : vector<8x8xf32> to vector<8xf32>
    %545 = vector.shape_cast %544 : vector<8xf32> to vector<8x1xf32>
    %546 = tpu.reciprocal %545 {approx = true} : vector<8x1xf32> -> vector<8x1xf32>
    %547 = vector.broadcast %546 : vector<8x1xf32> to vector<8x8xf32>
    %548 = arith.mulf %543, %547 : vector<8x8xf32>
    %549 = vector.extract_strided_slice %507 {offsets = [0, 8], sizes = [8, 8], strides = [1, 1]} : vector<8x32xf32> to vector<8x8xf32>
    %cst_235 = arith.constant dense<0.000000e+00> : vector<8x8xf32>
    %550 = tpu.matmul %548, %549, %cst_235 {dimension_numbers = #tpu.dot_dimension_numbers<[1], [0], [0], [1], [0, 0, 1, 1], [], []>} : vector<8x8xf32>, vector<8x8xf32>, vector<8x8xf32> -> vector<8x8xf32>
    %c8_236 = arith.constant 8 : index
    %c0_237 = arith.constant 0 : index
    %551 = vector.load %arg28[%c8_236, %c0_237] : memref<32x32xf32, #tpu.memory_space<vmem>>, vector<8x32xf32>
    %cst_238 = arith.constant dense<0.000000e+00> : vector<8x32xf32>
    %552 = tpu.matmul %550, %551, %cst_238 {dimension_numbers = #tpu.dot_dimension_numbers<[1], [0], [0], [1], [0, 0, 1, 1], [], []>} : vector<8x8xf32>, vector<8x32xf32>, vector<8x32xf32> -> vector<8x32xf32>
    %553 = arith.addf %531, %552 : vector<8x32xf32>
    %554 = vector.extract_strided_slice %505 {offsets = [0, 16], sizes = [8, 8], strides = [1, 1]} : vector<8x32xf32> to vector<8x8xf32>
    %555 = vector.extract_strided_slice %506 {offsets = [0, 16], sizes = [8, 8], strides = [1, 1]} : vector<8x32xf32> to vector<8x8xf32>
    %cst_239 = arith.constant dense<0.000000e+00> : vector<8x8xf32>
    %556 = tpu.matmul %554, %555, %cst_239 {dimension_numbers = #tpu.dot_dimension_numbers<[1], [1], [0], [0], [0, 0, 1, 0], [], []>} : vector<8x8xf32>, vector<8x8xf32>, vector<8x8xf32> -> vector<8x8xf32>
    %cst_240 = arith.constant 0.353553385 : f32
    %557 = vector.broadcast %cst_240 : f32 to vector<8x8xf32>
    %558 = arith.mulf %556, %557 : vector<8x8xf32>
    %559 = vector.broadcast %508 : vector<1x8xf32> to vector<8x8xf32>
    %560 = arith.addf %558, %559 : vector<8x8xf32>
    %cst_241 = arith.constant dense<0xFF800000> : vector<8xf32>
    %561 = vector.multi_reduction <maximumf>, %560, %cst_241 [1] : vector<8x8xf32> to vector<8xf32>
    %562 = vector.shape_cast %561 : vector<8xf32> to vector<8x1xf32>
    %563 = vector.broadcast %562 : vector<8x1xf32> to vector<8x8xf32>
    %564 = arith.subf %560, %563 : vector<8x8xf32>
    %565 = math.exp %564 : vector<8x8xf32>
    %cst_242 = arith.constant dense<0.000000e+00> : vector<8xf32>
    %566 = vector.multi_reduction <add>, %565, %cst_242 [1] : vector<8x8xf32> to vector<8xf32>
    %567 = vector.shape_cast %566 : vector<8xf32> to vector<8x1xf32>
    %568 = tpu.reciprocal %567 {approx = true} : vector<8x1xf32> -> vector<8x1xf32>
    %569 = vector.broadcast %568 : vector<8x1xf32> to vector<8x8xf32>
    %570 = arith.mulf %565, %569 : vector<8x8xf32>
    %571 = vector.extract_strided_slice %507 {offsets = [0, 16], sizes = [8, 8], strides = [1, 1]} : vector<8x32xf32> to vector<8x8xf32>
    %cst_243 = arith.constant dense<0.000000e+00> : vector<8x8xf32>
    %572 = tpu.matmul %570, %571, %cst_243 {dimension_numbers = #tpu.dot_dimension_numbers<[1], [0], [0], [1], [0, 0, 1, 1], [], []>} : vector<8x8xf32>, vector<8x8xf32>, vector<8x8xf32> -> vector<8x8xf32>
    %c16_244 = arith.constant 16 : index
    %c0_245 = arith.constant 0 : index
    %573 = vector.load %arg28[%c16_244, %c0_245] : memref<32x32xf32, #tpu.memory_space<vmem>>, vector<8x32xf32>
    %cst_246 = arith.constant dense<0.000000e+00> : vector<8x32xf32>
    %574 = tpu.matmul %572, %573, %cst_246 {dimension_numbers = #tpu.dot_dimension_numbers<[1], [0], [0], [1], [0, 0, 1, 1], [], []>} : vector<8x8xf32>, vector<8x32xf32>, vector<8x32xf32> -> vector<8x32xf32>
    %575 = arith.addf %553, %574 : vector<8x32xf32>
    %576 = vector.extract_strided_slice %505 {offsets = [0, 24], sizes = [8, 8], strides = [1, 1]} : vector<8x32xf32> to vector<8x8xf32>
    %577 = vector.extract_strided_slice %506 {offsets = [0, 24], sizes = [8, 8], strides = [1, 1]} : vector<8x32xf32> to vector<8x8xf32>
    %cst_247 = arith.constant dense<0.000000e+00> : vector<8x8xf32>
    %578 = tpu.matmul %576, %577, %cst_247 {dimension_numbers = #tpu.dot_dimension_numbers<[1], [1], [0], [0], [0, 0, 1, 0], [], []>} : vector<8x8xf32>, vector<8x8xf32>, vector<8x8xf32> -> vector<8x8xf32>
    %cst_248 = arith.constant 0.353553385 : f32
    %579 = vector.broadcast %cst_248 : f32 to vector<8x8xf32>
    %580 = arith.mulf %578, %579 : vector<8x8xf32>
    %581 = vector.broadcast %508 : vector<1x8xf32> to vector<8x8xf32>
    %582 = arith.addf %580, %581 : vector<8x8xf32>
    %cst_249 = arith.constant dense<0xFF800000> : vector<8xf32>
    %583 = vector.multi_reduction <maximumf>, %582, %cst_249 [1] : vector<8x8xf32> to vector<8xf32>
    %584 = vector.shape_cast %583 : vector<8xf32> to vector<8x1xf32>
    %585 = vector.broadcast %584 : vector<8x1xf32> to vector<8x8xf32>
    %586 = arith.subf %582, %585 : vector<8x8xf32>
    %587 = math.exp %586 : vector<8x8xf32>
    %cst_250 = arith.constant dense<0.000000e+00> : vector<8xf32>
    %588 = vector.multi_reduction <add>, %587, %cst_250 [1] : vector<8x8xf32> to vector<8xf32>
    %589 = vector.shape_cast %588 : vector<8xf32> to vector<8x1xf32>
    %590 = tpu.reciprocal %589 {approx = true} : vector<8x1xf32> -> vector<8x1xf32>
    %591 = vector.broadcast %590 : vector<8x1xf32> to vector<8x8xf32>
    %592 = arith.mulf %587, %591 : vector<8x8xf32>
    %593 = vector.extract_strided_slice %507 {offsets = [0, 24], sizes = [8, 8], strides = [1, 1]} : vector<8x32xf32> to vector<8x8xf32>
    %cst_251 = arith.constant dense<0.000000e+00> : vector<8x8xf32>
    %594 = tpu.matmul %592, %593, %cst_251 {dimension_numbers = #tpu.dot_dimension_numbers<[1], [0], [0], [1], [0, 0, 1, 1], [], []>} : vector<8x8xf32>, vector<8x8xf32>, vector<8x8xf32> -> vector<8x8xf32>
    %c24_252 = arith.constant 24 : index
    %c0_253 = arith.constant 0 : index
    %595 = vector.load %arg28[%c24_252, %c0_253] : memref<32x32xf32, #tpu.memory_space<vmem>>, vector<8x32xf32>
    %cst_254 = arith.constant dense<0.000000e+00> : vector<8x32xf32>
    %596 = tpu.matmul %594, %595, %cst_254 {dimension_numbers = #tpu.dot_dimension_numbers<[1], [0], [0], [1], [0, 0, 1, 1], [], []>} : vector<8x8xf32>, vector<8x32xf32>, vector<8x32xf32> -> vector<8x32xf32>
    %597 = arith.addf %575, %596 : vector<8x32xf32>
    %c0_255 = arith.constant 0 : index
    %c0_256 = arith.constant 0 : index
    %598 = vector.load %arg29[%c0_255, %c0_256] : memref<1x32xf32, #tpu.memory_space<vmem>>, vector<1x32xf32>
    %599 = vector.broadcast %598 : vector<1x32xf32> to vector<8x32xf32>
    %600 = arith.addf %597, %599 : vector<8x32xf32>
    %c0_257 = arith.constant 0 : index
    %c0_258 = arith.constant 0 : index
    %601 = vector.load %arg41[%c0_257, %c0_258] : memref<16x32xf32, #tpu.memory_space<vmem>>, vector<8x32xf32>
    tpu.vector_store %arg41[%c0_257, %c0_258], %600 {strides = array<i32>} : memref<16x32xf32, #tpu.memory_space<vmem>>, vector<8x32xf32>,
    %602 = vector.extract_strided_slice %497 {offsets = [8, 0], sizes = [8, 32], strides = [1, 1]} : vector<16x32xf32> to vector<8x32xf32>
    %603 = vector.extract_strided_slice %503 {offsets = [8, 0], sizes = [8, 32], strides = [1, 1]} : vector<16x32xf32> to vector<8x32xf32>
    %604 = vector.extract_strided_slice %504 {offsets = [8, 0], sizes = [8, 32], strides = [1, 1]} : vector<16x32xf32> to vector<8x32xf32>
    %c1_259 = arith.constant 1 : index
    %c0_260 = arith.constant 0 : index
    %605 = vector.load %arg4[%c1_259, %c0_260] : memref<2x8xf32, #tpu.memory_space<vmem>>, vector<1x8xf32>
    %cst_261 = arith.constant 0.000000e+00 : f32
    %606 = vector.broadcast %cst_261 : f32 to vector<8x32xf32>
    %607 = vector.extract_strided_slice %602 {offsets = [0, 0], sizes = [8, 8], strides = [1, 1]} : vector<8x32xf32> to vector<8x8xf32>
    %608 = vector.extract_strided_slice %603 {offsets = [0, 0], sizes = [8, 8], strides = [1, 1]} : vector<8x32xf32> to vector<8x8xf32>
    %cst_262 = arith.constant dense<0.000000e+00> : vector<8x8xf32>
    %609 = tpu.matmul %607, %608, %cst_262 {dimension_numbers = #tpu.dot_dimension_numbers<[1], [1], [0], [0], [0, 0, 1, 0], [], []>} : vector<8x8xf32>, vector<8x8xf32>, vector<8x8xf32> -> vector<8x8xf32>
    %cst_263 = arith.constant 0.353553385 : f32
    %610 = vector.broadcast %cst_263 : f32 to vector<8x8xf32>
    %611 = arith.mulf %609, %610 : vector<8x8xf32>
    %612 = vector.broadcast %605 : vector<1x8xf32> to vector<8x8xf32>
    %613 = arith.addf %611, %612 : vector<8x8xf32>
    %cst_264 = arith.constant dense<0xFF800000> : vector<8xf32>
    %614 = vector.multi_reduction <maximumf>, %613, %cst_264 [1] : vector<8x8xf32> to vector<8xf32>
    %615 = vector.shape_cast %614 : vector<8xf32> to vector<8x1xf32>
    %616 = vector.broadcast %615 : vector<8x1xf32> to vector<8x8xf32>
    %617 = arith.subf %613, %616 : vector<8x8xf32>
    %618 = math.exp %617 : vector<8x8xf32>
    %cst_265 = arith.constant dense<0.000000e+00> : vector<8xf32>
    %619 = vector.multi_reduction <add>, %618, %cst_265 [1] : vector<8x8xf32> to vector<8xf32>
    %620 = vector.shape_cast %619 : vector<8xf32> to vector<8x1xf32>
    %621 = tpu.reciprocal %620 {approx = true} : vector<8x1xf32> -> vector<8x1xf32>
    %622 = vector.broadcast %621 : vector<8x1xf32> to vector<8x8xf32>
    %623 = arith.mulf %618, %622 : vector<8x8xf32>
    %624 = vector.extract_strided_slice %604 {offsets = [0, 0], sizes = [8, 8], strides = [1, 1]} : vector<8x32xf32> to vector<8x8xf32>
    %cst_266 = arith.constant dense<0.000000e+00> : vector<8x8xf32>
    %625 = tpu.matmul %623, %624, %cst_266 {dimension_numbers = #tpu.dot_dimension_numbers<[1], [0], [0], [1], [0, 0, 1, 1], [], []>} : vector<8x8xf32>, vector<8x8xf32>, vector<8x8xf32> -> vector<8x8xf32>
    %c0_267 = arith.constant 0 : index
    %c0_268 = arith.constant 0 : index
    %626 = vector.load %arg28[%c0_267, %c0_268] : memref<32x32xf32, #tpu.memory_space<vmem>>, vector<8x32xf32>
    %cst_269 = arith.constant dense<0.000000e+00> : vector<8x32xf32>
    %627 = tpu.matmul %625, %626, %cst_269 {dimension_numbers = #tpu.dot_dimension_numbers<[1], [0], [0], [1], [0, 0, 1, 1], [], []>} : vector<8x8xf32>, vector<8x32xf32>, vector<8x32xf32> -> vector<8x32xf32>
    %628 = arith.addf %606, %627 : vector<8x32xf32>
    %629 = vector.extract_strided_slice %602 {offsets = [0, 8], sizes = [8, 8], strides = [1, 1]} : vector<8x32xf32> to vector<8x8xf32>
    %630 = vector.extract_strided_slice %603 {offsets = [0, 8], sizes = [8, 8], strides = [1, 1]} : vector<8x32xf32> to vector<8x8xf32>
    %cst_270 = arith.constant dense<0.000000e+00> : vector<8x8xf32>
    %631 = tpu.matmul %629, %630, %cst_270 {dimension_numbers = #tpu.dot_dimension_numbers<[1], [1], [0], [0], [0, 0, 1, 0], [], []>} : vector<8x8xf32>, vector<8x8xf32>, vector<8x8xf32> -> vector<8x8xf32>
    %cst_271 = arith.constant 0.353553385 : f32
    %632 = vector.broadcast %cst_271 : f32 to vector<8x8xf32>
    %633 = arith.mulf %631, %632 : vector<8x8xf32>
    %634 = vector.broadcast %605 : vector<1x8xf32> to vector<8x8xf32>
    %635 = arith.addf %633, %634 : vector<8x8xf32>
    %cst_272 = arith.constant dense<0xFF800000> : vector<8xf32>
    %636 = vector.multi_reduction <maximumf>, %635, %cst_272 [1] : vector<8x8xf32> to vector<8xf32>
    %637 = vector.shape_cast %636 : vector<8xf32> to vector<8x1xf32>
    %638 = vector.broadcast %637 : vector<8x1xf32> to vector<8x8xf32>
    %639 = arith.subf %635, %638 : vector<8x8xf32>
    %640 = math.exp %639 : vector<8x8xf32>
    %cst_273 = arith.constant dense<0.000000e+00> : vector<8xf32>
    %641 = vector.multi_reduction <add>, %640, %cst_273 [1] : vector<8x8xf32> to vector<8xf32>
    %642 = vector.shape_cast %641 : vector<8xf32> to vector<8x1xf32>
    %643 = tpu.reciprocal %642 {approx = true} : vector<8x1xf32> -> vector<8x1xf32>
    %644 = vector.broadcast %643 : vector<8x1xf32> to vector<8x8xf32>
    %645 = arith.mulf %640, %644 : vector<8x8xf32>
    %646 = vector.extract_strided_slice %604 {offsets = [0, 8], sizes = [8, 8], strides = [1, 1]} : vector<8x32xf32> to vector<8x8xf32>
    %cst_274 = arith.constant dense<0.000000e+00> : vector<8x8xf32>
    %647 = tpu.matmul %645, %646, %cst_274 {dimension_numbers = #tpu.dot_dimension_numbers<[1], [0], [0], [1], [0, 0, 1, 1], [], []>} : vector<8x8xf32>, vector<8x8xf32>, vector<8x8xf32> -> vector<8x8xf32>
    %c8_275 = arith.constant 8 : index
    %c0_276 = arith.constant 0 : index
    %648 = vector.load %arg28[%c8_275, %c0_276] : memref<32x32xf32, #tpu.memory_space<vmem>>, vector<8x32xf32>
    %cst_277 = arith.constant dense<0.000000e+00> : vector<8x32xf32>
    %649 = tpu.matmul %647, %648, %cst_277 {dimension_numbers = #tpu.dot_dimension_numbers<[1], [0], [0], [1], [0, 0, 1, 1], [], []>} : vector<8x8xf32>, vector<8x32xf32>, vector<8x32xf32> -> vector<8x32xf32>
    %650 = arith.addf %628, %649 : vector<8x32xf32>
    %651 = vector.extract_strided_slice %602 {offsets = [0, 16], sizes = [8, 8], strides = [1, 1]} : vector<8x32xf32> to vector<8x8xf32>
    %652 = vector.extract_strided_slice %603 {offsets = [0, 16], sizes = [8, 8], strides = [1, 1]} : vector<8x32xf32> to vector<8x8xf32>
    %cst_278 = arith.constant dense<0.000000e+00> : vector<8x8xf32>
    %653 = tpu.matmul %651, %652, %cst_278 {dimension_numbers = #tpu.dot_dimension_numbers<[1], [1], [0], [0], [0, 0, 1, 0], [], []>} : vector<8x8xf32>, vector<8x8xf32>, vector<8x8xf32> -> vector<8x8xf32>
    %cst_279 = arith.constant 0.353553385 : f32
    %654 = vector.broadcast %cst_279 : f32 to vector<8x8xf32>
    %655 = arith.mulf %653, %654 : vector<8x8xf32>
    %656 = vector.broadcast %605 : vector<1x8xf32> to vector<8x8xf32>
    %657 = arith.addf %655, %656 : vector<8x8xf32>
    %cst_280 = arith.constant dense<0xFF800000> : vector<8xf32>
    %658 = vector.multi_reduction <maximumf>, %657, %cst_280 [1] : vector<8x8xf32> to vector<8xf32>
    %659 = vector.shape_cast %658 : vector<8xf32> to vector<8x1xf32>
    %660 = vector.broadcast %659 : vector<8x1xf32> to vector<8x8xf32>
    %661 = arith.subf %657, %660 : vector<8x8xf32>
    %662 = math.exp %661 : vector<8x8xf32>
    %cst_281 = arith.constant dense<0.000000e+00> : vector<8xf32>
    %663 = vector.multi_reduction <add>, %662, %cst_281 [1] : vector<8x8xf32> to vector<8xf32>
    %664 = vector.shape_cast %663 : vector<8xf32> to vector<8x1xf32>
    %665 = tpu.reciprocal %664 {approx = true} : vector<8x1xf32> -> vector<8x1xf32>
    %666 = vector.broadcast %665 : vector<8x1xf32> to vector<8x8xf32>
    %667 = arith.mulf %662, %666 : vector<8x8xf32>
    %668 = vector.extract_strided_slice %604 {offsets = [0, 16], sizes = [8, 8], strides = [1, 1]} : vector<8x32xf32> to vector<8x8xf32>
    %cst_282 = arith.constant dense<0.000000e+00> : vector<8x8xf32>
    %669 = tpu.matmul %667, %668, %cst_282 {dimension_numbers = #tpu.dot_dimension_numbers<[1], [0], [0], [1], [0, 0, 1, 1], [], []>} : vector<8x8xf32>, vector<8x8xf32>, vector<8x8xf32> -> vector<8x8xf32>
    %c16_283 = arith.constant 16 : index
    %c0_284 = arith.constant 0 : index
    %670 = vector.load %arg28[%c16_283, %c0_284] : memref<32x32xf32, #tpu.memory_space<vmem>>, vector<8x32xf32>
    %cst_285 = arith.constant dense<0.000000e+00> : vector<8x32xf32>
    %671 = tpu.matmul %669, %670, %cst_285 {dimension_numbers = #tpu.dot_dimension_numbers<[1], [0], [0], [1], [0, 0, 1, 1], [], []>} : vector<8x8xf32>, vector<8x32xf32>, vector<8x32xf32> -> vector<8x32xf32>
    %672 = arith.addf %650, %671 : vector<8x32xf32>
    %673 = vector.extract_strided_slice %602 {offsets = [0, 24], sizes = [8, 8], strides = [1, 1]} : vector<8x32xf32> to vector<8x8xf32>
    %674 = vector.extract_strided_slice %603 {offsets = [0, 24], sizes = [8, 8], strides = [1, 1]} : vector<8x32xf32> to vector<8x8xf32>
    %cst_286 = arith.constant dense<0.000000e+00> : vector<8x8xf32>
    %675 = tpu.matmul %673, %674, %cst_286 {dimension_numbers = #tpu.dot_dimension_numbers<[1], [1], [0], [0], [0, 0, 1, 0], [], []>} : vector<8x8xf32>, vector<8x8xf32>, vector<8x8xf32> -> vector<8x8xf32>
    %cst_287 = arith.constant 0.353553385 : f32
    %676 = vector.broadcast %cst_287 : f32 to vector<8x8xf32>
    %677 = arith.mulf %675, %676 : vector<8x8xf32>
    %678 = vector.broadcast %605 : vector<1x8xf32> to vector<8x8xf32>
    %679 = arith.addf %677, %678 : vector<8x8xf32>
    %cst_288 = arith.constant dense<0xFF800000> : vector<8xf32>
    %680 = vector.multi_reduction <maximumf>, %679, %cst_288 [1] : vector<8x8xf32> to vector<8xf32>
    %681 = vector.shape_cast %680 : vector<8xf32> to vector<8x1xf32>
    %682 = vector.broadcast %681 : vector<8x1xf32> to vector<8x8xf32>
    %683 = arith.subf %679, %682 : vector<8x8xf32>
    %684 = math.exp %683 : vector<8x8xf32>
    %cst_289 = arith.constant dense<0.000000e+00> : vector<8xf32>
    %685 = vector.multi_reduction <add>, %684, %cst_289 [1] : vector<8x8xf32> to vector<8xf32>
    %686 = vector.shape_cast %685 : vector<8xf32> to vector<8x1xf32>
    %687 = tpu.reciprocal %686 {approx = true} : vector<8x1xf32> -> vector<8x1xf32>
    %688 = vector.broadcast %687 : vector<8x1xf32> to vector<8x8xf32>
    %689 = arith.mulf %684, %688 : vector<8x8xf32>
    %690 = vector.extract_strided_slice %604 {offsets = [0, 24], sizes = [8, 8], strides = [1, 1]} : vector<8x32xf32> to vector<8x8xf32>
    %cst_290 = arith.constant dense<0.000000e+00> : vector<8x8xf32>
    %691 = tpu.matmul %689, %690, %cst_290 {dimension_numbers = #tpu.dot_dimension_numbers<[1], [0], [0], [1], [0, 0, 1, 1], [], []>} : vector<8x8xf32>, vector<8x8xf32>, vector<8x8xf32> -> vector<8x8xf32>
    %c24_291 = arith.constant 24 : index
    %c0_292 = arith.constant 0 : index
    %692 = vector.load %arg28[%c24_291, %c0_292] : memref<32x32xf32, #tpu.memory_space<vmem>>, vector<8x32xf32>
    %cst_293 = arith.constant dense<0.000000e+00> : vector<8x32xf32>
    %693 = tpu.matmul %691, %692, %cst_293 {dimension_numbers = #tpu.dot_dimension_numbers<[1], [0], [0], [1], [0, 0, 1, 1], [], []>} : vector<8x8xf32>, vector<8x32xf32>, vector<8x32xf32> -> vector<8x32xf32>
    %694 = arith.addf %672, %693 : vector<8x32xf32>
    %c0_294 = arith.constant 0 : index
    %c0_295 = arith.constant 0 : index
    %695 = vector.load %arg29[%c0_294, %c0_295] : memref<1x32xf32, #tpu.memory_space<vmem>>, vector<1x32xf32>
    %696 = vector.broadcast %695 : vector<1x32xf32> to vector<8x32xf32>
    %697 = arith.addf %694, %696 : vector<8x32xf32>
    %c8_296 = arith.constant 8 : index
    %c0_297 = arith.constant 0 : index
    %698 = vector.load %arg41[%c8_296, %c0_297] : memref<16x32xf32, #tpu.memory_space<vmem>>, vector<8x32xf32>
    tpu.vector_store %arg41[%c8_296, %c0_297], %697 {strides = array<i32>} : memref<16x32xf32, #tpu.memory_space<vmem>>, vector<8x32xf32>,
    %c0_298 = arith.constant 0 : index
    %c0_299 = arith.constant 0 : index
    %699 = vector.load %arg41[%c0_298, %c0_299] : memref<16x32xf32, #tpu.memory_space<vmem>>, vector<16x32xf32>
    %700 = arith.addf %492, %699 : vector<16x32xf32>
    %cst_300 = arith.constant dense<0.000000e+00> : vector<16xf32>
    %701 = vector.multi_reduction <add>, %700, %cst_300 [1] : vector<16x32xf32> to vector<16xf32>
    %702 = vector.shape_cast %701 : vector<16xf32> to vector<16x1xf32>
    %cst_301 = arith.constant 3.200000e+01 : f32
    %703 = vector.broadcast %cst_301 : f32 to vector<16x1xf32>
    %704 = arith.divf %702, %703 : vector<16x1xf32>
    %705 = vector.broadcast %704 : vector<16x1xf32> to vector<16x32xf32>
    %706 = arith.subf %700, %705 : vector<16x32xf32>
    %707 = arith.mulf %706, %706 : vector<16x32xf32>
    %cst_302 = arith.constant dense<0.000000e+00> : vector<16xf32>
    %708 = vector.multi_reduction <add>, %707, %cst_302 [1] : vector<16x32xf32> to vector<16xf32>
    %709 = vector.shape_cast %708 : vector<16xf32> to vector<16x1xf32>
    %cst_303 = arith.constant 3.200000e+01 : f32
    %710 = vector.broadcast %cst_303 : f32 to vector<16x1xf32>
    %711 = arith.divf %709, %710 : vector<16x1xf32>
    %712 = vector.broadcast %704 : vector<16x1xf32> to vector<16x32xf32>
    %713 = arith.subf %700, %712 : vector<16x32xf32>
    %cst_304 = arith.constant 9.99999974E-6 : f32
    %714 = vector.broadcast %cst_304 : f32 to vector<16x1xf32>
    %715 = arith.addf %711, %714 : vector<16x1xf32>
    %716 = math.rsqrt %715 : vector<16x1xf32>
    %717 = vector.broadcast %716 : vector<16x1xf32> to vector<16x32xf32>
    %718 = arith.mulf %713, %717 : vector<16x32xf32>
    %c0_305 = arith.constant 0 : index
    %c0_306 = arith.constant 0 : index
    %719 = vector.load %arg30[%c0_305, %c0_306] : memref<1x32xf32, #tpu.memory_space<vmem>>, vector<1x32xf32>
    %720 = vector.broadcast %719 : vector<1x32xf32> to vector<16x32xf32>
    %721 = arith.mulf %718, %720 : vector<16x32xf32>
    %c0_307 = arith.constant 0 : index
    %c0_308 = arith.constant 0 : index
    %722 = vector.load %arg31[%c0_307, %c0_308] : memref<1x32xf32, #tpu.memory_space<vmem>>, vector<1x32xf32>
    %723 = vector.broadcast %722 : vector<1x32xf32> to vector<16x32xf32>
    %724 = arith.addf %721, %723 : vector<16x32xf32>
    %c0_309 = arith.constant 0 : index
    %c0_310 = arith.constant 0 : index
    %725 = vector.load %arg32[%c0_309, %c0_310] : memref<32x64xf32, #tpu.memory_space<vmem>>, vector<32x64xf32>
    %cst_311 = arith.constant dense<0.000000e+00> : vector<16x64xf32>
    %726 = tpu.matmul %724, %725, %cst_311 {dimension_numbers = #tpu.dot_dimension_numbers<[1], [0], [0], [1], [0, 0, 1, 1], [], []>} : vector<16x32xf32>, vector<32x64xf32>, vector<16x64xf32> -> vector<16x64xf32>
    %c0_312 = arith.constant 0 : index
    %c0_313 = arith.constant 0 : index
    %727 = vector.load %arg33[%c0_312, %c0_313] : memref<1x64xf32, #tpu.memory_space<vmem>>, vector<1x64xf32>
    %728 = vector.broadcast %727 : vector<1x64xf32> to vector<16x64xf32>
    %729 = arith.addf %726, %728 : vector<16x64xf32>
    %cst_314 = arith.constant 0.000000e+00 : f32
    %730 = vector.broadcast %cst_314 : f32 to vector<16x64xf32>
    %731 = arith.maximumf %729, %730 : vector<16x64xf32>
    %c0_315 = arith.constant 0 : index
    %c0_316 = arith.constant 0 : index
    %732 = vector.load %arg34[%c0_315, %c0_316] : memref<64x32xf32, #tpu.memory_space<vmem>>, vector<64x32xf32>
    %cst_317 = arith.constant dense<0.000000e+00> : vector<16x32xf32>
    %733 = tpu.matmul %731, %732, %cst_317 {dimension_numbers = #tpu.dot_dimension_numbers<[1], [0], [0], [1], [0, 0, 1, 1], [], []>} : vector<16x64xf32>, vector<64x32xf32>, vector<16x32xf32> -> vector<16x32xf32>
    %c0_318 = arith.constant 0 : index
    %c0_319 = arith.constant 0 : index
    %734 = vector.load %arg35[%c0_318, %c0_319] : memref<1x32xf32, #tpu.memory_space<vmem>>, vector<1x32xf32>
    %735 = vector.broadcast %734 : vector<1x32xf32> to vector<16x32xf32>
    %736 = arith.addf %733, %735 : vector<16x32xf32>
    %737 = arith.addf %724, %736 : vector<16x32xf32>
    %cst_320 = arith.constant dense<0.000000e+00> : vector<16xf32>
    %738 = vector.multi_reduction <add>, %737, %cst_320 [1] : vector<16x32xf32> to vector<16xf32>
    %739 = vector.shape_cast %738 : vector<16xf32> to vector<16x1xf32>
    %cst_321 = arith.constant 3.200000e+01 : f32
    %740 = vector.broadcast %cst_321 : f32 to vector<16x1xf32>
    %741 = arith.divf %739, %740 : vector<16x1xf32>
    %742 = vector.broadcast %741 : vector<16x1xf32> to vector<16x32xf32>
    %743 = arith.subf %737, %742 : vector<16x32xf32>
    %744 = arith.mulf %743, %743 : vector<16x32xf32>
    %cst_322 = arith.constant dense<0.000000e+00> : vector<16xf32>
    %745 = vector.multi_reduction <add>, %744, %cst_322 [1] : vector<16x32xf32> to vector<16xf32>
    %746 = vector.shape_cast %745 : vector<16xf32> to vector<16x1xf32>
    %cst_323 = arith.constant 3.200000e+01 : f32
    %747 = vector.broadcast %cst_323 : f32 to vector<16x1xf32>
    %748 = arith.divf %746, %747 : vector<16x1xf32>
    %749 = vector.broadcast %741 : vector<16x1xf32> to vector<16x32xf32>
    %750 = arith.subf %737, %749 : vector<16x32xf32>
    %cst_324 = arith.constant 9.99999974E-6 : f32
    %751 = vector.broadcast %cst_324 : f32 to vector<16x1xf32>
    %752 = arith.addf %748, %751 : vector<16x1xf32>
    %753 = math.rsqrt %752 : vector<16x1xf32>
    %754 = vector.broadcast %753 : vector<16x1xf32> to vector<16x32xf32>
    %755 = arith.mulf %750, %754 : vector<16x32xf32>
    %c0_325 = arith.constant 0 : index
    %c0_326 = arith.constant 0 : index
    %756 = vector.load %arg36[%c0_325, %c0_326] : memref<1x32xf32, #tpu.memory_space<vmem>>, vector<1x32xf32>
    %757 = vector.broadcast %756 : vector<1x32xf32> to vector<16x32xf32>
    %758 = arith.mulf %755, %757 : vector<16x32xf32>
    %c0_327 = arith.constant 0 : index
    %c0_328 = arith.constant 0 : index
    %759 = vector.load %arg37[%c0_327, %c0_328] : memref<1x32xf32, #tpu.memory_space<vmem>>, vector<1x32xf32>
    %760 = vector.broadcast %759 : vector<1x32xf32> to vector<16x32xf32>
    %761 = arith.addf %758, %760 : vector<16x32xf32>
    %c0_329 = arith.constant 0 : index
    %c0_330 = arith.constant 0 : index
    %762 = vector.load %arg38[%c0_329, %c0_330] : memref<32x64xf32, #tpu.memory_space<vmem>>, vector<32x64xf32>
    %cst_331 = arith.constant dense<0.000000e+00> : vector<16x64xf32>
    %763 = tpu.matmul %761, %762, %cst_331 {dimension_numbers = #tpu.dot_dimension_numbers<[1], [0], [0], [1], [0, 0, 1, 1], [], []>} : vector<16x32xf32>, vector<32x64xf32>, vector<16x64xf32> -> vector<16x64xf32>
    %c0_332 = arith.constant 0 : index
    %c0_333 = arith.constant 0 : index
    %764 = vector.load %arg39[%c0_332, %c0_333] : memref<1x64xf32, #tpu.memory_space<vmem>>, vector<1x64xf32>
    %765 = vector.broadcast %764 : vector<1x64xf32> to vector<16x64xf32>
    %766 = arith.addf %763, %765 : vector<16x64xf32>
    %c0_334 = arith.constant 0 : index
    %c0_335 = arith.constant 0 : index
    %767 = vector.load %arg40[%c0_334, %c0_335] : memref<16x64xf32, #tpu.memory_space<vmem>>, vector<16x64xf32>
    tpu.vector_store %arg40[%c0_334, %c0_335], %766 {strides = array<i32>} : memref<16x64xf32, #tpu.memory_space<vmem>>, vector<16x64xf32>,
    return
  }
  func.func @transform_0(%arg0: i32) -> (i32, i32) {
    %c0_i32 = arith.constant 0 : i32
    %c0_i32_0 = arith.constant 0 : i32
    %c0_i32_1 = arith.constant 0 : i32
    return %c0_i32, %c0_i32_0 : i32, i32
  }
  func.func @transform_1(%arg0: i32) -> (i32, i32) {
    %c0_i32 = arith.constant 0 : i32
    %c0_i32_0 = arith.constant 0 : i32
    %c0_i32_1 = arith.constant 0 : i32
    return %c0_i32, %c0_i32_0 : i32, i32
  }
  func.func @transform_2(%arg0: i32) -> (i32, i32) {
    %c0_i32 = arith.constant 0 : i32
    %c0_i32_0 = arith.constant 0 : i32
    %c0_i32_1 = arith.constant 0 : i32
    return %c0_i32, %c0_i32_0 : i32, i32
  }
  func.func @transform_3(%arg0: i32) -> (i32, i32) {
    %c0_i32 = arith.constant 0 : i32
    %c0_i32_0 = arith.constant 0 : i32
    %c0_i32_1 = arith.constant 0 : i32
    return %c0_i32, %c0_i32_0 : i32, i32
  }
  func.func @transform_4(%arg0: i32) -> (i32, i32) {
    %c0_i32 = arith.constant 0 : i32
    %c0_i32_0 = arith.constant 0 : i32
    %c0_i32_1 = arith.constant 0 : i32
    return %c0_i32, %c0_i32_0 : i32, i32
  }
  func.func @transform_5(%arg0: i32) -> (i32, i32) {
    %c0_i32 = arith.constant 0 : i32
    %c0_i32_0 = arith.constant 0 : i32
    %c0_i32_1 = arith.constant 0 : i32
    return %c0_i32, %c0_i32_0 : i32, i32
  }
  func.func @transform_6(%arg0: i32) -> (i32, i32) {
    %c0_i32 = arith.constant 0 : i32
    %c0_i32_0 = arith.constant 0 : i32
    %c0_i32_1 = arith.constant 0 : i32
    return %c0_i32, %c0_i32_0 : i32, i32
  }
  func.func @transform_7(%arg0: i32) -> (i32, i32) {
    %c0_i32 = arith.constant 0 : i32
    %c0_i32_0 = arith.constant 0 : i32
    %c0_i32_1 = arith.constant 0 : i32
    return %c0_i32, %c0_i32_0 : i32, i32
  }
  func.func @transform_8(%arg0: i32) -> (i32, i32) {
    %c0_i32 = arith.constant 0 : i32
    %c0_i32_0 = arith.constant 0 : i32
    %c0_i32_1 = arith.constant 0 : i32
    return %c0_i32, %c0_i32_0 : i32, i32
  }
  func.func @transform_9(%arg0: i32) -> (i32, i32) {
    %c0_i32 = arith.constant 0 : i32
    %c0_i32_0 = arith.constant 0 : i32
    %c0_i32_1 = arith.constant 0 : i32
    return %c0_i32, %c0_i32_0 : i32, i32
  }
  func.func @transform_10(%arg0: i32) -> (i32, i32) {
    %c0_i32 = arith.constant 0 : i32
    %c0_i32_0 = arith.constant 0 : i32
    %c0_i32_1 = arith.constant 0 : i32
    return %c0_i32, %c0_i32_0 : i32, i32
  }
  func.func @transform_11(%arg0: i32) -> (i32, i32) {
    %c0_i32 = arith.constant 0 : i32
    %c0_i32_0 = arith.constant 0 : i32
    %c0_i32_1 = arith.constant 0 : i32
    return %c0_i32, %c0_i32_0 : i32, i32
  }
  func.func @transform_12(%arg0: i32) -> (i32, i32) {
    %c0_i32 = arith.constant 0 : i32
    %c0_i32_0 = arith.constant 0 : i32
    %c0_i32_1 = arith.constant 0 : i32
    return %c0_i32, %c0_i32_0 : i32, i32
  }
  func.func @transform_13(%arg0: i32) -> (i32, i32) {
    %c0_i32 = arith.constant 0 : i32
    %c0_i32_0 = arith.constant 0 : i32
    %c0_i32_1 = arith.constant 0 : i32
    return %c0_i32, %c0_i32_0 : i32, i32
  }
  func.func @transform_14(%arg0: i32) -> (i32, i32) {
    %c0_i32 = arith.constant 0 : i32
    %c0_i32_0 = arith.constant 0 : i32
    %c0_i32_1 = arith.constant 0 : i32
    return %c0_i32, %c0_i32_0 : i32, i32
  }
  func.func @transform_15(%arg0: i32) -> (i32, i32) {
    %c0_i32 = arith.constant 0 : i32
    %c0_i32_0 = arith.constant 0 : i32
    %c0_i32_1 = arith.constant 0 : i32
    return %c0_i32, %c0_i32_0 : i32, i32
  }
  func.func @transform_16(%arg0: i32) -> (i32, i32) {
    %c0_i32 = arith.constant 0 : i32
    %c0_i32_0 = arith.constant 0 : i32
    %c0_i32_1 = arith.constant 0 : i32
    return %c0_i32, %c0_i32_0 : i32, i32
  }
  func.func @transform_17(%arg0: i32) -> (i32, i32) {
    %c0_i32 = arith.constant 0 : i32
    %c0_i32_0 = arith.constant 0 : i32
    %c0_i32_1 = arith.constant 0 : i32
    return %c0_i32, %c0_i32_0 : i32, i32
  }
  func.func @transform_18(%arg0: i32) -> (i32, i32) {
    %c0_i32 = arith.constant 0 : i32
    %c0_i32_0 = arith.constant 0 : i32
    %c0_i32_1 = arith.constant 0 : i32
    return %c0_i32, %c0_i32_0 : i32, i32
  }
  func.func @transform_19(%arg0: i32) -> (i32, i32) {
    %c0_i32 = arith.constant 0 : i32
    %c0_i32_0 = arith.constant 0 : i32
    %c0_i32_1 = arith.constant 0 : i32
    return %c0_i32, %c0_i32_0 : i32, i32
  }
  func.func @transform_20(%arg0: i32) -> (i32, i32) {
    %c0_i32 = arith.constant 0 : i32
    %c0_i32_0 = arith.constant 0 : i32
    %c0_i32_1 = arith.constant 0 : i32
    return %c0_i32, %c0_i32_0 : i32, i32
  }
  func.func @transform_21(%arg0: i32) -> (i32, i32) {
    %c0_i32 = arith.constant 0 : i32
    %c0_i32_0 = arith.constant 0 : i32
    %c0_i32_1 = arith.constant 0 : i32
    return %c0_i32, %c0_i32_0 : i32, i32
  }
  func.func @transform_22(%arg0: i32) -> (i32, i32) {
    %c0_i32 = arith.constant 0 : i32
    %c0_i32_0 = arith.constant 0 : i32
    %c0_i32_1 = arith.constant 0 : i32
    return %c0_i32, %c0_i32_0 : i32, i32
  }
  func.func @transform_23(%arg0: i32) -> (i32, i32) {
    %c0_i32 = arith.constant 0 : i32
    %c0_i32_0 = arith.constant 0 : i32
    %c0_i32_1 = arith.constant 0 : i32
    return %c0_i32, %c0_i32_0 : i32, i32
  }
  func.func @transform_24(%arg0: i32) -> (i32, i32) {
    %c0_i32 = arith.constant 0 : i32
    %c0_i32_0 = arith.constant 0 : i32
    %c0_i32_1 = arith.constant 0 : i32
    return %c0_i32, %c0_i32_0 : i32, i32
  }
  func.func @transform_25(%arg0: i32) -> (i32, i32) {
    %c0_i32 = arith.constant 0 : i32
    %c0_i32_0 = arith.constant 0 : i32
    %c0_i32_1 = arith.constant 0 : i32
    return %c0_i32, %c0_i32_0 : i32, i32
  }
  func.func @transform_26(%arg0: i32) -> (i32, i32) {
    %c0_i32 = arith.constant 0 : i32
    %c0_i32_0 = arith.constant 0 : i32
    %c0_i32_1 = arith.constant 0 : i32
    return %c0_i32, %c0_i32_0 : i32, i32
  }
  func.func @transform_27(%arg0: i32) -> (i32, i32) {
    %c0_i32 = arith.constant 0 : i32
    %c0_i32_0 = arith.constant 0 : i32
    %c0_i32_1 = arith.constant 0 : i32
    return %c0_i32, %c0_i32_0 : i32, i32
  }
  func.func @transform_28(%arg0: i32) -> (i32, i32) {
    %c0_i32 = arith.constant 0 : i32
    %c0_i32_0 = arith.constant 0 : i32
    %c0_i32_1 = arith.constant 0 : i32
    return %c0_i32, %c0_i32_0 : i32, i32
  }
  func.func @transform_29(%arg0: i32) -> (i32, i32) {
    %c0_i32 = arith.constant 0 : i32
    %c0_i32_0 = arith.constant 0 : i32
    %c0_i32_1 = arith.constant 0 : i32
    return %c0_i32, %c0_i32_0 : i32, i32
  }
  func.func @transform_30(%arg0: i32) -> (i32, i32) {
    %c0_i32 = arith.constant 0 : i32
    %c0_i32_0 = arith.constant 0 : i32
    %c0_i32_1 = arith.constant 0 : i32
    return %c0_i32, %c0_i32_0 : i32, i32
  }
  func.func @transform_31(%arg0: i32) -> (i32, i32) {
    %c0_i32 = arith.constant 0 : i32
    %c0_i32_0 = arith.constant 0 : i32
    %c0_i32_1 = arith.constant 0 : i32
    return %c0_i32, %c0_i32_0 : i32, i32
  }
  func.func @transform_32(%arg0: i32) -> (i32, i32) {
    %c0_i32 = arith.constant 0 : i32
    %c0_i32_0 = arith.constant 0 : i32
    %c0_i32_1 = arith.constant 0 : i32
    return %c0_i32, %c0_i32_0 : i32, i32
  }
  func.func @transform_33(%arg0: i32) -> (i32, i32) {
    %c0_i32 = arith.constant 0 : i32
    %c0_i32_0 = arith.constant 0 : i32
    %c0_i32_1 = arith.constant 0 : i32
    return %c0_i32, %c0_i32_0 : i32, i32
  }
  func.func @transform_34(%arg0: i32) -> (i32, i32) {
    %c0_i32 = arith.constant 0 : i32
    %c0_i32_0 = arith.constant 0 : i32
    %c0_i32_1 = arith.constant 0 : i32
    return %c0_i32, %c0_i32_0 : i32, i32
  }
  func.func @transform_35(%arg0: i32) -> (i32, i32) {
    %c0_i32 = arith.constant 0 : i32
    %c0_i32_0 = arith.constant 0 : i32
    %c0_i32_1 = arith.constant 0 : i32
    return %c0_i32, %c0_i32_0 : i32, i32
  }
  func.func @transform_36(%arg0: i32) -> (i32, i32) {
    %c0_i32 = arith.constant 0 : i32
    %c0_i32_0 = arith.constant 0 : i32
    %c0_i32_1 = arith.constant 0 : i32
    return %c0_i32, %c0_i32_0 : i32, i32
  }
  func.func @transform_37(%arg0: i32) -> (i32, i32) {
    %c0_i32 = arith.constant 0 : i32
    %c0_i32_0 = arith.constant 0 : i32
    %c0_i32_1 = arith.constant 0 : i32
    return %c0_i32, %c0_i32_0 : i32, i32
  }
  func.func @transform_38(%arg0: i32) -> (i32, i32) {
    %c0_i32 = arith.constant 0 : i32
    %c0_i32_0 = arith.constant 0 : i32
    %c0_i32_1 = arith.constant 0 : i32
    return %c0_i32, %c0_i32_0 : i32, i32
  }
  func.func @transform_39(%arg0: i32) -> (i32, i32) {
    %c0_i32 = arith.constant 0 : i32
    %c0_i32_0 = arith.constant 0 : i32
    %c0_i32_1 = arith.constant 0 : i32
    return %c0_i32, %c0_i32_0 : i32, i32
  }
}

</mosaic_0001>

<bundles_post_ra>
// kernel: pallas_forward.1
= control target key start
LH: loop header
LB: loop body
LE: loop exit
PB: predicated region body
PF: predicated region fallthrough
CT: control target
= control target key end

     0   :  { %s8289_s6 = smov 1   ;;  %s8290_s10 = smov 2   ;;  %s9361_s0 = inlined_call_operand.smem [shape: u32[40], index: -1, kind: input, shape index: {}] }
   0x1   :  { %s8352_s5 = sld [smem:[%s9361_s0]]   ;;  %s8291_s14 = smov 3  }
   0x2   :  { %s8357_s9 = sld [smem:[%s9361_s0 + %s8289_s6]]   ;;  %s8292_s18 = smov 4  }
   0x3   :  { %s8362_s13 = sld [smem:[%s9361_s0 + %s8290_s10]]   ;;  %s8293_s22 = smov 5  }
   0x4   :  { %s8367_s17 = sld [smem:[%s9361_s0 + %s8291_s14]]   ;;  %s8294_s26 = smov 6  }
   0x5   :  { %s8372_s21 = sld [smem:[%s9361_s0 + %s8292_s18]]   ;;  %s8295_s30 = smov 7  }
   0x6   :  { %s8377_s25 = sld [smem:[%s9361_s0 + %s8293_s22]]   ;;  %s8296_s4 = smov 8  }
   0x7   :  { %s8382_s29 = sld [smem:[%s9361_s0 + %s8294_s26]]   ;;  %s8297_s10 = smov 9  }
   0x8   :  { %s8387_s3 = sld [smem:[%s9361_s0 + %s8295_s30]]   ;;  %s8298_s15 = smov 10  }
   0x9   :  { %9369 = sst [smem:[#allocation6_spill]] %s8362_s13  ;;  %s8299_s20 = smov 11  }
   0xa   :  { %s8392_s8 = sld [smem:[%s9361_s0 + %s8296_s4]]   ;;  %s8300_s26 = smov 12  }
   0xb   :  { %9370 = sst [smem:[#allocation7_spill]] %s8372_s21  ;;  %s8301_s1 = smov 13  }
   0xc   :  { %s8397_s14 = sld [smem:[%s9361_s0 + %s8297_s10]]   ;;  %s8302_s7 = smov 14  }
   0xd   :  { %s8402_s19 = sld [smem:[%s9361_s0 + %s8298_s15]]   ;;  %s8303_s15 = smov 15  }
   0xe   :  { %s8407_s24 = sld [smem:[%s9361_s0 + %s8299_s20]]   ;;  %s8304_s22 = smov 16  }
   0xf   :  { %s8412_s30 = sld [smem:[%s9361_s0 + %s8300_s26]]   ;;  %s8305_s28 = smov 17  }
  0x10   :  { %s8417_s6 = sld [smem:[%s9361_s0 + %s8301_s1]]  }
  0x11   :  { %s8422_s12 = sld [smem:[%s9361_s0 + %s8302_s7]]   ;;  %s8306_s7 = smov 18  }
  0x12   :  { %s8427_s20 = sld [smem:[%s9361_s0 + %s8303_s15]]   ;;  %s8307_s15 = smov 19  }
  0x13   :  { %s8432_s27 = sld [smem:[%s9361_s0 + %s8304_s22]]   ;;  %s8308_s22 = smov 20  }
  0x14   :  { %s8437_s4 = sld [smem:[%s9361_s0 + %s8305_s28]]   ;;  %s8309_s28 = smov 21  }
  0x15   :  { %s8457_s21 = sld [smem:[%s9361_s0 + %s8309_s28]]   ;;  %s8313_s28 = smov 25  }
  0x17   :  { %9371 = sst [smem:[#allocation8_spill]] %s8422_s12 }
  0x18   :  { %9372 = sst [smem:[#allocation9_spill]] %s8427_s20 }
  0x19   :  { %9373 = sst [smem:[#allocation10_spill]] %s8432_s27 }
  0x1a   :  { %s8442_s12 = sld [smem:[%s9361_s0 + %s8306_s7]]   ;;  %s8310_s7 = smov 22  }
  0x1b   :  { %s8447_s20 = sld [smem:[%s9361_s0 + %s8307_s15]]   ;;  %s8311_s15 = smov 23  }
  0x1c   :  { %s8452_s27 = sld [smem:[%s9361_s0 + %s8308_s22]]   ;;  %s8312_s22 = smov 24  }
  0x1d   :  { %9376 = sst [smem:[#allocation13_spill]] %s8457_s21 }
  0x1e   :  { %s8462_s13 = sld [smem:[%s9361_s0 + %s8310_s7]]   ;;  %s8314_s7 = smov 26  }
  0x1f   :  { %s8477_s21 = sld [smem:[%s9361_s0 + %s8313_s28]]   ;;  %s8317_s28 = smov 29  }
  0x21   :  { %9374 = sst [smem:[#allocation11_spill]] %s8447_s20 }
  0x22   :  { %9375 = sst [smem:[#allocation12_spill]] %s8452_s27 }
  0x23   :  { %s8467_s20 = sld [smem:[%s9361_s0 + %s8311_s15]]   ;;  %s8315_s15 = smov 27  }
  0x24   :  { %9377 = sst [smem:[#allocation14_spill]] %s8462_s13 }
  0x25   :  { %s8472_s27 = sld [smem:[%s9361_s0 + %s8312_s22]]   ;;  %s8316_s22 = smov 28  }
  0x26   :  { %9380 = sst [smem:[#allocation17_spill]] %s8477_s21 }
  0x27   :  { %s8482_s13 = sld [smem:[%s9361_s0 + %s8314_s7]]   ;;  %s8318_s7 = smov 30  }
  0x28   :  { %s8497_s21 = sld [smem:[%s9361_s0 + %s8317_s28]]   ;;  %s8321_s28 = smov 33  }
  0x29   :  { %9378 = sst [smem:[#allocation15_spill]] %s8467_s20 }
  0x2a   :  { %s8487_s20 = sld [smem:[%s9361_s0 + %s8315_s15]]   ;;  %s8319_s15 = smov 31  }
  0x2b   :  { %9379 = sst [smem:[#allocation16_spill]] %s8472_s27 }
  0x2c   :  { %s8492_s27 = sld [smem:[%s9361_s0 + %s8316_s22]]   ;;  %s8320_s22 = smov 32  }
  0x2d   :  { %9381 = sst [smem:[#allocation18_spill]] %s8482_s13 }
  0x2e   :  { %9384 = sst [smem:[#allocation21_spill]] %s8497_s21 }
  0x2f   :  { %s8502_s13 = sld [smem:[%s9361_s0 + %s8318_s7]]   ;;  %s8322_s7 = smov 34  }
  0x30   :  { %9382 = sst [smem:[#allocation19_spill]] %s8487_s20 }
  0x31   :  { %s8507_s20 = sld [smem:[%s9361_s0 + %s8319_s15]]   ;;  %s8323_s15 = smov 35  }
  0x32   :  { %9383 = sst [smem:[#allocation20_spill]] %s8492_s27 }
  0x33   :  { %s8512_s27 = sld [smem:[%s9361_s0 + %s8320_s22]]   ;;  %s8324_s22 = smov 36  }
  0x34   :  { %s8517_s21 = sld [smem:[%s9361_s0 + %s8321_s28]]   ;;  %s8325_s28 = smov 37  }
  0x35   :  { %9385 = sst [smem:[#allocation22_spill]] %s8502_s13 }
  0x36   :  { %s8522_s13 = sld [smem:[%s9361_s0 + %s8322_s7]]   ;;  %s8326_s7 = smov 38  }
  0x37   :  { %9386 = sst [smem:[#allocation23_spill]] %s8507_s20 }
  0x38   :  { %s8527_s20 = sld [smem:[%s9361_s0 + %s8323_s15]]   ;;  %s8327_s15 = smov 39  }
  0x39   :  { %9387 = sst [smem:[#allocation24_spill]] %s8512_s27 }
  0x3a   :  { %9388 = sst [smem:[#allocation25_spill]] %s8517_s21 }
  0x3b   :  { %s8532_s27 = sld [smem:[%s9361_s0 + %s8324_s22]]  }
  0x3c   :  { %9389 = sst [smem:[#allocation26_spill]] %s8522_s13 }
  0x3d   :  { %s8537_s21 = sld [smem:[%s9361_s0 + %s8325_s28]]  }
  0x3e   :  { %9390 = sst [smem:[#allocation27_spill]] %s8527_s20 }
  0x3f   :  { %s8542_s13 = sld [smem:[%s9361_s0 + %s8326_s7]]  }
  0x40   :  { %s8547_s20 = sld [smem:[%s9361_s0 + %s8327_s15]]  }
  0x41   :  { %v165_v0 = vld [vmem:[%s8377_s25] sm:$0xff]  ;;  %v166_v1 = vld [vmem:[%s8377_s25 + $0x8] sm:$0xff]  ;;  %v167_v2 = vld [vmem:[%s8377_s25 + $0x10] sm:$0xff]  ;;  %vm176_vm0 = vcmask 261120  }
  0x42   :  { %v8006_v3 = vpack.c.bf16 %v166_v1, %v165_v0  ;;  %v168_v4 = vld [vmem:[%s8377_s25 + $0x18] sm:$0xff]  ;;  %v8554_v5 = vld [vmem:[%s8352_s5] sm:$0xff] }
  0x43   :  { %v8010_v6 = vpack.c.bf16 %v168_v4, %v167_v2  ;;  %7539 = vmatprep.mubr.msk.f32.mxu0 %vm176_vm0, %v8554_v5 }
  0x44   :  { %84 = vsyncpa [#allocation4], 0  ;;  %8007 = vmatprep.subr.bf16.mxu0 %v8006_v3  ;;  %v8559_v7 = vld [vmem:[%s8352_s5 + $0x8] sm:$0xff]  ;;  %v8328_v8 = vmov 0.0   ;;  %vm8329_vm1 = vmmov 0   ;;  %s8330_s0 = smov 120  }
  0x45   :  { %8009 = vmatpush3.bf16.msra.mxu0 %v8006_v3  ;;  %7542 = vmatprep.subr.mxu1 %v8328_v8  ;;  %v7180_v9 = vld [vmem:[%s8382_s29] ss:$0 sm:$0xff]  ;;  %s8331_s5 = smov 96   ;;  %s8332_s25 = smov 88   ;;  %vm262_vm2 = vcmask 64512   ;;  %v8609_v38 = vld [vmem:[%s8387_s3 + $0x8] sm:$0xff] }
  0x46   :  { %8011 = vmatprep.subr.bf16.mxu0 %v8010_v6  ;;  %7544 = vmatprep.mubr.msk.f32.mxu1 %vm8329_vm1, %v8328_v8  ;;  %v8592_v18 = vld [vmem:[%s8367_s17] ss:$0 sm:$0xff]  ;;  %s8333_s29 = smov 56   ;;  %s8334_s22 = smov 64   ;;  %vm2375_vm3 = vcmask 523264  }
  0x47   :  { %s8335_s23 = smov 80   ;;  %s8336_s26 = smov 112   ;;  %v8622_v47 = vld [vmem:[%s8387_s3] sm:$0xff] }
  0x48   :  { %s8337_s28 = smov 72   ;;  %s8338_s1 = smov 104  }
  0x49   :  { %8013 = vmatpush3.bf16.msra.mxu0 %v8010_v6  ;;  %s8339_s2 = smov 48   ;;  %s8340_s7 = smov 40  }
  0x4a   :  { %7552 = vmatprep.subr.mxu0 %v8328_v8  ;;  %s9401_s10 = sld [smem:[#allocation15_spill]]  ;;  %s9402_s11 = sld [smem:[#allocation18_spill]] }
  0x4b   :  { %s9403_s15 = sld [smem:[#allocation16_spill]]  ;;  %s9404_s16 = sld [smem:[#allocation19_spill]] }
  0x4c   :  { %7540 = vmatmul.mubr.msk.f32.vlgmr.msra.gmra.mrb[0].mxu0 %vm176_vm0, %v8559_v7  ;;  %s9406_s18 = sld [smem:[#allocation21_spill]] }
  0x4d   :  { %7554 = vmatprep.mubr.msk.f32.mxu0 %vm8329_vm1, %v8328_v8 }
 0x11f   :  { %v7541_v10 = vpop.f32.mrb[0].mxu0 }
 0x120   :  { %v8570_v11 = vadd.f32 %v7541_v10, %v7180_v9  ;;  %v249_v12 = vpop.f32.mrb[1].mxu0 }
 0x121   :  { %v8572_v13 = vadd.f32 %v7180_v9, %v249_v12 }
 0x123   :  { %431 = vrot.lane.b32.xlu1 %v8572_v13, %s8330_s0  ;;  %260 = vrot.lane.b32.xlu0 %v8572_v13, %s8331_s5 }
 0x127   :  { %433 = vrot.lane.b32.xlu0 %v8572_v13, %s8332_s25 }
 0x195   :  { %v261_v14 = vpop.permute.xlu0 %260  ;;  %v432_v16 = vpop.permute.xlu1 %431 }
 0x196   :  { %7543 = vmatpush3.xpose.msk.msra.mxu1 %vm262_vm2, %v261_v14 }
 0x197   :  { %7547 = vmatprep.subr.mxu1 %v8328_v8 }
 0x199   :  { %7545 = vmatmul.mubr.msk.f32.vlgmr.msra.gmra.mrb[0].mxu1 %vm262_vm2, %v8572_v13  ;;  %v434_v15 = vpop.permute.xlu0 %433 }
 0x19a   :  { %7553 = vmatpush3.xpose.msk.msra.mxu0 %vm262_vm2, %v434_v15  ;;  %7549 = vmatprep.mubr.msk.f32.mxu1 %vm8329_vm1, %v8328_v8 }
 0x19b   :  { %7562 = vmatprep.subr.mxu0 %v8328_v8 }
 0x19d   :  { %7555 = vmatmul.mubr.msk.f32.vlgmr.msra.gmra.mrb[2].mxu0 %vm262_vm2, %v432_v16  ;;  %v8660_v16 = vld [vmem:[%s8387_s3 + $0x10] sm:$0xff] }
 0x19e   :  { %7564 = vmatprep.mubr.msk.f32.mxu0 %vm8329_vm1, %v8328_v8  ;;  %7563 = vmatpush3.msra.mxu0 %v8609_v38 }
 0x19f   :  { %7572 = vmatprep.subr.mxu0 %v8328_v8 }
 0x26c   :  { %v333_v17 = vpop.f32.mrb[0].mxu1 }
 0x26d   :  { %v337_v19 = vmul.f32 0.35355338, %v333_v17  ;;  %v7546_v20 = vpop.f32.mrb[1].mxu1 }
 0x26f   :  { %v342_v21 = vadd.f32 %v8592_v18, %v337_v19 }
 0x270   :  { %v505_v22 = vpop.f32.mrb[2].mxu0 }
 0x271   :  { %v509_v23 = vmul.f32 0.35355338, %v505_v22  ;;  %v7556_v24 = vpop.f32.mrb[3].mxu0  ;;  %v343_v25 = vsel %vm262_vm2, %v342_v21, -inf }
 0x272   :  { %344 = vmax.xlane.f32.xlu1 %v343_v25 }
 0x273   :  { %v510_v26 = vadd.f32 %v8592_v18, %v509_v23 }
 0x275   :  { %v511_v27 = vsel %vm262_vm2, %v510_v26, -inf }
 0x276   :  { %512 = vmax.xlane.f32.xlu0 %v511_v27 }
 0x2ff   :  { %v345_v28 = vpop.xlane.xlu1 %344 }
 0x300   :  { %v346_v29 = vsub.f32 %v342_v21, %v345_v28 }
 0x302   :  { %v347_v30 = vmul.f32 1.442695, %v346_v29 }
 0x303   :  { %v513_v31 = vpop.xlane.xlu0 %512 }
 0x304   :  { %8149 = vpow2.f32 %v347_v30  ;;  %v514_v32 = vsub.f32 %v510_v26, %v513_v31 }
 0x306   :  { %v515_v33 = vmul.f32 1.442695, %v514_v32 }
 0x308   :  { %8151 = vpow2.f32 %v515_v33 }
 0x30e   :  { %v8150_v34 = vpop.eup %8149 }
 0x30f   :  { %v349_v35 = vsel %vm262_vm2, %v8150_v34, 0.0 }
 0x310   :  { %350 = vadd.xlane.f32.xlu0 %v349_v35 }
 0x312   :  { %v8152_v36 = vpop.eup %8151 }
 0x313   :  { %v517_v37 = vsel %vm262_vm2, %v8152_v36, 0.0 }
 0x314   :  { %518 = vadd.xlane.f32.xlu1 %v517_v37 }
 0x325   :  { %522 = vrot.lane.b32.xlu1 %v8572_v13, %s8333_s29 }
 0x326   :  { %354 = vrot.lane.b32.xlu0 %v8572_v13, %s8334_s22 }
 0x329   :  { %747 = vrot.lane.b32.xlu1 %v8572_v13, %s8335_s23 }
 0x32a   :  { %745 = vrot.lane.b32.xlu0 %v8572_v13, %s8336_s26 }
 0x39d   :  { %v351_v39 = vpop.xlane.xlu0 %350 }
 0x39e   :  { %8153 = vrcp.f32 %v351_v39  ;;  %v8697_v39 = vld [vmem:[%s8387_s3 + $0x18] sm:$0xff]  ;;  %s9392_s3 = sld [smem:[#allocation7_spill]] }
 0x3a1   :  { %v519_v40 = vpop.xlane.xlu1 %518  ;;  %v355_v41 = vpop.permute.xlu0 %354 }
 0x3a2   :  { %8155 = vrcp.f32 %v519_v40  ;;  %7548 = vmatpush3.msra.mxu1 %v355_v41 }
 0x3a3   :  { %7557 = vmatprep.subr.mxu1 %v8328_v8 }
 0x3a5   :  { %v523_v44 = vpop.permute.xlu1 %522  ;;  %v746_v53 = vpop.permute.xlu0 %745 }
 0x3a8   :  { %v8154_v42 = vpop.eup %8153 }
 0x3a9   :  { %v353_v43 = vmul.f32 %v8154_v42, %v8150_v34  ;;  %v748_v51 = vpop.permute.xlu1 %747 }
 0x3ab   :  { %7550 = vmatmul.mubr.msk.f32.vlgmr.msra.gmra.mrb[2].mxu1 %vm262_vm2, %v353_v43 }
 0x3ac   :  { %v8156_v45 = vpop.eup %8155  ;;  %7558 = vmatpush3.msra.mxu1 %v523_v44  ;;  %7559 = vmatprep.mubr.msk.f32.mxu1 %vm8329_vm1, %v8328_v8 }
 0x3ad   :  { %v521_v46 = vmul.f32 %v8156_v45, %v8152_v36  ;;  %7567 = vmatprep.subr.mxu1 %v8328_v8 }
 0x3af   :  { %7560 = vmatmul.mubr.msk.f32.vlgmr.msra.gmra.mrb[4].mxu1 %vm262_vm2, %v521_v46 }
 0x3b0   :  { %7569 = vmatprep.mubr.msk.f32.mxu1 %vm8329_vm1, %v8328_v8  ;;  %7568 = vmatpush3.msra.mxu1 %v8622_v47 }
 0x3b1   :  { %7577 = vmatprep.subr.mxu1 %v8328_v8 }
 0x47e   :  { %v426_v48 = vpop.f32.mrb[2].mxu1 }
 0x47f   :  { %v7551_v49 = vpop.f32.mrb[3].mxu1  ;;  %7570 = vmatmul.mubr.msk.f32.vlgmr.msra.gmra.mrb[6].mxu1 %vm262_vm2, %v426_v48 }
 0x480   :  { %7579 = vmatprep.mubr.msk.f32.mxu1 %vm8329_vm1, %v8328_v8 }
 0x482   :  { %v594_v50 = vpop.f32.mrb[4].mxu1 }
 0x483   :  { %v7561_v52 = vpop.f32.mrb[5].mxu1  ;;  %7565 = vmatmul.mubr.msk.f32.vlgmr.msra.gmra.mrb[4].mxu0 %vm262_vm2, %v594_v50 }
 0x484   :  { %7573 = vmatpush3.xpose.msk.msra.mxu0 %vm262_vm2, %v748_v51  ;;  %7574 = vmatprep.mubr.msk.f32.mxu0 %vm8329_vm1, %v8328_v8 }
 0x485   :  { %7582 = vmatprep.subr.mxu0 %v8328_v8 }
 0x487   :  { %7575 = vmatmul.mubr.msk.f32.vlgmr.msra.gmra.mrb[6].mxu0 %vm262_vm2, %v746_v53 }
 0x488   :  { %7584 = vmatprep.mubr.msk.f32.mxu0 %vm8329_vm1, %v8328_v8  ;;  %7583 = vmatpush3.msra.mxu0 %v8660_v16 }
 0x489   :  { %7592 = vmatprep.subr.mxu0 %v8328_v8 }
 0x552   :  { %v741_v54 = vpop.f32.mrb[6].mxu1 }
 0x553   :  { %v7571_v55 = vpop.f32.mrb[7].mxu1 }
 0x556   :  { %v668_v56 = vpop.f32.mrb[4].mxu0 }
 0x557   :  { %v8637_v57 = vadd.f32 %v741_v54, %v668_v56  ;;  %v7566_v58 = vpop.f32.mrb[5].mxu0 }
 0x55a   :  { %v819_v59 = vpop.f32.mrb[6].mxu0 }
 0x55b   :  { %v823_v60 = vmul.f32 0.35355338, %v819_v59  ;;  %v7576_v61 = vpop.f32.mrb[7].mxu0 }
 0x55d   :  { %v824_v62 = vadd.f32 %v8592_v18, %v823_v60 }
 0x55f   :  { %v825_v63 = vsel %vm262_vm2, %v824_v62, -inf }
 0x560   :  { %826 = vmax.xlane.f32.xlu1 %v825_v63 }
 0x571   :  { %989 = vrot.lane.b32.xlu1 %v8572_v13, %s8337_s28 }
 0x575   :  { %987 = vrot.lane.b32.xlu1 %v8572_v13, %s8338_s1 }
 0x579   :  { %1240 = vrot.lane.b32.xlu1 %v8570_v11, %s8331_s5 }
 0x5ed   :  { %v827_v0 = vpop.xlane.xlu1 %826 }
 0x5ee   :  { %v828_v1 = vsub.f32 %v824_v62, %v827_v0 }
 0x5f0   :  { %v829_v2 = vmul.f32 1.442695, %v828_v1  ;;  %v8723_v1 = vld [vmem:[%s8392_s8] ss:$0 sm:$0xff]  ;;  %s9393_s8 = sld [smem:[#allocation11_spill]] }
 0x5f1   :  { %v990_v12 = vpop.permute.xlu1 %989 }
 0x5f2   :  { %8157 = vpow2.f32 %v829_v2 }
 0x5f5   :  { %v988_v15 = vpop.permute.xlu1 %987 }
 0x5f9   :  { %v1241_v32 = vpop.permute.xlu1 %1240 }
 0x5fc   :  { %v8158_v3 = vpop.eup %8157 }
 0x5fd   :  { %v831_v4 = vsel %vm262_vm2, %v8158_v3, 0.0 }
 0x5fe   :  { %832 = vadd.xlane.f32.xlu0 %v831_v4 }
 0x614   :  { %836 = vrot.lane.b32.xlu0 %v8572_v13, %s8339_s2 }
 0x68b   :  { %v833_v6 = vpop.xlane.xlu0 %832 }
 0x68c   :  { %8159 = vrcp.f32 %v833_v6 }
 0x68f   :  { %v837_v9 = vpop.permute.xlu0 %836 }
 0x690   :  { %7578 = vmatpush3.msra.mxu1 %v837_v9 }
 0x691   :  { %7587 = vmatprep.subr.mxu1 %v8328_v8 }
 0x696   :  { %v8160_v10 = vpop.eup %8159 }
 0x697   :  { %v835_v14 = vmul.f32 %v8160_v10, %v8158_v3 }
 0x699   :  { %7580 = vmatmul.mubr.msk.f32.vlgmr.msra.gmra.mrb[8].mxu1 %vm262_vm2, %v835_v14 }
 0x69a   :  { %7588 = vmatpush3.xpose.msk.msra.mxu1 %vm262_vm2, %v990_v12  ;;  %7589 = vmatprep.mubr.msk.f32.mxu1 %vm8329_vm1, %v8328_v8 }
 0x69b   :  { %7597 = vmatprep.subr.mxu1 %v8328_v8 }
 0x69d   :  { %7590 = vmatmul.mubr.msk.f32.vlgmr.msra.gmra.mrb[10].mxu1 %vm262_vm2, %v988_v15 }
 0x69e   :  { %7599 = vmatprep.mubr.msk.f32.mxu1 %vm8329_vm1, %v8328_v8  ;;  %7598 = vmatpush3.msra.mxu1 %v8697_v39 }
 0x69f   :  { %7607 = vmatprep.subr.mxu1 %v8328_v8 }
 0x76c   :  { %v908_v17 = vpop.f32.mrb[8].mxu1 }
 0x76d   :  { %v7581_v19 = vpop.f32.mrb[9].mxu1  ;;  %7585 = vmatmul.mubr.msk.f32.vlgmr.msra.gmra.mrb[8].mxu0 %vm262_vm2, %v908_v17 }
 0x76e   :  { %7594 = vmatprep.mubr.msk.f32.mxu0 %vm8329_vm1, %v8328_v8 }
 0x770   :  { %v1061_v20 = vpop.f32.mrb[10].mxu1 }
 0x771   :  { %v1065_v21 = vmul.f32 0.35355338, %v1061_v20  ;;  %v7591_v22 = vpop.f32.mrb[11].mxu1 }
 0x773   :  { %v1066_v23 = vadd.f32 %v8592_v18, %v1065_v21 }
 0x775   :  { %v1067_v24 = vsel %vm262_vm2, %v1066_v23, -inf }
 0x776   :  { %1068 = vmax.xlane.f32.xlu0 %v1067_v24 }
 0x78c   :  { %1078 = vrot.lane.b32.xlu0 %v8572_v13, %s8340_s7 }
 0x790   :  { %1412 = vrot.lane.b32.xlu0 %v8570_v11, %s8332_s25 }
 0x803   :  { %v1069_v25 = vpop.xlane.xlu0 %1068 }
 0x804   :  { %v1070_v26 = vsub.f32 %v1066_v23, %v1069_v25 }
 0x806   :  { %v1071_v27 = vmul.f32 1.442695, %v1070_v26 }
 0x807   :  { %v1079_v28 = vpop.permute.xlu0 %1078 }
 0x808   :  { %8161 = vpow2.f32 %v1071_v27  ;;  %7593 = vmatpush3.msra.mxu0 %v1079_v28 }
 0x809   :  { %7602 = vmatprep.subr.mxu0 %v8328_v8 }
 0x80b   :  { %v1413_v36 = vpop.permute.xlu0 %1412 }
 0x812   :  { %v8162_v29 = vpop.eup %8161 }
 0x813   :  { %v1073_v18 = vsel %vm262_vm2, %v8162_v29, 0.0 }
 0x814   :  { %1074 = vadd.xlane.f32.xlu1 %v1073_v18 }
 0x825   :  { %1410 = vrot.lane.b32.xlu1 %v8570_v11, %s8330_s0 }
 0x840   :  { %v982_v30 = vpop.f32.mrb[8].mxu0 }
 0x841   :  { %v8678_v13 = vadd.f32 %v982_v30, %v8637_v57  ;;  %v7586_v31 = vpop.f32.mrb[9].mxu0 }
 0x8a1   :  { %v1075_v33 = vpop.xlane.xlu1 %1074 }
 0x8a2   :  { %8163 = vrcp.f32 %v1075_v33 }
 0x8a5   :  { %v1411_v37 = vpop.permute.xlu1 %1410 }
 0x8ac   :  { %v8164_v34 = vpop.eup %8163 }
 0x8ad   :  { %v1077_v35 = vmul.f32 %v8164_v34, %v8162_v29 }
 0x8af   :  { %7595 = vmatmul.mubr.msk.f32.vlgmr.msra.gmra.mrb[10].mxu0 %vm262_vm2, %v1077_v35 }
 0x8b0   :  { %7603 = vmatpush3.xpose.msk.msra.mxu0 %vm262_vm2, %v1241_v32  ;;  %7604 = vmatprep.mubr.msk.f32.mxu0 %vm8329_vm1, %v8328_v8 }
 0x8b1   :  { %7612 = vmatprep.subr.mxu0 %v8328_v8 }
 0x8b3   :  { %7605 = vmatmul.mubr.msk.f32.vlgmr.msra.gmra.mrb[12].mxu0 %vm262_vm2, %v8570_v11 }
 0x8b4   :  { %7613 = vmatpush3.xpose.msk.msra.mxu0 %vm262_vm2, %v1413_v36  ;;  %7614 = vmatprep.mubr.msk.f32.mxu0 %vm8329_vm1, %v8328_v8 }
 0x8b5   :  { %7622 = vmatprep.subr.mxu0 %v8328_v8 }
 0x8b7   :  { %7615 = vmatmul.mubr.msk.f32.vlgmr.msra.gmra.mrb[14].mxu0 %vm262_vm2, %v1411_v37 }
 0x8b8   :  { %7623 = vmatpush3.msra.mxu0 %v8609_v38  ;;  %7624 = vmatprep.mubr.msk.f32.mxu0 %vm8329_vm1, %v8328_v8  ;;  %v8705_v38 = vld [vmem:[%s8367_s17 + $0x1] ss:$0 sm:$0xff] }
 0x8b9   :  { %7632 = vmatprep.subr.mxu0 %v8328_v8 }
 0x982   :  { %v1150_v40 = vpop.f32.mrb[10].mxu0 }
 0x983   :  { %v7596_v41 = vpop.f32.mrb[11].mxu0  ;;  %7600 = vmatmul.mubr.msk.f32.vlgmr.msra.gmra.mrb[12].mxu1 %vm262_vm2, %v1150_v40 }
 0x984   :  { %7609 = vmatprep.mubr.msk.f32.mxu1 %vm8329_vm1, %v8328_v8 }
 0x986   :  { %v1312_v42 = vpop.f32.mrb[12].mxu0 }
 0x987   :  { %v1316_v43 = vmul.f32 0.35355338, %v1312_v42  ;;  %v7606_v44 = vpop.f32.mrb[13].mxu0 }
 0x989   :  { %v1321_v45 = vadd.f32 %v8705_v38, %v1316_v43 }
 0x98a   :  { %v1484_v46 = vpop.f32.mrb[14].mxu0 }
 0x98b   :  { %v1488_v48 = vmul.f32 0.35355338, %v1484_v46  ;;  %v7616_v49 = vpop.f32.mrb[15].mxu0  ;;  %v1322_v50 = vsel %vm262_vm2, %v1321_v45, -inf }
 0x98c   :  { %1323 = vmax.xlane.f32.xlu0 %v1322_v50 }
 0x98d   :  { %v1489_v51 = vadd.f32 %v8705_v38, %v1488_v48 }
 0x98f   :  { %v1490_v52 = vsel %vm262_vm2, %v1489_v51, -inf }
 0x990   :  { %1491 = vmax.xlane.f32.xlu1 %v1490_v52 }
 0x9a1   :  { %1333 = vrot.lane.b32.xlu1 %v8570_v11, %s8334_s22 }
 0x9a5   :  { %1726 = vrot.lane.b32.xlu1 %v8570_v11, %s8335_s23 }
 0x9a9   :  { %1724 = vrot.lane.b32.xlu1 %v8570_v11, %s8336_s26 }
 0xa19   :  { %v1324_v53 = vpop.xlane.xlu0 %1323 }
 0xa1a   :  { %v1325_v54 = vsub.f32 %v1321_v45, %v1324_v53 }
 0xa1c   :  { %v1326_v55 = vmul.f32 1.442695, %v1325_v54 }
 0xa1d   :  { %v1492_v56 = vpop.xlane.xlu1 %1491 }
 0xa1e   :  { %8165 = vpow2.f32 %v1326_v55  ;;  %v1493_v57 = vsub.f32 %v1489_v51, %v1492_v56 }
 0xa20   :  { %v1494_v58 = vmul.f32 1.442695, %v1493_v57 }
 0xa21   :  { %v1334_v59 = vpop.permute.xlu1 %1333 }
 0xa22   :  { %8167 = vpow2.f32 %v1494_v58  ;;  %7608 = vmatpush3.msra.mxu1 %v1334_v59 }
 0xa23   :  { %7617 = vmatprep.subr.mxu1 %v8328_v8 }
 0xa25   :  { %v1727_v21 = vpop.permute.xlu1 %1726 }
 0xa28   :  { %v8166_v60 = vpop.eup %8165 }
 0xa29   :  { %v1328_v61 = vsel %vm262_vm2, %v8166_v60, 0.0 }
 0xa2a   :  { %1329 = vadd.xlane.f32.xlu0 %v1328_v61 }
 0xa2c   :  { %v8168_v62 = vpop.eup %8167 }
 0xa2d   :  { %v1496_v63 = vsel %vm262_vm2, %v8168_v62, 0.0 }
 0xa2e   :  { %1497 = vadd.xlane.f32.xlu0 %v1496_v63 }
 0xa44   :  { %1501 = vrot.lane.b32.xlu0 %v8570_v11, %s8333_s29 }
 0xa56   :  { %v1224_v0 = vpop.f32.mrb[12].mxu1 }
 0xa57   :  { %v1228_v2 = vadd.f32 %v1224_v0, %v8678_v13  ;;  %v7601_v3 = vpop.f32.mrb[13].mxu1 }
 0xa59   :  { %v1236_v4 = vadd.f32 %v8723_v1, %v1228_v2 }
 0xa5b   :  { %1237 = vst.msk [vmem:[#allocation2] sm:$0xff] %vm176_vm0, %v1236_v4 }
 0xa62   :  { %v2217_v50 = vld [vmem:[#allocation2] sm:$0xff] }
 0xab7   :  { %v1330_v6 = vpop.xlane.xlu0 %1329 }
 0xab8   :  { %8169 = vrcp.f32 %v1330_v6 }
 0xabb   :  { %v1498_v9 = vpop.xlane.xlu0 %1497 }
 0xabc   :  { %8171 = vrcp.f32 %v1498_v9 }
 0xabf   :  { %v1502_v14 = vpop.permute.xlu0 %1501 }
 0xac2   :  { %v8170_v10 = vpop.eup %8169 }
 0xac3   :  { %v1332_v12 = vmul.f32 %v8170_v10, %v8166_v60 }
 0xac5   :  { %7610 = vmatmul.mubr.msk.f32.vlgmr.msra.gmra.mrb[14].mxu1 %vm262_vm2, %v1332_v12 }
 0xac6   :  { %v8172_v15 = vpop.eup %8171  ;;  %7618 = vmatpush3.msra.mxu1 %v1502_v14  ;;  %7619 = vmatprep.mubr.msk.f32.mxu1 %vm8329_vm1, %v8328_v8 }
 0xac7   :  { %v1500_v17 = vmul.f32 %v8172_v15, %v8168_v62  ;;  %7627 = vmatprep.subr.mxu1 %v8328_v8 }
 0xac9   :  { %7620 = vmatmul.mubr.msk.f32.vlgmr.msra.gmra.mrb[16].mxu1 %vm262_vm2, %v1500_v17 }
 0xaca   :  { %7628 = vmatpush3.msra.mxu1 %v8622_v47  ;;  %7629 = vmatprep.mubr.msk.f32.mxu1 %vm8329_vm1, %v8328_v8  ;;  %v1725_v47 = vpop.permute.xlu1 %1724 }
 0xacb   :  { %7637 = vmatprep.subr.mxu1 %v8328_v8 }
 0xb98   :  { %v1405_v19 = vpop.f32.mrb[14].mxu1 }
 0xb99   :  { %v7611_v20 = vpop.f32.mrb[15].mxu1  ;;  %7630 = vmatmul.mubr.msk.f32.vlgmr.msra.gmra.mrb[18].mxu1 %vm262_vm2, %v1405_v19 }
 0xb9a   :  { %7639 = vmatprep.mubr.msk.f32.mxu1 %vm8329_vm1, %v8328_v8 }
 0xb9c   :  { %v1573_v22 = vpop.f32.mrb[16].mxu1 }
 0xb9d   :  { %v7621_v23 = vpop.f32.mrb[17].mxu1  ;;  %7625 = vmatmul.mubr.msk.f32.vlgmr.msra.gmra.mrb[16].mxu0 %vm262_vm2, %v1573_v22 }
 0xb9e   :  { %7633 = vmatpush3.xpose.msk.msra.mxu0 %vm262_vm2, %v1727_v21  ;;  %7634 = vmatprep.mubr.msk.f32.mxu0 %vm8329_vm1, %v8328_v8 }
 0xb9f   :  { %7642 = vmatprep.subr.mxu0 %v8328_v8 }
 0xba1   :  { %7635 = vmatmul.mubr.msk.f32.vlgmr.msra.gmra.mrb[18].mxu0 %vm262_vm2, %v1725_v47 }
 0xba2   :  { %7643 = vmatpush3.msra.mxu0 %v8660_v16  ;;  %7644 = vmatprep.mubr.msk.f32.mxu0 %vm8329_vm1, %v8328_v8 }
 0xba3   :  { %7652 = vmatprep.subr.mxu0 %v8328_v8 }
 0xc6c   :  { %v1720_v24 = vpop.f32.mrb[18].mxu1 }
 0xc6d   :  { %v7631_v25 = vpop.f32.mrb[19].mxu1 }
 0xc70   :  { %v1647_v26 = vpop.f32.mrb[16].mxu0 }
 0xc71   :  { %v1721_v27 = vadd.f32 %v1720_v24, %v1647_v26  ;;  %v7626_v28 = vpop.f32.mrb[17].mxu0 }
 0xc74   :  { %v1798_v29 = vpop.f32.mrb[18].mxu0 }
 0xc75   :  { %v1802_v18 = vmul.f32 0.35355338, %v1798_v29  ;;  %v7636_v30 = vpop.f32.mrb[19].mxu0  ;;  %v7220_v29 = vld [vmem:[%s8402_s19] ss:$0 sm:$0xff]  ;;  %s9395_s19 = sld [smem:[#allocation8_spill]] }
 0xc77   :  { %v1803_v13 = vadd.f32 %v8705_v38, %v1802_v18 }
 0xc79   :  { %v1804_v31 = vsel %vm262_vm2, %v1803_v13, -inf }
 0xc7a   :  { %1805 = vmax.xlane.f32.xlu0 %v1804_v31  ;;  %v2267_v31 = vld [vmem:[%s8407_s24 + $0x8] sm:$0xff] }
 0xc90   :  { %1815 = vrot.lane.b32.xlu0 %v8570_v11, %s8339_s2 }
 0xc94   :  { %1966 = vrot.lane.b32.xlu0 %v8570_v11, %s8338_s1 }
 0xd07   :  { %v1806_v16 = vpop.xlane.xlu0 %1805 }
 0xd08   :  { %v1807_v32 = vsub.f32 %v1803_v13, %v1806_v16  ;;  %v2266_v13 = vld [vmem:[%s8407_s24] sm:$0xff] }
 0xd09   :  { %v8014_v16 = vpack.c.bf16 %v2267_v31, %v2266_v13 }
 0xd0a   :  { %v1808_v33 = vmul.f32 1.442695, %v1807_v32  ;;  %v2268_v32 = vld [vmem:[%s8407_s24 + $0x10] sm:$0xff] }
 0xd0b   :  { %v1816_v34 = vpop.permute.xlu0 %1815 }
 0xd0c   :  { %8173 = vpow2.f32 %v1808_v33  ;;  %7638 = vmatpush3.msra.mxu1 %v1816_v34  ;;  %v2269_v33 = vld [vmem:[%s8407_s24 + $0x18] sm:$0xff]  ;;  %s9396_s24 = sld [smem:[#allocation13_spill]] }
 0xd0d   :  { %7647 = vmatprep.subr.mxu1 %v8328_v8  ;;  %v8018_v34 = vpack.c.bf16 %v2269_v33, %v2268_v32 }
 0xd0f   :  { %v1967_v43 = vpop.permute.xlu0 %1966 }
 0xd16   :  { %v8174_v35 = vpop.eup %8173 }
 0xd17   :  { %v1810_v36 = vsel %vm262_vm2, %v8174_v35, 0.0 }
 0xd18   :  { %1811 = vadd.xlane.f32.xlu1 %v1810_v36  ;;  %v2506_v36 = vld [vmem:[%s8437_s4 + $0x8] sm:$0xff] }
 0xd29   :  { %1968 = vrot.lane.b32.xlu1 %v8570_v11, %s8337_s28 }
 0xda5   :  { %v1812_v37 = vpop.xlane.xlu1 %1811 }
 0xda6   :  { %8175 = vrcp.f32 %v1812_v37 }
 0xda9   :  { %v1969_v42 = vpop.permute.xlu1 %1968 }
 0xdb0   :  { %v8176_v40 = vpop.eup %8175 }
 0xdb1   :  { %v1814_v41 = vmul.f32 %v8176_v40, %v8174_v35  ;;  %v2505_v35 = vld [vmem:[%s8437_s4] sm:$0xff] }
 0xdb2   :  { %v8038_v37 = vpack.c.bf16 %v2506_v36, %v2505_v35  ;;  %v2360_v40 = vld [vmem:[%s8417_s6] sm:$0xff] }
 0xdb3   :  { %7640 = vmatmul.mubr.msk.f32.vlgmr.msra.gmra.mrb[20].mxu1 %vm262_vm2, %v1814_v41  ;;  %v2361_v41 = vld [vmem:[%s8417_s6 + $0x8] sm:$0xff] }
 0xdb4   :  { %7648 = vmatpush3.xpose.msk.msra.mxu1 %vm262_vm2, %v1969_v42  ;;  %7649 = vmatprep.mubr.msk.f32.mxu1 %vm8329_vm1, %v8328_v8  ;;  %v2362_v42 = vld [vmem:[%s8417_s6 + $0x10] sm:$0xff] }
 0xdb5   :  { %7657 = vmatprep.subr.mxu1 %v8328_v8 }
 0xdb7   :  { %7650 = vmatmul.mubr.msk.f32.vlgmr.msra.gmra.mrb[22].mxu1 %vm262_vm2, %v1967_v43  ;;  %v8022_v43 = vpack.c.bf16 %v2361_v41, %v2360_v40 }
 0xdb8   :  { %7658 = vmatpush3.msra.mxu1 %v8697_v39  ;;  %7659 = vmatprep.mubr.msk.f32.mxu1 %vm8329_vm1, %v8328_v8  ;;  %v2219_v39 = vadd.f32 %v2217_v50, %v8554_v5 }
 0xdb9   :  { %8023 = vmatprep.subr.bf16.mxu1 %v8022_v43 }
 0xdba   :  { %v2221_v53 = vsel %vm176_vm0, %v2219_v39, 0.0 }
 0xe86   :  { %v1887_v44 = vpop.f32.mrb[20].mxu1 }
 0xe87   :  { %v7641_v45 = vpop.f32.mrb[21].mxu1  ;;  %7645 = vmatmul.mubr.msk.f32.vlgmr.msra.gmra.mrb[20].mxu0 %vm262_vm2, %v1887_v44  ;;  %v2363_v44 = vld [vmem:[%s8417_s6 + $0x18] sm:$0xff] }
 0xe88   :  { %7654 = vmatprep.mubr.msk.f32.mxu0 %vm8329_vm1, %v8328_v8  ;;  %v8026_v45 = vpack.c.bf16 %v2363_v44, %v2362_v42  ;;  %v8880_v42 = vld [vmem:[%s9393_s8 + $0x8] sm:$0xff] }
 0xe8a   :  { %v2040_v46 = vpop.f32.mrb[22].mxu1 }
 0xe8b   :  { %v2044_v48 = vmul.f32 0.35355338, %v2040_v46  ;;  %v7651_v49 = vpop.f32.mrb[23].mxu1  ;;  %v2364_v46 = vld [vmem:[%s8417_s6 + $0x20] sm:$0xff] }
 0xe8d   :  { %v2045_v51 = vadd.f32 %v8705_v38, %v2044_v48  ;;  %v2365_v48 = vld [vmem:[%s8417_s6 + $0x28] sm:$0xff] }
 0xe8e   :  { %v8030_v49 = vpack.c.bf16 %v2365_v48, %v2364_v46 }
 0xe8f   :  { %v2046_v52 = vsel %vm262_vm2, %v2045_v51, -inf }
 0xe90   :  { %2047 = vmax.xlane.f32.xlu1 %v2046_v52 }
 0xe94   :  { %2222 = vadd.xlane.f32.xlu1 %v2221_v53 }
 0xf1d   :  { %v2048_v54 = vpop.xlane.xlu1 %2047 }
 0xf1e   :  { %v2049_v55 = vsub.f32 %v2045_v51, %v2048_v54  ;;  %v2507_v54 = vld [vmem:[%s8437_s4 + $0x10] sm:$0xff] }
 0xf20   :  { %v2050_v56 = vmul.f32 1.442695, %v2049_v55  ;;  %v2508_v55 = vld [vmem:[%s8437_s4 + $0x18] sm:$0xff]  ;;  %s9400_s4 = sld [smem:[#allocation10_spill]] }
 0xf21   :  { %v2223_v9 = vpop.xlane.xlu1 %2222 }
 0xf22   :  { %8177 = vpow2.f32 %v2050_v56  ;;  %v2228_v10 = vmul.f32 0.03125, %v2223_v9 }
 0xf24   :  { %v2230_v12 = vsub.f32 %v2219_v39, %v2228_v10 }
 0xf26   :  { %v2232_v19 = vmul.f32 %v2230_v12, %v2230_v12 }
 0xf28   :  { %v2234_v20 = vsel %vm176_vm0, %v2232_v19, 0.0 }
 0xf2c   :  { %v8178_v57 = vpop.eup %8177 }
 0xf2d   :  { %v2052_v58 = vsel %vm262_vm2, %v8178_v57, 0.0 }
 0xf2e   :  { %2053 = vadd.xlane.f32.xlu0 %v2052_v58  ;;  %v8042_v58 = vpack.c.bf16 %v2508_v55, %v2507_v54 }
 0xf44   :  { %2057 = vrot.lane.b32.xlu0 %v8570_v11, %s8340_s7 }
 0xf5a   :  { %v1961_v38 = vpop.f32.mrb[20].mxu0 }
 0xf5b   :  { %v1965_v59 = vadd.f32 %v1961_v38, %v1721_v27  ;;  %v7646_v60 = vpop.f32.mrb[21].mxu0  ;;  %v7219_v27 = vld [vmem:[%s8397_s14] ss:$0 sm:$0xff]  ;;  %s9394_s14 = sld [smem:[#allocation12_spill]] }
 0xf5c   :  { %v8810_v38 = vld [vmem:[%s8357_s9] sm:$0xff]  ;;  %v2366_v60 = vld [vmem:[%s8417_s6 + $0x30] sm:$0xff] }
 0xfbb   :  { %v2054_v61 = vpop.xlane.xlu0 %2053 }
 0xfbc   :  { %8179 = vrcp.f32 %v2054_v61  ;;  %v2367_v61 = vld [vmem:[%s8417_s6 + $0x38] sm:$0xff]  ;;  %s9398_s6 = sld [smem:[#allocation17_spill]] }
 0xfbf   :  { %v2058_v5 = vpop.permute.xlu0 %2057 }
 0xfc0   :  { %7653 = vmatpush3.msra.mxu0 %v2058_v5  ;;  %v8034_v5 = vpack.c.bf16 %v2367_v61, %v2366_v60 }
 0xfc1   :  { %8015 = vmatprep.subr.bf16.mxu0 %v8014_v16 }
 0xfc6   :  { %v8180_v62 = vpop.eup %8179 }
 0xfc7   :  { %v2056_v63 = vmul.f32 %v8180_v62, %v8178_v57  ;;  %v7221_v62 = vld [vmem:[%s8412_s30] ss:$0 sm:$0xff]  ;;  %s9397_s30 = sld [smem:[#allocation14_spill]] }
 0xfc9   :  { %7655 = vmatmul.mubr.msk.f32.vlgmr.msra.gmra.mrb[22].mxu0 %vm262_vm2, %v2056_v63 }
 0xfca   :  { %8017 = vmatpush3.bf16.msra.mxu0 %v8014_v16 }
 0xfcb   :  { %8019 = vmatprep.subr.bf16.mxu0 %v8018_v34 }
 0xfce   :  { %8021 = vmatpush3.bf16.msra.mxu0 %v8018_v34 }
 0xfcf   :  { %8039 = vmatprep.subr.bf16.mxu0 %v8038_v37 }
0x109c   :  { %v2129_v0 = vpop.f32.mrb[22].mxu0 }
0x109d   :  { %v7656_v2 = vpop.f32.mrb[23].mxu0  ;;  %7660 = vmatmul.mubr.msk.f32.vlgmr.msra.gmra.mrb[24].mxu1 %vm262_vm2, %v2129_v0 }
0x109e   :  { %8025 = vmatpush3.bf16.msra.mxu1 %v8022_v43 }
0x109f   :  { %8027 = vmatprep.subr.bf16.mxu1 %v8026_v45 }
0x10a2   :  { %8029 = vmatpush3.bf16.msra.mxu1 %v8026_v45 }
0x10a3   :  { %8031 = vmatprep.subr.bf16.mxu1 %v8030_v49 }
0x10a6   :  { %8033 = vmatpush3.bf16.msra.mxu1 %v8030_v49 }
0x10a7   :  { %8035 = vmatprep.subr.bf16.mxu1 %v8034_v5 }
0x10aa   :  { %8037 = vmatpush3.bf16.msra.mxu1 %v8034_v5 }
0x10ab   :  { %7708 = vmatprep.subr.mxu1 %v8328_v8 }
0x1170   :  { %v2203_v3 = vpop.f32.mrb[24].mxu1 }
0x1171   :  { %v2207_v4 = vadd.f32 %v2203_v3, %v1965_v59  ;;  %v7661_v6 = vpop.f32.mrb[25].mxu1  ;;  %v8817_v59 = vld [vmem:[%s8357_s9 + $0x8] sm:$0xff]  ;;  %s9391_s9 = sld [smem:[#allocation6_spill]] }
0x1173   :  { %v2215_v11 = vadd.f32 %v8723_v1, %v2207_v4 }
0x1175   :  { %2216 = vst.msk [vmem:[#allocation2 + $0x8] sm:$0xff] %vm176_vm0, %v2215_v11  ;;  %v7229_v11 = vld [vmem:[%s8442_s12] ss:$0 sm:$0xff]  ;;  %s9399_s12 = sld [smem:[#allocation9_spill]] }
0x117c   :  { %v2218_v14 = vld [vmem:[#allocation2 + $0x8] sm:$0xff] }
0x117d   :  { %v2220_v15 = vadd.f32 %v2218_v14, %v8559_v7 }
0x117f   :  { %v2224_v17 = vsel %vm176_vm0, %v2220_v15, 0.0 }
0x1180   :  { %2225 = vadd.xlane.f32.xlu1 %v2224_v17 }
0x1184   :  { %2235 = vadd.xlane.f32.xlu1 %v2234_v20 }
0x120d   :  { %v2226_v21 = vpop.xlane.xlu1 %2225 }
0x120e   :  { %v2229_v22 = vmul.f32 0.03125, %v2226_v21 }
0x1210   :  { %v2231_v1 = vsub.f32 %v2220_v15, %v2229_v22  ;;  %v8859_v22 = vld [vmem:[%s9391_s9] sm:$0xff] }
0x1211   :  { %v2236_v23 = vpop.xlane.xlu1 %2235 }
0x1212   :  { %v2240_v47 = vmul.f32 0.03125, %v2236_v23  ;;  %v2233_v24 = vmul.f32 %v2231_v1, %v2231_v1 }
0x1214   :  { %v2242_v25 = vadd.f32 1e-05, %v2240_v47  ;;  %v2237_v7 = vsel %vm176_vm0, %v2233_v24, 0.0 }
0x1215   :  { %2238 = vadd.xlane.f32.xlu1 %v2237_v7 }
0x1216   :  { %8181 = vrsqrt.f32 %v2242_v25 }
0x1220   :  { %v8182_v26 = vpop.eup %8181 }
0x1221   :  { %v2246_v28 = vmul.f32 %v8182_v26, %v2230_v12 }
0x1223   :  { %v2255_v18 = vmul.f32 %v7219_v27, %v2246_v28 }
0x1225   :  { %v8789_v30 = vadd.f32 %v7220_v29, %v2255_v18 }
0x1227   :  { %7670 = vmatprep.mubr.msk.f32.mxu0 %vm176_vm0, %v8789_v30 }
0x12a2   :  { %v2239_v50 = vpop.xlane.xlu1 %2238 }
0x12a3   :  { %v2241_v51 = vmul.f32 0.03125, %v2239_v50 }
0x12a5   :  { %v2243_v52 = vadd.f32 1e-05, %v2241_v51 }
0x12a7   :  { %8183 = vrsqrt.f32 %v2243_v52  ;;  %v8893_v52 = vld [vmem:[%s9393_s8] sm:$0xff] }
0x12b1   :  { %v8184_v39 = vpop.eup %8183 }
0x12b2   :  { %v2247_v53 = vmul.f32 %v8184_v39, %v2231_v1  ;;  %v7232_v1 = vld [vmem:[%s9392_s3] ss:$0 sm:$0xff] }
0x12b3   :  { %v8863_v23 = vadd.f32 %v7232_v1, %v8859_v22 }
0x12b4   :  { %v2256_v56 = vmul.f32 %v7219_v27, %v2247_v53 }
0x12b6   :  { %v8807_v57 = vadd.f32 %v7220_v29, %v2256_v56 }
0x12b8   :  { %7671 = vmatmul.mubr.msk.f32.vlgmr.msra.gmra.mrb[24].mxu0 %vm176_vm0, %v8807_v57 }
0x12b9   :  { %8041 = vmatpush3.bf16.msra.mxu0 %v8038_v37  ;;  %7700 = vmatprep.mubr.msk.f32.mxu0 %vm176_vm0, %v8810_v38 }
0x12ba   :  { %8043 = vmatprep.subr.bf16.mxu0 %v8042_v58 }
0x12bd   :  { %8045 = vmatpush3.bf16.msra.mxu0 %v8042_v58 }
0x12be   :  { %7703 = vmatprep.subr.mxu0 %v8328_v8 }
0x12c0   :  { %7701 = vmatmul.mubr.msk.f32.vlgmr.msra.gmra.mrb[26].mxu0 %vm176_vm0, %v8817_v59 }
0x12c1   :  { %7705 = vmatprep.mubr.msk.f32.mxu0 %vm8329_vm1, %v8328_v8 }
0x138b   :  { %v7672_v63 = vpop.f32.mrb[24].mxu0 }
0x138c   :  { %v2355_v0 = vadd.f32 %v7672_v63, %v7221_v62  ;;  %v2349_v2 = vpop.f32.mrb[25].mxu0 }
0x138d   :  { %v2350_v3 = vadd.f32 %v7221_v62, %v2349_v2 }
0x138e   :  { %v2359_v6 = vmax.f32 %v2355_v0, 0.0 }
0x138f   :  { %v2358_v4 = vmax.f32 %v2350_v3, 0.0 }
0x1391   :  { %7689 = vmatprep.mubr.msk.f32.mxu1 %vm2375_vm3, %v2358_v4 }
0x1392   :  { %7690 = vmatmul.mubr.msk.f32.vlgmr.msra.gmra.mrb[26].mxu1 %vm2375_vm3, %v2359_v6 }
0x1393   :  { %v7702_v9 = vpop.f32.mrb[26].mxu0  ;;  %7710 = vmatprep.mubr.msk.f32.mxu1 %vm8329_vm1, %v8328_v8 }
0x1394   :  { %v8833_v10 = vadd.f32 %v7702_v9, %v7229_v11  ;;  %v2588_v12 = vpop.f32.mrb[27].mxu0 }
0x1395   :  { %v8835_v14 = vadd.f32 %v7229_v11, %v2588_v12 }
0x1397   :  { %2773 = vrot.lane.b32.xlu0 %v8835_v14, %s8332_s25  ;;  %2605 = vrot.lane.b32.xlu1 %v8835_v14, %s8331_s5 }
0x139b   :  { %2771 = vrot.lane.b32.xlu0 %v8835_v14, %s8330_s0 }
0x1409   :  { %v2606_v15 = vpop.permute.xlu1 %2605  ;;  %v2774_v17 = vpop.permute.xlu0 %2773 }
0x140a   :  { %7704 = vmatpush3.xpose.msk.msra.mxu0 %vm262_vm2, %v2606_v15 }
0x140b   :  { %7713 = vmatprep.subr.mxu0 %v8328_v8 }
0x140d   :  { %7706 = vmatmul.mubr.msk.f32.vlgmr.msra.gmra.mrb[28].mxu0 %vm262_vm2, %v8835_v14  ;;  %v2772_v19 = vpop.permute.xlu0 %2771 }
0x140e   :  { %7714 = vmatpush3.xpose.msk.msra.mxu0 %vm262_vm2, %v2774_v17  ;;  %7715 = vmatprep.mubr.msk.f32.mxu0 %vm8329_vm1, %v8328_v8 }
0x140f   :  { %7723 = vmatprep.subr.mxu0 %v8328_v8 }
0x1411   :  { %7716 = vmatmul.mubr.msk.f32.vlgmr.msra.gmra.mrb[30].mxu0 %vm262_vm2, %v2772_v19 }
0x1412   :  { %7725 = vmatprep.mubr.msk.f32.mxu0 %vm8329_vm1, %v8328_v8  ;;  %7724 = vmatpush3.msra.mxu0 %v8880_v42 }
0x1413   :  { %7733 = vmatprep.subr.mxu0 %v8328_v8 }
0x1465   :  { %v8854_v20 = vpop.f32.mrb[26].mxu1 }
0x1466   :  { %v8856_v21 = vpop.f32.mrb[27].mxu1 }
0x14e0   :  { %v2677_v47 = vpop.f32.mrb[28].mxu0 }
0x14e1   :  { %v2681_v24 = vmul.f32 0.35355338, %v2677_v47  ;;  %v7707_v25 = vpop.f32.mrb[29].mxu0 }
0x14e3   :  { %v2682_v7 = vadd.f32 %v2681_v24, %v8863_v23 }
0x14e4   :  { %v2845_v26 = vpop.f32.mrb[30].mxu0 }
0x14e5   :  { %v2849_v27 = vmul.f32 0.35355338, %v2845_v26  ;;  %v7717_v28 = vpop.f32.mrb[31].mxu0  ;;  %v2683_v29 = vsel %vm262_vm2, %v2682_v7, -inf  ;;  %v8929_v26 = vld [vmem:[%s9393_s8 + $0x10] sm:$0xff] }
0x14e6   :  { %2684 = vmax.xlane.f32.xlu0 %v2683_v29 }
0x14e7   :  { %v2850_v18 = vadd.f32 %v2849_v27, %v8863_v23 }
0x14e9   :  { %v2851_v13 = vsel %vm262_vm2, %v2850_v18, -inf }
0x14ea   :  { %2852 = vmax.xlane.f32.xlu1 %v2851_v13 }
0x14fb   :  { %2862 = vrot.lane.b32.xlu1 %v8835_v14, %s8333_s29 }
0x14ff   :  { %3087 = vrot.lane.b32.xlu1 %v8835_v14, %s8335_s23 }
0x1573   :  { %v2685_v31 = vpop.xlane.xlu0 %2684 }
0x1574   :  { %v2686_v16 = vsub.f32 %v2682_v7, %v2685_v31 }
0x1576   :  { %v2687_v32 = vmul.f32 1.442695, %v2686_v16 }
0x1577   :  { %v2853_v33 = vpop.xlane.xlu1 %2852 }
0x1578   :  { %8185 = vpow2.f32 %v2687_v32  ;;  %v2854_v34 = vsub.f32 %v2850_v18, %v2853_v33 }
0x157a   :  { %v2855_v35 = vmul.f32 1.442695, %v2854_v34 }
0x157b   :  { %v2863_v49 = vpop.permute.xlu1 %2862 }
0x157c   :  { %8187 = vpow2.f32 %v2855_v35 }
0x157f   :  { %v3088_v55 = vpop.permute.xlu1 %3087 }
0x1582   :  { %v8186_v36 = vpop.eup %8185 }
0x1583   :  { %v2689_v37 = vsel %vm262_vm2, %v8186_v36, 0.0 }
0x1584   :  { %2690 = vadd.xlane.f32.xlu0 %v2689_v37 }
0x1586   :  { %v8188_v40 = vpop.eup %8187 }
0x1587   :  { %v2857_v41 = vsel %vm262_vm2, %v8188_v40, 0.0 }
0x1588   :  { %2858 = vadd.xlane.f32.xlu0 %v2857_v41 }
0x159e   :  { %2694 = vrot.lane.b32.xlu0 %v8835_v14, %s8334_s22 }
0x15a2   :  { %3085 = vrot.lane.b32.xlu0 %v8835_v14, %s8336_s26 }
0x1611   :  { %v2691_v43 = vpop.xlane.xlu0 %2690 }
0x1612   :  { %8189 = vrcp.f32 %v2691_v43 }
0x1615   :  { %v2859_v44 = vpop.xlane.xlu0 %2858 }
0x1616   :  { %8191 = vrcp.f32 %v2859_v44 }
0x1619   :  { %v2695_v45 = vpop.permute.xlu0 %2694 }
0x161a   :  { %7709 = vmatpush3.msra.mxu1 %v2695_v45 }
0x161b   :  { %7718 = vmatprep.subr.mxu1 %v8328_v8 }
0x161c   :  { %v8190_v46 = vpop.eup %8189 }
0x161d   :  { %v2693_v48 = vmul.f32 %v8190_v46, %v8186_v36  ;;  %v3086_v58 = vpop.permute.xlu0 %3085 }
0x161f   :  { %7711 = vmatmul.mubr.msk.f32.vlgmr.msra.gmra.mrb[28].mxu1 %vm262_vm2, %v2693_v48 }
0x1620   :  { %v8192_v50 = vpop.eup %8191  ;;  %7719 = vmatpush3.msra.mxu1 %v2863_v49  ;;  %7720 = vmatprep.mubr.msk.f32.mxu1 %vm8329_vm1, %v8328_v8  ;;  %v8965_v49 = vld [vmem:[%s9393_s8 + $0x18] sm:$0xff] }
0x1621   :  { %v2861_v51 = vmul.f32 %v8192_v50, %v8188_v40  ;;  %7728 = vmatprep.subr.mxu1 %v8328_v8 }
0x1623   :  { %7721 = vmatmul.mubr.msk.f32.vlgmr.msra.gmra.mrb[30].mxu1 %vm262_vm2, %v2861_v51  ;;  %v7250_v51 = vld [vmem:[%s9392_s3 + $0x1] ss:$0 sm:$0xff] }
0x1624   :  { %7730 = vmatprep.mubr.msk.f32.mxu1 %vm8329_vm1, %v8328_v8  ;;  %7729 = vmatpush3.msra.mxu1 %v8893_v52 }
0x1625   :  { %7738 = vmatprep.subr.mxu1 %v8328_v8 }
0x16f2   :  { %v2766_v39 = vpop.f32.mrb[28].mxu1 }
0x16f3   :  { %v7712_v53 = vpop.f32.mrb[29].mxu1  ;;  %7731 = vmatmul.mubr.msk.f32.vlgmr.msra.gmra.mrb[32].mxu1 %vm262_vm2, %v2766_v39 }
0x16f4   :  { %7740 = vmatprep.mubr.msk.f32.mxu1 %vm8329_vm1, %v8328_v8 }
0x16f6   :  { %v2934_v54 = vpop.f32.mrb[30].mxu1 }
0x16f7   :  { %v7722_v56 = vpop.f32.mrb[31].mxu1  ;;  %7726 = vmatmul.mubr.msk.f32.vlgmr.msra.gmra.mrb[32].mxu0 %vm262_vm2, %v2934_v54 }
0x16f8   :  { %7734 = vmatpush3.xpose.msk.msra.mxu0 %vm262_vm2, %v3088_v55  ;;  %7735 = vmatprep.mubr.msk.f32.mxu0 %vm8329_vm1, %v8328_v8 }
0x16f9   :  { %7743 = vmatprep.subr.mxu0 %v8328_v8 }
0x16fb   :  { %7736 = vmatmul.mubr.msk.f32.vlgmr.msra.gmra.mrb[34].mxu0 %vm262_vm2, %v3086_v58 }
0x16fc   :  { %7745 = vmatprep.mubr.msk.f32.mxu0 %vm8329_vm1, %v8328_v8  ;;  %7744 = vmatpush3.msra.mxu0 %v8929_v26 }
0x16fd   :  { %7753 = vmatprep.subr.mxu0 %v8328_v8 }
0x17c6   :  { %v3081_v60 = vpop.f32.mrb[32].mxu1 }
0x17c7   :  { %v7732_v61 = vpop.f32.mrb[33].mxu1 }
0x17ca   :  { %v3008_v5 = vpop.f32.mrb[32].mxu0 }
0x17cb   :  { %v3082_v62 = vadd.f32 %v3081_v60, %v3008_v5  ;;  %v7727_v63 = vpop.f32.mrb[33].mxu0 }
0x17ce   :  { %v3159_v0 = vpop.f32.mrb[34].mxu0 }
0x17cf   :  { %v3163_v2 = vmul.f32 0.35355338, %v3159_v0  ;;  %v7737_v3 = vpop.f32.mrb[35].mxu0 }
0x17d1   :  { %v3164_v4 = vadd.f32 %v3163_v2, %v8863_v23 }
0x17d3   :  { %v3165_v6 = vsel %vm262_vm2, %v3164_v4, -inf }
0x17d4   :  { %3166 = vmax.xlane.f32.xlu1 %v3165_v6 }
0x17e5   :  { %3329 = vrot.lane.b32.xlu1 %v8835_v14, %s8337_s28 }
0x17e9   :  { %3327 = vrot.lane.b32.xlu1 %v8835_v14, %s8338_s1 }
0x17ed   :  { %3586 = vrot.lane.b32.xlu1 %v8833_v10, %s8331_s5 }
0x1861   :  { %v3167_v11 = vpop.xlane.xlu1 %3166 }
0x1862   :  { %v3168_v9 = vsub.f32 %v3164_v4, %v3167_v11 }
0x1864   :  { %v3169_v12 = vmul.f32 1.442695, %v3168_v9 }
0x1865   :  { %v3330_v24 = vpop.permute.xlu1 %3329 }
0x1866   :  { %8193 = vpow2.f32 %v3169_v12 }
0x1869   :  { %v3328_v7 = vpop.permute.xlu1 %3327 }
0x186d   :  { %v3587_v41 = vpop.permute.xlu1 %3586 }
0x1870   :  { %v8194_v15 = vpop.eup %8193 }
0x1871   :  { %v3171_v17 = vsel %vm262_vm2, %v8194_v15, 0.0 }
0x1872   :  { %3172 = vadd.xlane.f32.xlu0 %v3171_v17 }
0x1888   :  { %3176 = vrot.lane.b32.xlu0 %v8835_v14, %s8339_s2 }
0x18ff   :  { %v3173_v19 = vpop.xlane.xlu0 %3172 }
0x1900   :  { %8195 = vrcp.f32 %v3173_v19 }
0x1903   :  { %v3177_v1 = vpop.permute.xlu0 %3176 }
0x1904   :  { %7739 = vmatpush3.msra.mxu1 %v3177_v1  ;;  %v8992_v1 = vld [vmem:[%s9394_s14] ss:$0 sm:$0xff] }
0x1905   :  { %7748 = vmatprep.subr.mxu1 %v8328_v8 }
0x190a   :  { %v8196_v47 = vpop.eup %8195 }
0x190b   :  { %v3175_v25 = vmul.f32 %v8196_v47, %v8194_v15 }
0x190d   :  { %7741 = vmatmul.mubr.msk.f32.vlgmr.msra.gmra.mrb[34].mxu1 %vm262_vm2, %v3175_v25 }
0x190e   :  { %7749 = vmatpush3.xpose.msk.msra.mxu1 %vm262_vm2, %v3330_v24  ;;  %7750 = vmatprep.mubr.msk.f32.mxu1 %vm8329_vm1, %v8328_v8 }
0x190f   :  { %7758 = vmatprep.subr.mxu1 %v8328_v8 }
0x1911   :  { %7751 = vmatmul.mubr.msk.f32.vlgmr.msra.gmra.mrb[36].mxu1 %vm262_vm2, %v3328_v7 }
0x1912   :  { %7760 = vmatprep.mubr.msk.f32.mxu1 %vm8329_vm1, %v8328_v8  ;;  %7759 = vmatpush3.msra.mxu1 %v8965_v49 }
0x1913   :  { %7768 = vmatprep.subr.mxu1 %v8328_v8 }
0x19e0   :  { %v3248_v27 = vpop.f32.mrb[34].mxu1 }
0x19e1   :  { %v7742_v28 = vpop.f32.mrb[35].mxu1  ;;  %7746 = vmatmul.mubr.msk.f32.vlgmr.msra.gmra.mrb[36].mxu0 %vm262_vm2, %v3248_v27 }
0x19e2   :  { %7755 = vmatprep.mubr.msk.f32.mxu0 %vm8329_vm1, %v8328_v8 }
0x19e4   :  { %v3401_v29 = vpop.f32.mrb[36].mxu1 }
0x19e5   :  { %v3405_v18 = vmul.f32 0.35355338, %v3401_v29  ;;  %v7752_v13 = vpop.f32.mrb[37].mxu1 }
0x19e7   :  { %v3406_v31 = vadd.f32 %v3405_v18, %v8863_v23 }
0x19e9   :  { %v3407_v16 = vsel %vm262_vm2, %v3406_v31, -inf }
0x19ea   :  { %3408 = vmax.xlane.f32.xlu0 %v3407_v16 }
0x1a00   :  { %3418 = vrot.lane.b32.xlu0 %v8835_v14, %s8340_s7 }
0x1a04   :  { %3754 = vrot.lane.b32.xlu0 %v8833_v10, %s8332_s25 }
0x1a77   :  { %v3409_v32 = vpop.xlane.xlu0 %3408 }
0x1a78   :  { %v3410_v33 = vsub.f32 %v3406_v31, %v3409_v32 }
0x1a7a   :  { %v3411_v34 = vmul.f32 1.442695, %v3410_v33 }
0x1a7b   :  { %v3419_v35 = vpop.permute.xlu0 %3418 }
0x1a7c   :  { %8197 = vpow2.f32 %v3411_v34  ;;  %7754 = vmatpush3.msra.mxu0 %v3419_v35 }
0x1a7d   :  { %7763 = vmatprep.subr.mxu0 %v8328_v8 }
0x1a7f   :  { %v3755_v46 = vpop.permute.xlu0 %3754 }
0x1a86   :  { %v8198_v36 = vpop.eup %8197 }
0x1a87   :  { %v3413_v23 = vsel %vm262_vm2, %v8198_v36, 0.0 }
0x1a88   :  { %3414 = vadd.xlane.f32.xlu1 %v3413_v23 }
0x1a99   :  { %3752 = vrot.lane.b32.xlu1 %v8833_v10, %s8330_s0 }
0x1ab4   :  { %v3322_v37 = vpop.f32.mrb[36].mxu0 }
0x1ab5   :  { %v8946_v14 = vadd.f32 %v3322_v37, %v3082_v62  ;;  %v7747_v40 = vpop.f32.mrb[37].mxu0 }
0x1b15   :  { %v3415_v43 = vpop.xlane.xlu1 %3414 }
0x1b16   :  { %8199 = vrcp.f32 %v3415_v43 }
0x1b19   :  { %v3753_v48 = vpop.permute.xlu1 %3752 }
0x1b20   :  { %v8200_v44 = vpop.eup %8199 }
0x1b21   :  { %v3417_v45 = vmul.f32 %v8200_v44, %v8198_v36 }
0x1b23   :  { %7756 = vmatmul.mubr.msk.f32.vlgmr.msra.gmra.mrb[38].mxu0 %vm262_vm2, %v3417_v45 }
0x1b24   :  { %7764 = vmatpush3.xpose.msk.msra.mxu0 %vm262_vm2, %v3587_v41  ;;  %7765 = vmatprep.mubr.msk.f32.mxu0 %vm8329_vm1, %v8328_v8 }
0x1b25   :  { %7773 = vmatprep.subr.mxu0 %v8328_v8 }
0x1b27   :  { %7766 = vmatmul.mubr.msk.f32.vlgmr.msra.gmra.mrb[40].mxu0 %vm262_vm2, %v8833_v10 }
0x1b28   :  { %7774 = vmatpush3.xpose.msk.msra.mxu0 %vm262_vm2, %v3755_v46  ;;  %7775 = vmatprep.mubr.msk.f32.mxu0 %vm8329_vm1, %v8328_v8 }
0x1b29   :  { %7783 = vmatprep.subr.mxu0 %v8328_v8 }
0x1b2b   :  { %7776 = vmatmul.mubr.msk.f32.vlgmr.msra.gmra.mrb[42].mxu0 %vm262_vm2, %v3753_v48 }
0x1b2c   :  { %7784 = vmatpush3.msra.mxu0 %v8880_v42  ;;  %7785 = vmatprep.mubr.msk.f32.mxu0 %vm8329_vm1, %v8328_v8  ;;  %v8974_v42 = vadd.f32 %v7250_v51, %v8859_v22 }
0x1b2d   :  { %7793 = vmatprep.subr.mxu0 %v8328_v8 }
0x1bf6   :  { %v3490_v50 = vpop.f32.mrb[38].mxu0 }
0x1bf7   :  { %v7757_v39 = vpop.f32.mrb[39].mxu0  ;;  %7761 = vmatmul.mubr.msk.f32.vlgmr.msra.gmra.mrb[38].mxu1 %vm262_vm2, %v3490_v50 }
0x1bf8   :  { %7770 = vmatprep.mubr.msk.f32.mxu1 %vm8329_vm1, %v8328_v8 }
0x1bfa   :  { %v3658_v53 = vpop.f32.mrb[40].mxu0 }
0x1bfb   :  { %v3662_v54 = vmul.f32 0.35355338, %v3658_v53  ;;  %v7767_v55 = vpop.f32.mrb[41].mxu0 }
0x1bfd   :  { %v3663_v56 = vadd.f32 %v3662_v54, %v8974_v42 }
0x1bfe   :  { %v3826_v58 = vpop.f32.mrb[42].mxu0 }
0x1bff   :  { %v3830_v60 = vmul.f32 0.35355338, %v3826_v58  ;;  %v7777_v61 = vpop.f32.mrb[43].mxu0  ;;  %v3664_v5 = vsel %vm262_vm2, %v3663_v56, -inf }
0x1c00   :  { %3665 = vmax.xlane.f32.xlu0 %v3664_v5 }
0x1c01   :  { %v3831_v62 = vadd.f32 %v3830_v60, %v8974_v42 }
0x1c03   :  { %v3832_v63 = vsel %vm262_vm2, %v3831_v62, -inf }
0x1c04   :  { %3833 = vmax.xlane.f32.xlu1 %v3832_v63 }
0x1c15   :  { %3675 = vrot.lane.b32.xlu1 %v8833_v10, %s8334_s22  ;;  %s9411_s22 = sld [smem:[#allocation26_spill]] }
0x1c19   :  { %4068 = vrot.lane.b32.xlu1 %v8833_v10, %s8335_s23 }
0x1c1d   :  { %4066 = vrot.lane.b32.xlu1 %v8833_v10, %s8336_s26 }
0x1c8d   :  { %v3666_v22 = vpop.xlane.xlu0 %3665 }
0x1c8e   :  { %v3667_v0 = vsub.f32 %v3663_v56, %v3666_v22 }
0x1c90   :  { %v3668_v2 = vmul.f32 1.442695, %v3667_v0 }
0x1c91   :  { %v3834_v3 = vpop.xlane.xlu1 %3833 }
0x1c92   :  { %8201 = vpow2.f32 %v3668_v2  ;;  %v3835_v4 = vsub.f32 %v3831_v62, %v3834_v3  ;;  %v7224_v62 = vld [vmem:[%s9395_s19] ss:$0 sm:$0xff] }
0x1c93   :  { %v2449_v22 = vadd.f32 %v7224_v62, %v8856_v21 }
0x1c94   :  { %v3836_v6 = vmul.f32 1.442695, %v3835_v4 }
0x1c95   :  { %v3676_v11 = vpop.permute.xlu1 %3675 }
0x1c96   :  { %8203 = vpow2.f32 %v3836_v6  ;;  %7769 = vmatpush3.msra.mxu1 %v3676_v11  ;;  %v2457_v6 = vadd.f32 %v2449_v22, %v8789_v30 }
0x1c97   :  { %7778 = vmatprep.subr.mxu1 %v8328_v8 }
0x1c98   :  { %v2459_v11 = vsel %vm176_vm0, %v2457_v6, 0.0 }
0x1c99   :  { %v4069_v33 = vpop.permute.xlu1 %4068 }
0x1c9c   :  { %v8202_v9 = vpop.eup %8201 }
0x1c9d   :  { %v3670_v12 = vsel %vm262_vm2, %v8202_v9, 0.0 }
0x1c9e   :  { %3671 = vadd.xlane.f32.xlu0 %v3670_v12 }
0x1ca0   :  { %v8204_v15 = vpop.eup %8203 }
0x1ca1   :  { %v3838_v17 = vsel %vm262_vm2, %v8204_v15, 0.0 }
0x1ca2   :  { %3839 = vadd.xlane.f32.xlu0 %v3838_v17 }
0x1cb8   :  { %3843 = vrot.lane.b32.xlu0 %v8833_v10, %s8333_s29  ;;  %s9410_s29 = sld [smem:[#allocation24_spill]] }
0x1cca   :  { %v3564_v19 = vpop.f32.mrb[38].mxu1 }
0x1ccb   :  { %v3568_v47 = vadd.f32 %v3564_v19, %v8946_v14  ;;  %v7762_v24 = vpop.f32.mrb[39].mxu1 }
0x1ccd   :  { %v3576_v25 = vadd.f32 %v8992_v1, %v3568_v47 }
0x1ccf   :  { %3577 = vst.msk [vmem:[#allocation2] sm:$0xff] %vm176_vm0, %v3576_v25 }
0x1cd6   :  { %v4559_v12 = vld [vmem:[#allocation2] sm:$0xff] }
0x1cd7   :  { %v4561_v21 = vadd.f32 %v4559_v12, %v8810_v38 }
0x1d2b   :  { %v3672_v7 = vpop.xlane.xlu0 %3671 }
0x1d2c   :  { %8205 = vrcp.f32 %v3672_v7 }
0x1d2f   :  { %v3840_v27 = vpop.xlane.xlu0 %3839 }
0x1d30   :  { %8207 = vrcp.f32 %v3840_v27 }
0x1d33   :  { %v3844_v18 = vpop.permute.xlu0 %3843 }
0x1d36   :  { %v8206_v28 = vpop.eup %8205 }
0x1d37   :  { %v3674_v29 = vmul.f32 %v8206_v28, %v8202_v9 }
0x1d39   :  { %7771 = vmatmul.mubr.msk.f32.vlgmr.msra.gmra.mrb[40].mxu1 %vm262_vm2, %v3674_v29 }
0x1d3a   :  { %v8208_v13 = vpop.eup %8207  ;;  %7779 = vmatpush3.msra.mxu1 %v3844_v18  ;;  %7780 = vmatprep.mubr.msk.f32.mxu1 %vm8329_vm1, %v8328_v8 }
0x1d3b   :  { %v3842_v31 = vmul.f32 %v8208_v13, %v8204_v15  ;;  %7788 = vmatprep.subr.mxu1 %v8328_v8 }
0x1d3d   :  { %7781 = vmatmul.mubr.msk.f32.vlgmr.msra.gmra.mrb[42].mxu1 %vm262_vm2, %v3842_v31 }
0x1d3e   :  { %7789 = vmatpush3.msra.mxu1 %v8893_v52  ;;  %7790 = vmatprep.mubr.msk.f32.mxu1 %vm8329_vm1, %v8328_v8  ;;  %v4067_v52 = vpop.permute.xlu1 %4066 }
0x1d3f   :  { %7798 = vmatprep.subr.mxu1 %v8328_v8 }
0x1e0c   :  { %v3747_v16 = vpop.f32.mrb[40].mxu1 }
0x1e0d   :  { %v7772_v32 = vpop.f32.mrb[41].mxu1  ;;  %7791 = vmatmul.mubr.msk.f32.vlgmr.msra.gmra.mrb[44].mxu1 %vm262_vm2, %v3747_v16 }
0x1e0e   :  { %7800 = vmatprep.mubr.msk.f32.mxu1 %vm8329_vm1, %v8328_v8 }
0x1e10   :  { %v3915_v34 = vpop.f32.mrb[42].mxu1 }
0x1e11   :  { %v7782_v35 = vpop.f32.mrb[43].mxu1  ;;  %7786 = vmatmul.mubr.msk.f32.vlgmr.msra.gmra.mrb[44].mxu0 %vm262_vm2, %v3915_v34 }
0x1e12   :  { %7794 = vmatpush3.xpose.msk.msra.mxu0 %vm262_vm2, %v4069_v33  ;;  %7795 = vmatprep.mubr.msk.f32.mxu0 %vm8329_vm1, %v8328_v8 }
0x1e13   :  { %7803 = vmatprep.subr.mxu0 %v8328_v8 }
0x1e15   :  { %7796 = vmatmul.mubr.msk.f32.vlgmr.msra.gmra.mrb[46].mxu0 %vm262_vm2, %v4067_v52 }
0x1e16   :  { %7804 = vmatpush3.msra.mxu0 %v8929_v26  ;;  %7805 = vmatprep.mubr.msk.f32.mxu0 %vm8329_vm1, %v8328_v8 }
0x1e17   :  { %7813 = vmatprep.subr.mxu0 %v8328_v8 }
0x1ee0   :  { %v4062_v36 = vpop.f32.mrb[44].mxu1 }
0x1ee1   :  { %v7792_v23 = vpop.f32.mrb[45].mxu1 }
0x1ee4   :  { %v3989_v37 = vpop.f32.mrb[44].mxu0 }
0x1ee5   :  { %v9019_v14 = vadd.f32 %v4062_v36, %v3989_v37  ;;  %v7787_v40 = vpop.f32.mrb[45].mxu0  ;;  %v9061_v36 = vld [vmem:[%s9396_s24] ss:$0 sm:$0xff] }
0x1ee6   :  { %v9064_v37 = vld [vmem:[%s9397_s30] ss:$0 sm:$0xff] }
0x1ee8   :  { %v4140_v41 = vpop.f32.mrb[46].mxu0 }
0x1ee9   :  { %v4144_v43 = vmul.f32 0.35355338, %v4140_v41  ;;  %v7797_v44 = vpop.f32.mrb[47].mxu0 }
0x1eeb   :  { %v4145_v45 = vadd.f32 %v4144_v43, %v8974_v42 }
0x1eed   :  { %v4146_v46 = vsel %vm262_vm2, %v4145_v45, -inf }
0x1eee   :  { %4147 = vmax.xlane.f32.xlu0 %v4146_v46 }
0x1f04   :  { %4157 = vrot.lane.b32.xlu0 %v8833_v10, %s8339_s2 }
0x1f08   :  { %4308 = vrot.lane.b32.xlu0 %v8833_v10, %s8338_s1 }
0x1f7b   :  { %v4148_v26 = vpop.xlane.xlu0 %4147 }
0x1f7c   :  { %v4149_v48 = vsub.f32 %v4145_v45, %v4148_v26 }
0x1f7e   :  { %v4150_v50 = vmul.f32 1.442695, %v4149_v48 }
0x1f7f   :  { %v4158_v51 = vpop.permute.xlu0 %4157 }
0x1f80   :  { %8209 = vpow2.f32 %v4150_v50  ;;  %7799 = vmatpush3.msra.mxu1 %v4158_v51 }
0x1f81   :  { %7808 = vmatprep.subr.mxu1 %v8328_v8 }
0x1f83   :  { %v4309_v60 = vpop.permute.xlu0 %4308 }
0x1f8a   :  { %v8210_v39 = vpop.eup %8209 }
0x1f8b   :  { %v4152_v53 = vsel %vm262_vm2, %v8210_v39, 0.0 }
0x1f8c   :  { %4153 = vadd.xlane.f32.xlu1 %v4152_v53 }
0x1f9d   :  { %4310 = vrot.lane.b32.xlu1 %v8833_v10, %s8337_s28 }
0x2019   :  { %v4154_v54 = vpop.xlane.xlu1 %4153 }
0x201a   :  { %8211 = vrcp.f32 %v4154_v54 }
0x201d   :  { %v4311_v58 = vpop.permute.xlu1 %4310 }
0x2024   :  { %v8212_v55 = vpop.eup %8211 }
0x2025   :  { %v4156_v56 = vmul.f32 %v8212_v55, %v8210_v39 }
0x2027   :  { %7801 = vmatmul.mubr.msk.f32.vlgmr.msra.gmra.mrb[46].mxu1 %vm262_vm2, %v4156_v56 }
0x2028   :  { %7809 = vmatpush3.xpose.msk.msra.mxu1 %vm262_vm2, %v4311_v58  ;;  %7810 = vmatprep.mubr.msk.f32.mxu1 %vm8329_vm1, %v8328_v8 }
0x2029   :  { %7818 = vmatprep.subr.mxu1 %v8328_v8 }
0x202b   :  { %7811 = vmatmul.mubr.msk.f32.vlgmr.msra.gmra.mrb[48].mxu1 %vm262_vm2, %v4309_v60 }
0x202c   :  { %7819 = vmatpush3.msra.mxu1 %v8965_v49  ;;  %7820 = vmatprep.mubr.msk.f32.mxu1 %vm8329_vm1, %v8328_v8  ;;  %v2454_v49 = vadd.f32 %v8854_v20, %v7224_v62 }
0x202e   :  { %v2458_v9 = vadd.f32 %v2454_v49, %v8807_v57 }
0x2030   :  { %v2462_v15 = vsel %vm176_vm0, %v2458_v9, 0.0 }
0x20fa   :  { %v4229_v61 = vpop.f32.mrb[46].mxu1 }
0x20fb   :  { %v7802_v5 = vpop.f32.mrb[47].mxu1  ;;  %7806 = vmatmul.mubr.msk.f32.vlgmr.msra.gmra.mrb[48].mxu0 %vm262_vm2, %v4229_v61  ;;  %v4699_v61 = vld [vmem:[%s9398_s6] sm:$0xff] }
0x20fc   :  { %7815 = vmatprep.mubr.msk.f32.mxu0 %vm8329_vm1, %v8328_v8  ;;  %v4700_v5 = vld [vmem:[%s9398_s6 + $0x8] sm:$0xff] }
0x20fd   :  { %v8054_v62 = vpack.c.bf16 %v4700_v5, %v4699_v61 }
0x20fe   :  { %v4382_v63 = vpop.f32.mrb[48].mxu1 }
0x20ff   :  { %v4386_v0 = vmul.f32 0.35355338, %v4382_v63  ;;  %v7812_v2 = vpop.f32.mrb[49].mxu1  ;;  %8055 = vmatprep.subr.bf16.mxu1 %v8054_v62  ;;  %v4701_v63 = vld [vmem:[%s9398_s6 + $0x10] sm:$0xff] }
0x2101   :  { %v4387_v3 = vadd.f32 %v4386_v0, %v8974_v42  ;;  %v4563_v42 = vsel %vm176_vm0, %v4561_v21, 0.0 }
0x2103   :  { %v4388_v4 = vsel %vm262_vm2, %v4387_v3, -inf }
0x2104   :  { %4389 = vmax.xlane.f32.xlu1 %v4388_v4 }
0x2108   :  { %2460 = vadd.xlane.f32.xlu1 %v2459_v11 }
0x210c   :  { %2463 = vadd.xlane.f32.xlu1 %v2462_v15 }
0x2110   :  { %4564 = vadd.xlane.f32.xlu1 %v4563_v42 }
0x2191   :  { %v4390_v20 = vpop.xlane.xlu1 %4389 }
0x2192   :  { %v4391_v17 = vsub.f32 %v4387_v3, %v4390_v20  ;;  %v7227_v20 = vld [vmem:[%s9399_s12] ss:$0 sm:$0xff] }
0x2194   :  { %v4392_v19 = vmul.f32 1.442695, %v4391_v17 }
0x2195   :  { %v2461_v57 = vpop.xlane.xlu1 %2460 }
0x2196   :  { %8213 = vpow2.f32 %v4392_v19  ;;  %v2465_v48 = vmul.f32 0.03125, %v2461_v57  ;;  %v7228_v19 = vld [vmem:[%s9400_s4] ss:$0 sm:$0xff] }
0x2198   :  { %v2467_v50 = vsub.f32 %v2457_v6, %v2465_v48 }
0x2199   :  { %v2464_v24 = vpop.xlane.xlu1 %2463 }
0x219a   :  { %v2466_v51 = vmul.f32 0.03125, %v2464_v24  ;;  %v2469_v56 = vmul.f32 %v2467_v50, %v2467_v50 }
0x219c   :  { %v2468_v54 = vsub.f32 %v2458_v9, %v2466_v51  ;;  %v2471_v58 = vsel %vm176_vm0, %v2469_v56, 0.0  ;;  %v9131_v51 = vld [vmem:[%s8367_s17] ss:$0 sm:$0xff] }
0x219d   :  { %v4565_v25 = vpop.xlane.xlu1 %4564 }
0x219e   :  { %v4569_v7 = vmul.f32 0.03125, %v4565_v25 }
0x21a0   :  { %v8214_v30 = vpop.eup %8213  ;;  %v4571_v38 = vsub.f32 %v4561_v21, %v4569_v7 }
0x21a1   :  { %v4394_v47 = vsel %vm262_vm2, %v8214_v30, 0.0 }
0x21a2   :  { %4395 = vadd.xlane.f32.xlu0 %v4394_v47  ;;  %v4573_v18 = vmul.f32 %v4571_v38, %v4571_v38 }
0x21a4   :  { %v4575_v13 = vsel %vm176_vm0, %v4573_v18, 0.0  ;;  %v4610_v18 = vld [vmem:[%s9401_s10 + $0x18] sm:$0xff] }
0x21b8   :  { %4399 = vrot.lane.b32.xlu0 %v8833_v10, %s8340_s7 }
0x21ce   :  { %v4303_v27 = vpop.f32.mrb[48].mxu0 }
0x21cf   :  { %v4307_v28 = vadd.f32 %v4303_v27, %v9019_v14  ;;  %v7807_v29 = vpop.f32.mrb[49].mxu0  ;;  %v4608_v27 = vld [vmem:[%s9401_s10 + $0x8] sm:$0xff] }
0x21d0   :  { %v4609_v29 = vld [vmem:[%s9401_s10 + $0x10] sm:$0xff] }
0x21d7   :  { %4576 = vadd.xlane.f32.xlu0 %v4575_v13  ;;  %v8050_v13 = vpack.c.bf16 %v4610_v18, %v4609_v29 }
0x222f   :  { %v4396_v31 = vpop.xlane.xlu0 %4395 }
0x2230   :  { %8215 = vrcp.f32 %v4396_v31 }
0x2233   :  { %v4400_v16 = vpop.permute.xlu0 %4399 }
0x2234   :  { %7814 = vmatpush3.msra.mxu0 %v4400_v16 }
0x223a   :  { %v8216_v10 = vpop.eup %8215 }
0x223b   :  { %v4398_v32 = vmul.f32 %v8216_v10, %v8214_v30 }
0x223d   :  { %7816 = vmatmul.mubr.msk.f32.vlgmr.msra.gmra.mrb[50].mxu0 %vm262_vm2, %v4398_v32 }
0x2264   :  { %v4577_v33 = vpop.xlane.xlu0 %4576 }
0x2265   :  { %v4581_v34 = vmul.f32 0.03125, %v4577_v33 }
0x2267   :  { %v4583_v35 = vadd.f32 1e-05, %v4581_v34 }
0x2269   :  { %8217 = vrsqrt.f32 %v4583_v35 }
0x2273   :  { %v8218_v52 = vpop.eup %8217 }
0x2274   :  { %v4587_v23 = vmul.f32 %v8218_v52, %v4571_v38  ;;  %v4607_v38 = vld [vmem:[%s9401_s10] sm:$0xff] }
0x2275   :  { %v7273_v52 = vld [vmem:[%s9402_s11] ss:$0 sm:$0xff] }
0x2276   :  { %v4596_v14 = vmul.f32 %v9061_v36, %v4587_v23 }
0x2278   :  { %v9068_v40 = vadd.f32 %v9064_v37, %v4596_v14 }
0x227a   :  { %7831 = vmatprep.mubr.msk.f32.mxu0 %vm176_vm0, %v9068_v40 }
0x2310   :  { %v4471_v41 = vpop.f32.mrb[50].mxu0 }
0x2311   :  { %v7817_v43 = vpop.f32.mrb[51].mxu0  ;;  %7821 = vmatmul.mubr.msk.f32.vlgmr.msra.gmra.mrb[50].mxu1 %vm262_vm2, %v4471_v41 }
0x2312   :  { %8057 = vmatpush3.bf16.msra.mxu1 %v8054_v62 }
0x23e4   :  { %v4545_v44 = vpop.f32.mrb[50].mxu1 }
0x23e5   :  { %v4549_v45 = vadd.f32 %v4545_v44, %v4307_v28  ;;  %v7822_v46 = vpop.f32.mrb[51].mxu1  ;;  %v8046_v28 = vpack.c.bf16 %v4608_v27, %v4607_v38 }
0x23e7   :  { %v4557_v26 = vadd.f32 %v8992_v1, %v4549_v45  ;;  %v2470_v1 = vmul.f32 %v2468_v54, %v2468_v54  ;;  %8047 = vmatprep.subr.bf16.mxu0 %v8046_v28 }
0x23e8   :  { %8049 = vmatpush3.bf16.msra.mxu0 %v8046_v28 }
0x23e9   :  { %4558 = vst.msk [vmem:[#allocation2 + $0x8] sm:$0xff] %vm176_vm0, %v4557_v26  ;;  %v2474_v60 = vsel %vm176_vm0, %v2470_v1, 0.0  ;;  %8051 = vmatprep.subr.bf16.mxu0 %v8050_v13 }
0x23ec   :  { %8053 = vmatpush3.bf16.msra.mxu0 %v8050_v13 }
0x23ed   :  { %7845 = vmatprep.subr.mxu0 %v8328_v8 }
0x23f0   :  { %v4560_v39 = vld [vmem:[#allocation2 + $0x8] sm:$0xff] }
0x23f1   :  { %v4562_v53 = vadd.f32 %v4560_v39, %v8817_v59  ;;  %v4702_v59 = vld [vmem:[%s9398_s6 + $0x18] sm:$0xff] }
0x23f2   :  { %v8058_v22 = vpack.c.bf16 %v4702_v59, %v4701_v63 }
0x23f3   :  { %v4566_v55 = vsel %vm176_vm0, %v4562_v53, 0.0 }
0x23f4   :  { %4567 = vadd.xlane.f32.xlu1 %v4566_v55  ;;  %8059 = vmatprep.subr.bf16.mxu1 %v8058_v22 }
0x23f5   :  { %8061 = vmatpush3.bf16.msra.mxu1 %v8058_v22 }
0x23f6   :  { %7850 = vmatprep.subr.mxu1 %v8328_v8 }
0x23f8   :  { %2472 = vadd.xlane.f32.xlu1 %v2471_v58 }
0x23fc   :  { %2475 = vadd.xlane.f32.xlu1 %v2474_v60 }
0x2481   :  { %v4568_v0 = vpop.xlane.xlu1 %4567 }
0x2482   :  { %v4570_v2 = vmul.f32 0.03125, %v4568_v0 }
0x2484   :  { %v4572_v3 = vsub.f32 %v4562_v53, %v4570_v2 }
0x2485   :  { %v2473_v49 = vpop.xlane.xlu1 %2472 }
0x2486   :  { %v2477_v4 = vmul.f32 0.03125, %v2473_v49  ;;  %v4574_v6 = vmul.f32 %v4572_v3, %v4572_v3 }
0x2488   :  { %v2479_v11 = vadd.f32 1e-05, %v2477_v4  ;;  %v4578_v9 = vsel %vm176_vm0, %v4574_v6, 0.0 }
0x2489   :  { %4579 = vadd.xlane.f32.xlu1 %v4578_v9  ;;  %v2476_v12 = vpop.xlane.xlu1 %2475 }
0x248a   :  { %8219 = vrsqrt.f32 %v2479_v11  ;;  %v2478_v15 = vmul.f32 0.03125, %v2476_v12 }
0x248c   :  { %v2480_v21 = vadd.f32 1e-05, %v2478_v15 }
0x248e   :  { %8221 = vrsqrt.f32 %v2480_v21 }
0x2494   :  { %v8220_v42 = vpop.eup %8219 }
0x2495   :  { %v2483_v17 = vmul.f32 %v8220_v42, %v2467_v50 }
0x2497   :  { %v2492_v30 = vmul.f32 %v7227_v20, %v2483_v17  ;;  %v9156_v17 = vld [vmem:[%s9404_s16] sm:$0xff] }
0x2498   :  { %v8222_v47 = vpop.eup %8221 }
0x2499   :  { %v2484_v57 = vmul.f32 %v8222_v47, %v2468_v54  ;;  %v2501_v24 = vadd.f32 %v7228_v19, %v2492_v30 }
0x249b   :  { %v2493_v25 = vmul.f32 %v7227_v20, %v2484_v57  ;;  %7842 = vmatprep.mubr.msk.f32.mxu1 %vm176_vm0, %v2501_v24 }
0x249d   :  { %v2502_v7 = vadd.f32 %v7228_v19, %v2493_v25  ;;  %v9160_v19 = vld [vmem:[%s9404_s16 + $0x8] sm:$0xff] }
0x249f   :  { %7843 = vmatmul.mubr.msk.f32.vlgmr.msra.gmra.mrb[52].mxu1 %vm176_vm0, %v2502_v7 }
0x24a0   :  { %7852 = vmatprep.mubr.msk.f32.mxu1 %vm8329_vm1, %v8328_v8 }
0x2516   :  { %v4580_v31 = vpop.xlane.xlu1 %4579 }
0x2517   :  { %v4582_v16 = vmul.f32 0.03125, %v4580_v31 }
0x2519   :  { %v4584_v10 = vadd.f32 1e-05, %v4582_v16 }
0x251b   :  { %8223 = vrsqrt.f32 %v4584_v10 }
0x2525   :  { %v8224_v32 = vpop.eup %8223 }
0x2526   :  { %v4588_v33 = vmul.f32 %v8224_v32, %v4572_v3 }
0x2528   :  { %v4597_v34 = vmul.f32 %v9061_v36, %v4588_v33  ;;  %v7270_v36 = vld [vmem:[%s9403_s15] ss:$0 sm:$0xff] }
0x252a   :  { %v9098_v35 = vadd.f32 %v9064_v37, %v4597_v34 }
0x252c   :  { %7832 = vmatmul.mubr.msk.f32.vlgmr.msra.gmra.mrb[52].mxu0 %vm176_vm0, %v9098_v35 }
0x252d   :  { %7847 = vmatprep.mubr.msk.f32.mxu0 %vm8329_vm1, %v8328_v8 }
0x2572   :  { %v7844_v23 = vpop.f32.mrb[52].mxu1 }
0x2573   :  { %v9105_v14 = vadd.f32 %v7844_v23, %v7273_v52  ;;  %v4782_v41 = vpop.f32.mrb[53].mxu1 }
0x2574   :  { %v9107_v43 = vadd.f32 %v7273_v52, %v4782_v41 }
0x2576   :  { %4964 = vrot.lane.b32.xlu1 %v9107_v43, %s8330_s0  ;;  %7846 = vmatpush3.xpose.msk.msra.mxu0 %vm262_vm2, %v9107_v43 }
0x2577   :  { %7855 = vmatprep.subr.mxu0 %v8328_v8 }
0x25e8   :  { %v4965_v26 = vpop.permute.xlu1 %4964 }
0x25ff   :  { %v7833_v37 = vpop.f32.mrb[52].mxu0 }
0x2600   :  { %v9115_v44 = vadd.f32 %v7833_v37, %v7270_v36  ;;  %v4690_v45 = vpop.f32.mrb[53].mxu0 }
0x2601   :  { %v9117_v46 = vadd.f32 %v7270_v36, %v4690_v45 }
0x2603   :  { %4962 = vrot.lane.b32.xlu1 %v9117_v46, %s8330_s0  ;;  %7848 = vmatmul.mubr.msk.f32.vlgmr.msra.gmra.mrb[54].mxu0 %vm262_vm2, %v9117_v46 }
0x2604   :  { %7856 = vmatpush3.xpose.msk.msra.mxu0 %vm262_vm2, %v4965_v26  ;;  %7857 = vmatprep.mubr.msk.f32.mxu0 %vm8329_vm1, %v8328_v8 }
0x2605   :  { %7865 = vmatprep.subr.mxu0 %v8328_v8 }
0x2675   :  { %v4963_v48 = vpop.permute.xlu1 %4962 }
0x2676   :  { %7858 = vmatmul.mubr.msk.f32.vlgmr.msra.gmra.mrb[56].mxu0 %vm262_vm2, %v4963_v48 }
0x2677   :  { %7867 = vmatprep.mubr.msk.f32.mxu0 %vm8329_vm1, %v8328_v8  ;;  %7866 = vmatpush3.msra.mxu0 %v9160_v19 }
0x2678   :  { %7875 = vmatprep.subr.mxu0 %v8328_v8 }
0x26d6   :  { %v4864_v50 = vpop.f32.mrb[54].mxu0 }
0x26d7   :  { %v4868_v39 = vmul.f32 0.35355338, %v4864_v50  ;;  %v7849_v53 = vpop.f32.mrb[55].mxu0  ;;  %v9195_v50 = vld [vmem:[%s9404_s16 + $0x10] sm:$0xff] }
0x26d9   :  { %v4873_v54 = vadd.f32 %v9131_v51, %v4868_v39 }
0x26db   :  { %v4874_v55 = vsel %vm262_vm2, %v4873_v54, -inf }
0x26dc   :  { %4875 = vmax.xlane.f32.xlu1 %v4874_v55 }
0x26ed   :  { %5053 = vrot.lane.b32.xlu1 %v9107_v43, %s8332_s25 }
0x2749   :  { %v5036_v56 = vpop.f32.mrb[56].mxu0 }
0x274a   :  { %v5040_v58 = vmul.f32 0.35355338, %v5036_v56  ;;  %v7859_v1 = vpop.f32.mrb[57].mxu0 }
0x274c   :  { %v5041_v60 = vadd.f32 %v9131_v51, %v5040_v58 }
0x274e   :  { %v5042_v61 = vsel %vm262_vm2, %v5041_v60, -inf }
0x274f   :  { %5043 = vmax.xlane.f32.xlu0 %v5042_v61 }
0x2769   :  { %v4876_v5 = vpop.xlane.xlu1 %4875 }
0x276a   :  { %v4877_v62 = vsub.f32 %v4873_v54, %v4876_v5 }
0x276c   :  { %v4878_v63 = vmul.f32 1.442695, %v4877_v62 }
0x276d   :  { %v5054_v21 = vpop.permute.xlu1 %5053 }
0x276e   :  { %8225 = vpow2.f32 %v4878_v63 }
0x2778   :  { %v8226_v59 = vpop.eup %8225 }
0x2779   :  { %v4880_v22 = vsel %vm262_vm2, %v8226_v59, 0.0 }
0x277a   :  { %4881 = vadd.xlane.f32.xlu0 %v4880_v22 }
0x27dc   :  { %v5044_v0 = vpop.xlane.xlu0 %5043 }
0x27dd   :  { %v5045_v2 = vsub.f32 %v5041_v60, %v5044_v0 }
0x27df   :  { %v5046_v3 = vmul.f32 1.442695, %v5045_v2 }
0x27e1   :  { %8227 = vpow2.f32 %v5046_v3 }
0x27eb   :  { %v8228_v49 = vpop.eup %8227 }
0x27ec   :  { %v5048_v4 = vsel %vm262_vm2, %v8228_v49, 0.0 }
0x27ed   :  { %5049 = vadd.xlane.f32.xlu0 %v5048_v4 }
0x2803   :  { %4885 = vrot.lane.b32.xlu0 %v9107_v43, %s8331_s5 }
0x2807   :  { %5278 = vrot.lane.b32.xlu0 %v9107_v43, %s8336_s26  ;;  %v4882_v6 = vpop.xlane.xlu0 %4881 }
0x2808   :  { %8229 = vrcp.f32 %v4882_v6  ;;  %v9232_v6 = vld [vmem:[%s9404_s16 + $0x18] sm:$0xff] }
0x280b   :  { %5276 = vrot.lane.b32.xlu0 %v9117_v46, %s8336_s26 }
0x2812   :  { %v8230_v9 = vpop.eup %8229 }
0x2813   :  { %v4884_v12 = vmul.f32 %v8230_v9, %v8226_v59 }
0x287a   :  { %v5050_v11 = vpop.xlane.xlu0 %5049 }
0x287b   :  { %8231 = vrcp.f32 %v5050_v11 }
0x287e   :  { %v4886_v15 = vpop.permute.xlu0 %4885 }
0x287f   :  { %7851 = vmatpush3.msra.mxu1 %v4886_v15 }
0x2880   :  { %7853 = vmatmul.mubr.msk.f32.vlgmr.msra.gmra.mrb[54].mxu1 %vm262_vm2, %v4884_v12  ;;  %7860 = vmatprep.subr.mxu1 %v8328_v8  ;;  %v9240_v12 = vld [vmem:[%s8367_s17 + $0x1] ss:$0 sm:$0xff]  ;;  %s9405_s17 = sld [smem:[#allocation20_spill]] }
0x2881   :  { %7861 = vmatpush3.msra.mxu1 %v5054_v21  ;;  %7862 = vmatprep.mubr.msk.f32.mxu1 %vm8329_vm1, %v8328_v8 }
0x2882   :  { %7870 = vmatprep.subr.mxu1 %v8328_v8  ;;  %v5279_v57 = vpop.permute.xlu0 %5278 }
0x2885   :  { %v8232_v42 = vpop.eup %8231 }
0x2886   :  { %v5052_v20 = vmul.f32 %v8232_v42, %v8228_v49  ;;  %v5277_v7 = vpop.permute.xlu0 %5276 }
0x2888   :  { %7863 = vmatmul.mubr.msk.f32.vlgmr.msra.gmra.mrb[56].mxu1 %vm262_vm2, %v5052_v20 }
0x2889   :  { %7872 = vmatprep.mubr.msk.f32.mxu1 %vm8329_vm1, %v8328_v8  ;;  %7871 = vmatpush3.msra.mxu1 %v9156_v17 }
0x288a   :  { %7880 = vmatprep.subr.mxu1 %v8328_v8 }
0x2953   :  { %v4957_v30 = vpop.f32.mrb[54].mxu1 }
0x2954   :  { %v7854_v47 = vpop.f32.mrb[55].mxu1  ;;  %7873 = vmatmul.mubr.msk.f32.vlgmr.msra.gmra.mrb[58].mxu1 %vm262_vm2, %v4957_v30 }
0x2955   :  { %7882 = vmatprep.mubr.msk.f32.mxu1 %vm8329_vm1, %v8328_v8 }
0x295b   :  { %v5125_v24 = vpop.f32.mrb[56].mxu1 }
0x295c   :  { %v7864_v25 = vpop.f32.mrb[57].mxu1  ;;  %7868 = vmatmul.mubr.msk.f32.vlgmr.msra.gmra.mrb[58].mxu0 %vm262_vm2, %v5125_v24 }
0x295d   :  { %7876 = vmatpush3.xpose.msk.msra.mxu0 %vm262_vm2, %v5279_v57  ;;  %7877 = vmatprep.mubr.msk.f32.mxu0 %vm8329_vm1, %v8328_v8 }
0x295e   :  { %7885 = vmatprep.subr.mxu0 %v8328_v8 }
0x2960   :  { %7878 = vmatmul.mubr.msk.f32.vlgmr.msra.gmra.mrb[60].mxu0 %vm262_vm2, %v5277_v7 }
0x2961   :  { %7887 = vmatprep.mubr.msk.f32.mxu0 %vm8329_vm1, %v8328_v8  ;;  %7886 = vmatpush3.msra.mxu0 %v9195_v50 }
0x2962   :  { %7895 = vmatprep.subr.mxu0 %v8328_v8 }
0x2a27   :  { %v5272_v38 = vpop.f32.mrb[58].mxu1 }
0x2a28   :  { %v7874_v27 = vpop.f32.mrb[59].mxu1 }
0x2a2f   :  { %v5199_v28 = vpop.f32.mrb[58].mxu0 }
0x2a30   :  { %v5273_v29 = vadd.f32 %v5272_v38, %v5199_v28  ;;  %v7869_v18 = vpop.f32.mrb[59].mxu0 }
0x2a33   :  { %v5350_v13 = vpop.f32.mrb[60].mxu0 }
0x2a34   :  { %v5354_v31 = vmul.f32 0.35355338, %v5350_v13  ;;  %v7879_v16 = vpop.f32.mrb[61].mxu0 }
0x2a36   :  { %v5355_v10 = vadd.f32 %v9131_v51, %v5354_v31 }
0x2a38   :  { %v5356_v32 = vsel %vm262_vm2, %v5355_v10, -inf }
0x2a39   :  { %5357 = vmax.xlane.f32.xlu0 %v5356_v32 }
0x2a4f   :  { %5367 = vrot.lane.b32.xlu0 %v9107_v43, %s8335_s23 }
0x2a53   :  { %5518 = vrot.lane.b32.xlu0 %v9117_v46, %s8338_s1 }
0x2ac6   :  { %v5358_v33 = vpop.xlane.xlu0 %5357 }
0x2ac7   :  { %v5359_v34 = vsub.f32 %v5355_v10, %v5358_v33 }
0x2ac9   :  { %v5360_v52 = vmul.f32 1.442695, %v5359_v34  ;;  %v9258_v34 = vld [vmem:[%s9405_s17] ss:$0 sm:$0xff] }
0x2aca   :  { %v5368_v23 = vpop.permute.xlu0 %5367 }
0x2acb   :  { %8233 = vpow2.f32 %v5360_v52  ;;  %7881 = vmatpush3.msra.mxu1 %v5368_v23 }
0x2acc   :  { %7890 = vmatprep.subr.mxu1 %v8328_v8 }
0x2ace   :  { %v5519_v48 = vpop.permute.xlu0 %5518 }
0x2ad5   :  { %v8234_v41 = vpop.eup %8233 }
0x2ad6   :  { %v5362_v36 = vsel %vm262_vm2, %v8234_v41, 0.0 }
0x2ad7   :  { %5363 = vadd.xlane.f32.xlu1 %v5362_v36 }
0x2ae8   :  { %5520 = vrot.lane.b32.xlu1 %v9107_v43, %s8338_s1 }
0x2b64   :  { %v5364_v37 = vpop.xlane.xlu1 %5363 }
0x2b65   :  { %8235 = vrcp.f32 %v5364_v37 }
0x2b68   :  { %v5521_v26 = vpop.permute.xlu1 %5520 }
0x2b6f   :  { %v8236_v45 = vpop.eup %8235 }
0x2b70   :  { %v5366_v46 = vmul.f32 %v8236_v45, %v8234_v41 }
0x2b72   :  { %7883 = vmatmul.mubr.msk.f32.vlgmr.msra.gmra.mrb[60].mxu1 %vm262_vm2, %v5366_v46 }
0x2b73   :  { %7891 = vmatpush3.xpose.msk.msra.mxu1 %vm262_vm2, %v5521_v26  ;;  %7892 = vmatprep.mubr.msk.f32.mxu1 %vm8329_vm1, %v8328_v8 }
0x2b74   :  { %7900 = vmatprep.subr.mxu1 %v8328_v8 }
0x2b76   :  { %7893 = vmatmul.mubr.msk.f32.vlgmr.msra.gmra.mrb[62].mxu1 %vm262_vm2, %v5519_v48 }
0x2b77   :  { %7902 = vmatprep.mubr.msk.f32.mxu1 %vm8329_vm1, %v8328_v8  ;;  %7901 = vmatpush3.msra.mxu1 %v9232_v6 }
0x2b78   :  { %7910 = vmatprep.subr.mxu1 %v8328_v8 }
0x2c45   :  { %v5439_v39 = vpop.f32.mrb[60].mxu1 }
0x2c46   :  { %v7884_v53 = vpop.f32.mrb[61].mxu1  ;;  %7888 = vmatmul.mubr.msk.f32.vlgmr.msra.gmra.mrb[62].mxu0 %vm262_vm2, %v5439_v39 }
0x2c47   :  { %7897 = vmatprep.mubr.msk.f32.mxu0 %vm8329_vm1, %v8328_v8 }
0x2c49   :  { %v5592_v54 = vpop.f32.mrb[62].mxu1 }
0x2c4a   :  { %v5596_v55 = vmul.f32 0.35355338, %v5592_v54  ;;  %v7894_v56 = vpop.f32.mrb[63].mxu1 }
0x2c4c   :  { %v5597_v58 = vadd.f32 %v9131_v51, %v5596_v55 }
0x2c4e   :  { %v5598_v1 = vsel %vm262_vm2, %v5597_v58, -inf }
0x2c4f   :  { %5599 = vmax.xlane.f32.xlu0 %v5598_v1 }
0x2c65   :  { %5609 = vrot.lane.b32.xlu0 %v9107_v43, %s8337_s28 }
0x2c69   :  { %5940 = vrot.lane.b32.xlu0 %v9115_v44, %s8330_s0 }
0x2cdc   :  { %v5600_v60 = vpop.xlane.xlu0 %5599 }
0x2cdd   :  { %v5601_v61 = vsub.f32 %v5597_v58, %v5600_v60 }
0x2cdf   :  { %v5602_v5 = vmul.f32 1.442695, %v5601_v61 }
0x2ce0   :  { %v5610_v62 = vpop.permute.xlu0 %5609 }
0x2ce1   :  { %8237 = vpow2.f32 %v5602_v5  ;;  %7896 = vmatpush3.msra.mxu0 %v5610_v62 }
0x2ce2   :  { %7905 = vmatprep.subr.mxu0 %v8328_v8 }
0x2ce4   :  { %v5941_v4 = vpop.permute.xlu0 %5940 }
0x2ceb   :  { %v8238_v63 = vpop.eup %8237 }
0x2cec   :  { %v5604_v51 = vsel %vm262_vm2, %v8238_v63, 0.0 }
0x2ced   :  { %5605 = vadd.xlane.f32.xlu1 %v5604_v51 }
0x2cfe   :  { %5942 = vrot.lane.b32.xlu1 %v9105_v14, %s8330_s0  ;;  %s9407_s0 = sld [smem:[#allocation22_spill]] }
0x2d19   :  { %v5513_v59 = vpop.f32.mrb[62].mxu0 }
0x2d1a   :  { %v9212_v43 = vadd.f32 %v5513_v59, %v5273_v29  ;;  %v7889_v22 = vpop.f32.mrb[63].mxu0 }
0x2d7a   :  { %v5606_v0 = vpop.xlane.xlu1 %5605 }
0x2d7b   :  { %8239 = vrcp.f32 %v5606_v0 }
0x2d7e   :  { %v5943_v49 = vpop.permute.xlu1 %5942 }
0x2d85   :  { %v8240_v2 = vpop.eup %8239 }
0x2d86   :  { %v5608_v3 = vmul.f32 %v8240_v2, %v8238_v63 }
0x2d88   :  { %7898 = vmatmul.mubr.msk.f32.vlgmr.msra.gmra.mrb[64].mxu0 %vm262_vm2, %v5608_v3 }
0x2d89   :  { %7906 = vmatpush3.xpose.msk.msra.mxu0 %vm262_vm2, %v9105_v14  ;;  %7907 = vmatprep.mubr.msk.f32.mxu0 %vm8329_vm1, %v8328_v8 }
0x2d8a   :  { %7915 = vmatprep.subr.mxu0 %v8328_v8 }
0x2d8c   :  { %7908 = vmatmul.mubr.msk.f32.vlgmr.msra.gmra.mrb[66].mxu0 %vm262_vm2, %v9115_v44 }
0x2d8d   :  { %7916 = vmatpush3.xpose.msk.msra.mxu0 %vm262_vm2, %v5943_v49  ;;  %7917 = vmatprep.mubr.msk.f32.mxu0 %vm8329_vm1, %v8328_v8 }
0x2d8e   :  { %7925 = vmatprep.subr.mxu0 %v8328_v8 }
0x2d90   :  { %7918 = vmatmul.mubr.msk.f32.vlgmr.msra.gmra.mrb[68].mxu0 %vm262_vm2, %v5941_v4 }
0x2d91   :  { %7926 = vmatpush3.msra.mxu0 %v9160_v19  ;;  %7927 = vmatprep.mubr.msk.f32.mxu0 %vm8329_vm1, %v8328_v8 }
0x2d92   :  { %7935 = vmatprep.subr.mxu0 %v8328_v8 }
0x2e5b   :  { %v5681_v11 = vpop.f32.mrb[64].mxu0 }
0x2e5c   :  { %v7899_v9 = vpop.f32.mrb[65].mxu0  ;;  %7903 = vmatmul.mubr.msk.f32.vlgmr.msra.gmra.mrb[64].mxu1 %vm262_vm2, %v5681_v11 }
0x2e5d   :  { %7912 = vmatprep.mubr.msk.f32.mxu1 %vm8329_vm1, %v8328_v8 }
0x2e5f   :  { %v5842_v15 = vpop.f32.mrb[66].mxu0 }
0x2e60   :  { %v5846_v21 = vmul.f32 0.35355338, %v5842_v15  ;;  %v7909_v42 = vpop.f32.mrb[67].mxu0 }
0x2e62   :  { %v5851_v20 = vadd.f32 %v9240_v12, %v5846_v21 }
0x2e63   :  { %v6014_v19 = vpop.f32.mrb[68].mxu0 }
0x2e64   :  { %v6018_v30 = vmul.f32 0.35355338, %v6014_v19  ;;  %v7919_v47 = vpop.f32.mrb[69].mxu0  ;;  %v5852_v57 = vsel %vm262_vm2, %v5851_v20, -inf }
0x2e65   :  { %5853 = vmax.xlane.f32.xlu0 %v5852_v57 }
0x2e66   :  { %v6019_v24 = vadd.f32 %v9240_v12, %v6018_v30 }
0x2e68   :  { %v6020_v25 = vsel %vm262_vm2, %v6019_v24, -inf }
0x2e69   :  { %6021 = vmax.xlane.f32.xlu1 %v6020_v25 }
0x2e7a   :  { %5863 = vrot.lane.b32.xlu1 %v9105_v14, %s8331_s5  ;;  %s9408_s5 = sld [smem:[#allocation23_spill]] }
0x2e7e   :  { %6256 = vrot.lane.b32.xlu1 %v9105_v14, %s8336_s26 }
0x2e82   :  { %6254 = vrot.lane.b32.xlu1 %v9115_v44, %s8336_s26 }
0x2ef2   :  { %v5854_v7 = vpop.xlane.xlu0 %5853 }
0x2ef3   :  { %v5855_v38 = vsub.f32 %v5851_v20, %v5854_v7 }
0x2ef5   :  { %v5856_v27 = vmul.f32 1.442695, %v5855_v38 }
0x2ef6   :  { %v6022_v28 = vpop.xlane.xlu1 %6021 }
0x2ef7   :  { %8241 = vpow2.f32 %v5856_v27  ;;  %v6023_v29 = vsub.f32 %v6019_v24, %v6022_v28 }
0x2ef9   :  { %v6024_v18 = vmul.f32 1.442695, %v6023_v29 }
0x2efa   :  { %v5864_v13 = vpop.permute.xlu1 %5863 }
0x2efb   :  { %8243 = vpow2.f32 %v6024_v18  ;;  %7911 = vmatpush3.msra.mxu1 %v5864_v13 }
0x2efc   :  { %7920 = vmatprep.subr.mxu1 %v8328_v8 }
0x2efe   :  { %v6257_v55 = vpop.permute.xlu1 %6256 }
0x2f01   :  { %v8242_v31 = vpop.eup %8241 }
0x2f02   :  { %v5858_v16 = vsel %vm262_vm2, %v8242_v31, 0.0 }
0x2f03   :  { %5859 = vadd.xlane.f32.xlu0 %v5858_v16 }
0x2f05   :  { %v8244_v10 = vpop.eup %8243 }
0x2f06   :  { %v6026_v32 = vsel %vm262_vm2, %v8244_v10, 0.0 }
0x2f07   :  { %6027 = vadd.xlane.f32.xlu0 %v6026_v32 }
0x2f1d   :  { %6031 = vrot.lane.b32.xlu0 %v9105_v14, %s8332_s25  ;;  %s9409_s25 = sld [smem:[#allocation25_spill]] }
0x2f2f   :  { %v5755_v33 = vpop.f32.mrb[64].mxu1 }
0x2f30   :  { %v5759_v52 = vadd.f32 %v5755_v33, %v9212_v43  ;;  %v7904_v23 = vpop.f32.mrb[65].mxu1 }
0x2f32   :  { %v5767_v41 = vadd.f32 %v9258_v34, %v5759_v52 }
0x2f34   :  { %5768 = vst.msk [vmem:[#allocation2] sm:$0xff] %vm176_vm0, %v5767_v41 }
0x2f3b   :  { %v6747_v57 = vld [vmem:[#allocation2] sm:$0xff] }
0x2f90   :  { %v5860_v36 = vpop.xlane.xlu0 %5859 }
0x2f91   :  { %8245 = vrcp.f32 %v5860_v36 }
0x2f94   :  { %v6028_v37 = vpop.xlane.xlu0 %6027 }
0x2f95   :  { %8247 = vrcp.f32 %v6028_v37 }
0x2f98   :  { %v6032_v26 = vpop.permute.xlu0 %6031 }
0x2f9b   :  { %v8246_v45 = vpop.eup %8245 }
0x2f9c   :  { %v5862_v46 = vmul.f32 %v8246_v45, %v8242_v31 }
0x2f9e   :  { %7913 = vmatmul.mubr.msk.f32.vlgmr.msra.gmra.mrb[66].mxu1 %vm262_vm2, %v5862_v46 }
0x2f9f   :  { %v8248_v48 = vpop.eup %8247  ;;  %7921 = vmatpush3.msra.mxu1 %v6032_v26  ;;  %7922 = vmatprep.mubr.msk.f32.mxu1 %vm8329_vm1, %v8328_v8 }
0x2fa0   :  { %v6030_v39 = vmul.f32 %v8248_v48, %v8244_v10  ;;  %7930 = vmatprep.subr.mxu1 %v8328_v8 }
0x2fa2   :  { %7923 = vmatmul.mubr.msk.f32.vlgmr.msra.gmra.mrb[68].mxu1 %vm262_vm2, %v6030_v39 }
0x2fa3   :  { %7931 = vmatpush3.msra.mxu1 %v9156_v17  ;;  %7932 = vmatprep.mubr.msk.f32.mxu1 %vm8329_vm1, %v8328_v8  ;;  %v6255_v17 = vpop.permute.xlu1 %6254 }
0x2fa4   :  { %7940 = vmatprep.subr.mxu1 %v8328_v8 }
0x3071   :  { %v5935_v53 = vpop.f32.mrb[66].mxu1 }
0x3072   :  { %v7914_v54 = vpop.f32.mrb[67].mxu1  ;;  %7933 = vmatmul.mubr.msk.f32.vlgmr.msra.gmra.mrb[70].mxu1 %vm262_vm2, %v5935_v53 }
0x3073   :  { %7942 = vmatprep.mubr.msk.f32.mxu1 %vm8329_vm1, %v8328_v8 }
0x3075   :  { %v6103_v56 = vpop.f32.mrb[68].mxu1 }
0x3076   :  { %v7924_v58 = vpop.f32.mrb[69].mxu1  ;;  %7928 = vmatmul.mubr.msk.f32.vlgmr.msra.gmra.mrb[70].mxu0 %vm262_vm2, %v6103_v56 }
0x3077   :  { %7936 = vmatpush3.xpose.msk.msra.mxu0 %vm262_vm2, %v6257_v55  ;;  %7937 = vmatprep.mubr.msk.f32.mxu0 %vm8329_vm1, %v8328_v8 }
0x3078   :  { %7945 = vmatprep.subr.mxu0 %v8328_v8 }
0x307a   :  { %7938 = vmatmul.mubr.msk.f32.vlgmr.msra.gmra.mrb[72].mxu0 %vm262_vm2, %v6255_v17 }
0x307b   :  { %7946 = vmatpush3.msra.mxu0 %v9195_v50  ;;  %7947 = vmatprep.mubr.msk.f32.mxu0 %vm8329_vm1, %v8328_v8 }
0x307c   :  { %7955 = vmatprep.subr.mxu0 %v8328_v8 }
0x3145   :  { %v6250_v1 = vpop.f32.mrb[70].mxu1 }
0x3146   :  { %v7934_v60 = vpop.f32.mrb[71].mxu1 }
0x3149   :  { %v6177_v61 = vpop.f32.mrb[70].mxu0 }
0x314a   :  { %v6251_v5 = vadd.f32 %v6250_v1, %v6177_v61  ;;  %v7929_v62 = vpop.f32.mrb[71].mxu0  ;;  %v7312_v61 = vld [vmem:[%s9406_s18] ss:$0 sm:$0xff] }
0x314b   :  { %v7313_v62 = vld [vmem:[%s9407_s0] ss:$0 sm:$0xff] }
0x314d   :  { %v6328_v63 = vpop.f32.mrb[72].mxu0 }
0x314e   :  { %v6332_v51 = vmul.f32 0.35355338, %v6328_v63  ;;  %v7939_v59 = vpop.f32.mrb[73].mxu0 }
0x314f   :  { %v6795_v59 = vld [vmem:[%s9408_s5] sm:$0xff] }
0x3150   :  { %v6333_v43 = vadd.f32 %v9240_v12, %v6332_v51 }
0x3152   :  { %v6334_v22 = vsel %vm262_vm2, %v6333_v43, -inf }
0x3153   :  { %6335 = vmax.xlane.f32.xlu0 %v6334_v22 }
0x3169   :  { %6345 = vrot.lane.b32.xlu0 %v9105_v14, %s8335_s23  ;;  %s9412_s23 = sld [smem:[#allocation27_spill]] }
0x316d   :  { %6496 = vrot.lane.b32.xlu0 %v9115_v44, %s8338_s1 }
0x31e0   :  { %v6336_v50 = vpop.xlane.xlu0 %6335 }
0x31e1   :  { %v6337_v0 = vsub.f32 %v6333_v43, %v6336_v50  ;;  %v6796_v43 = vld [vmem:[%s9408_s5 + $0x8] sm:$0xff]  ;;  %v6797_v50 = vld [vmem:[%s9408_s5 + $0x10] sm:$0xff] }
0x31e2   :  { %v8062_v22 = vpack.c.bf16 %v6796_v43, %v6795_v59  ;;  %v7320_v59 = vld [vmem:[%s9412_s23] ss:$0 sm:$0xff] }
0x31e3   :  { %v6338_v2 = vmul.f32 1.442695, %v6337_v0  ;;  %v6798_v0 = vld [vmem:[%s9408_s5 + $0x18] sm:$0xff] }
0x31e4   :  { %v6346_v3 = vpop.permute.xlu0 %6345 }
0x31e5   :  { %8249 = vpow2.f32 %v6338_v2  ;;  %7941 = vmatpush3.msra.mxu1 %v6346_v3  ;;  %v8066_v2 = vpack.c.bf16 %v6798_v0, %v6797_v50  ;;  %v6889_v3 = vld [vmem:[%s9409_s25] sm:$0xff] }
0x31e6   :  { %7950 = vmatprep.subr.mxu1 %v8328_v8 }
0x31e8   :  { %v6497_v21 = vpop.permute.xlu0 %6496 }
0x31ef   :  { %v8250_v49 = vpop.eup %8249 }
0x31f0   :  { %v6340_v4 = vsel %vm262_vm2, %v8250_v49, 0.0 }
0x31f1   :  { %6341 = vadd.xlane.f32.xlu1 %v6340_v4  ;;  %v6891_v4 = vld [vmem:[%s9409_s25 + $0x10] sm:$0xff] }
0x3202   :  { %6498 = vrot.lane.b32.xlu1 %v9105_v14, %s8338_s1 }
0x327e   :  { %v6342_v11 = vpop.xlane.xlu1 %6341 }
0x327f   :  { %8251 = vrcp.f32 %v6342_v11 }
0x3282   :  { %v6499_v44 = vpop.permute.xlu1 %6498 }
0x3289   :  { %v8252_v9 = vpop.eup %8251 }
0x328a   :  { %v6344_v15 = vmul.f32 %v8252_v9, %v8250_v49  ;;  %v6890_v49 = vld [vmem:[%s9409_s25 + $0x8] sm:$0xff]  ;;  %v6892_v9 = vld [vmem:[%s9409_s25 + $0x18] sm:$0xff] }
0x328b   :  { %v8070_v11 = vpack.c.bf16 %v6890_v49, %v6889_v3 }
0x328c   :  { %7943 = vmatmul.mubr.msk.f32.vlgmr.msra.gmra.mrb[72].mxu1 %vm262_vm2, %v6344_v15  ;;  %v8074_v15 = vpack.c.bf16 %v6892_v9, %v6891_v4 }
0x328d   :  { %7951 = vmatpush3.xpose.msk.msra.mxu1 %vm262_vm2, %v6499_v44  ;;  %7952 = vmatprep.mubr.msk.f32.mxu1 %vm8329_vm1, %v8328_v8  ;;  %v6893_v44 = vld [vmem:[%s9409_s25 + $0x20] sm:$0xff] }
0x328e   :  { %7960 = vmatprep.subr.mxu1 %v8328_v8 }
0x3290   :  { %7953 = vmatmul.mubr.msk.f32.vlgmr.msra.gmra.mrb[74].mxu1 %vm262_vm2, %v6497_v21  ;;  %v6894_v21 = vld [vmem:[%s9409_s25 + $0x28] sm:$0xff] }
0x3291   :  { %7961 = vmatpush3.msra.mxu1 %v9232_v6  ;;  %7962 = vmatprep.mubr.msk.f32.mxu1 %vm8329_vm1, %v8328_v8  ;;  %v6749_v6 = vadd.f32 %v6747_v57, %v9068_v40 }
0x3292   :  { %8071 = vmatprep.subr.bf16.mxu1 %v8070_v11 }
0x3293   :  { %v6751_v7 = vsel %vm176_vm0, %v6749_v6, 0.0 }
0x335f   :  { %v6417_v42 = vpop.f32.mrb[72].mxu1 }
0x3360   :  { %v7944_v20 = vpop.f32.mrb[73].mxu1  ;;  %7948 = vmatmul.mubr.msk.f32.vlgmr.msra.gmra.mrb[74].mxu0 %vm262_vm2, %v6417_v42  ;;  %v8078_v42 = vpack.c.bf16 %v6894_v21, %v6893_v44 }
0x3361   :  { %7957 = vmatprep.mubr.msk.f32.mxu0 %vm8329_vm1, %v8328_v8 }
0x3363   :  { %v6570_v19 = vpop.f32.mrb[74].mxu1 }
0x3364   :  { %v6574_v30 = vmul.f32 0.35355338, %v6570_v19  ;;  %v7954_v47 = vpop.f32.mrb[75].mxu1 }
0x3366   :  { %v6575_v24 = vadd.f32 %v9240_v12, %v6574_v30 }
0x3368   :  { %v6576_v25 = vsel %vm262_vm2, %v6575_v24, -inf }
0x3369   :  { %6577 = vmax.xlane.f32.xlu1 %v6576_v25 }
0x336d   :  { %6752 = vadd.xlane.f32.xlu1 %v6751_v7  ;;  %v6896_v7 = vld [vmem:[%s9409_s25 + $0x38] sm:$0xff] }
0x33f6   :  { %v6578_v38 = vpop.xlane.xlu1 %6577 }
0x33f7   :  { %v6579_v27 = vsub.f32 %v6575_v24, %v6578_v38 }
0x33f9   :  { %v6580_v28 = vmul.f32 1.442695, %v6579_v27  ;;  %v7314_v27 = vld [vmem:[%s9410_s29] ss:$0 sm:$0xff] }
0x33fa   :  { %v6753_v36 = vpop.xlane.xlu1 %6752 }
0x33fb   :  { %8253 = vpow2.f32 %v6580_v28  ;;  %v6757_v37 = vmul.f32 0.03125, %v6753_v36 }
0x33fd   :  { %v6759_v45 = vsub.f32 %v6749_v6, %v6757_v37  ;;  %v6895_v6 = vld [vmem:[%s9409_s25 + $0x30] sm:$0xff] }
0x33fe   :  { %v8082_v38 = vpack.c.bf16 %v6896_v7, %v6895_v6 }
0x33ff   :  { %v6761_v39 = vmul.f32 %v6759_v45, %v6759_v45 }
0x3401   :  { %v6763_v53 = vsel %vm176_vm0, %v6761_v39, 0.0 }
0x3405   :  { %v8254_v29 = vpop.eup %8253 }
0x3406   :  { %v6582_v8 = vsel %vm262_vm2, %v8254_v29, 0.0 }
0x3407   :  { %6583 = vadd.xlane.f32.xlu0 %v6582_v8 }
0x341d   :  { %6587 = vrot.lane.b32.xlu0 %v9105_v14, %s8337_s28 }
0x3433   :  { %v6491_v12 = vpop.f32.mrb[74].mxu0 }
0x3434   :  { %v6495_v18 = vadd.f32 %v6491_v12, %v6251_v5  ;;  %v7949_v13 = vpop.f32.mrb[75].mxu0 }
0x3494   :  { %v6584_v31 = vpop.xlane.xlu0 %6583 }
0x3495   :  { %8255 = vrcp.f32 %v6584_v31  ;;  %v7317_v31 = vld [vmem:[%s9411_s22] ss:$0 sm:$0xff] }
0x3498   :  { %v6588_v40 = vpop.permute.xlu0 %6587 }
0x3499   :  { %7956 = vmatpush3.msra.mxu0 %v6588_v40 }
0x349a   :  { %8063 = vmatprep.subr.bf16.mxu0 %v8062_v22 }
0x349f   :  { %v8256_v16 = vpop.eup %8255 }
0x34a0   :  { %v6586_v10 = vmul.f32 %v8256_v16, %v8254_v29 }
0x34a2   :  { %7958 = vmatmul.mubr.msk.f32.vlgmr.msra.gmra.mrb[76].mxu0 %vm262_vm2, %v6586_v10 }
0x34a3   :  { %8065 = vmatpush3.bf16.msra.mxu0 %v8062_v22  ;;  %v7321_v22 = vld [vmem:[%s8532_s27] ss:$0 sm:$0xff] }
0x34a4   :  { %8067 = vmatprep.subr.bf16.mxu0 %v8066_v2 }
0x34a7   :  { %8069 = vmatpush3.bf16.msra.mxu0 %v8066_v2 }
0x3575   :  { %v6659_v32 = vpop.f32.mrb[76].mxu0 }
0x3576   :  { %v7959_v33 = vpop.f32.mrb[77].mxu0  ;;  %7963 = vmatmul.mubr.msk.f32.vlgmr.msra.gmra.mrb[76].mxu1 %vm262_vm2, %v6659_v32 }
0x3577   :  { %8073 = vmatpush3.bf16.msra.mxu1 %v8070_v11  ;;  %v7322_v11 = vld [vmem:[%s8542_s13] ss:$0 sm:$0xff] }
0x3578   :  { %8075 = vmatprep.subr.bf16.mxu1 %v8074_v15 }
0x357b   :  { %8077 = vmatpush3.bf16.msra.mxu1 %v8074_v15 }
0x357c   :  { %8079 = vmatprep.subr.bf16.mxu1 %v8078_v42 }
0x357f   :  { %8081 = vmatpush3.bf16.msra.mxu1 %v8078_v42 }
0x3580   :  { %8083 = vmatprep.subr.bf16.mxu1 %v8082_v38 }
0x3583   :  { %8085 = vmatpush3.bf16.msra.mxu1 %v8082_v38 }
0x3649   :  { %v6733_v52 = vpop.f32.mrb[76].mxu1 }
0x364a   :  { %v6737_v23 = vadd.f32 %v6733_v52, %v6495_v18  ;;  %v7964_v41 = vpop.f32.mrb[77].mxu1 }
0x364c   :  { %v6745_v14 = vadd.f32 %v9258_v34, %v6737_v23 }
0x364e   :  { %6746 = vst.msk [vmem:[#allocation2 + $0x8] sm:$0xff] %vm176_vm0, %v6745_v14 }
0x3655   :  { %v6748_v46 = vld [vmem:[#allocation2 + $0x8] sm:$0xff] }
0x3656   :  { %v6750_v26 = vadd.f32 %v6748_v46, %v9098_v35 }
0x3658   :  { %v6754_v48 = vsel %vm176_vm0, %v6750_v26, 0.0 }
0x3659   :  { %6755 = vadd.xlane.f32.xlu1 %v6754_v48 }
0x365d   :  { %6764 = vadd.xlane.f32.xlu1 %v6763_v53 }
0x36e6   :  { %v6756_v54 = vpop.xlane.xlu1 %6755 }
0x36e7   :  { %v6758_v55 = vmul.f32 0.03125, %v6756_v54 }
0x36e9   :  { %v6760_v34 = vsub.f32 %v6750_v26, %v6758_v55  ;;  %v7031_v55 = vld [vmem:[%s8537_s21] sm:$0xff] }
0x36ea   :  { %v6765_v56 = vpop.xlane.xlu1 %6764 }
0x36eb   :  { %v6769_v58 = vmul.f32 0.03125, %v6765_v56  ;;  %v6762_v17 = vmul.f32 %v6760_v34, %v6760_v34 }
0x36ed   :  { %v6771_v1 = vadd.f32 1e-05, %v6769_v58  ;;  %v6766_v35 = vsel %vm176_vm0, %v6762_v17, 0.0  ;;  %v7033_v58 = vld [vmem:[%s8537_s21 + $0x10] sm:$0xff]  ;;  %v7034_v17 = vld [vmem:[%s8537_s21 + $0x18] sm:$0xff] }
0x36ee   :  { %6767 = vadd.xlane.f32.xlu1 %v6766_v35 }
0x36ef   :  { %8257 = vrsqrt.f32 %v6771_v1  ;;  %v8090_v1 = vpack.c.bf16 %v7034_v17, %v7033_v58 }
0x36f9   :  { %v8258_v60 = vpop.eup %8257 }
0x36fa   :  { %v6775_v5 = vmul.f32 %v8258_v60, %v6759_v45 }
0x36fc   :  { %v6784_v63 = vmul.f32 %v7312_v61, %v6775_v5 }
0x36fe   :  { %v6793_v51 = vadd.f32 %v7313_v62, %v6784_v63 }
0x3700   :  { %7973 = vmatprep.mubr.msk.f32.mxu0 %vm176_vm0, %v6793_v51 }
0x377b   :  { %v6768_v20 = vpop.xlane.xlu1 %6767 }
0x377c   :  { %v6770_v19 = vmul.f32 0.03125, %v6768_v20 }
0x377e   :  { %v6772_v30 = vadd.f32 1e-05, %v6770_v19 }
0x3780   :  { %8259 = vrsqrt.f32 %v6772_v30 }
0x378a   :  { %v8260_v47 = vpop.eup %8259 }
0x378b   :  { %v6776_v57 = vmul.f32 %v8260_v47, %v6760_v34  ;;  %v7032_v34 = vld [vmem:[%s8537_s21 + $0x8] sm:$0xff]  ;;  %s8341_s21 = smov [#allocation3]  }
0x378c   :  { %v8086_v56 = vpack.c.bf16 %v7032_v34, %v7031_v55  ;;  %s7130_s26 = sshll.u32 %s8341_s21, 4  ;;  %s7131_s26 = int_to_ptr.vmem [resolvable:$true] %s7130_s26 }
0x378d   :  { %v6785_v24 = vmul.f32 %v7312_v61, %v6776_v57  ;;  %s8265_s27 = scalar_lea.vmem %s7131_s26, 256  ;;  %p8270_p1 = scmp.lt.s32.totalorder %s7131_s26, %s7131_s26 }
0x378e   :  { %8087 = vmatprep.subr.bf16.mxu0 %v8086_v56  ;;  %p8266_p0 = scmp.ne.s32.totalorder %s7131_s26, %s8265_s27  ;;  %p8271_p2 = scmp.lt.s32.totalorder %s8265_s27, %s8265_s27 }
0x378f   :  { %v6794_v25 = vadd.f32 %v7313_v62, %v6785_v24 }
0x3790   :  { %p8272_p3 = por %p8271_p2, %p8270_p1 }
0x3791   :  { %7974 = vmatmul.mubr.msk.f32.vlgmr.msra.gmra.mrb[78].mxu0 %vm176_vm0, %v6794_v25 }
0x3792   :  { %8089 = vmatpush3.bf16.msra.mxu0 %v8086_v56  ;;  %p8273_p4 = pnand %p8272_p3, %p8266_p0 }
0x3793   :  { %8091 = vmatprep.subr.bf16.mxu0 %v8090_v1 }
0x3796   :  { %8093 = vmatpush3.bf16.msra.mxu0 %v8090_v1 }
0x3864   :  { %v7975_v28 = vpop.f32.mrb[78].mxu0 }
0x3865   :  { %v6884_v29 = vadd.f32 %v7975_v28, %v7314_v27  ;;  %v6878_v8 = vpop.f32.mrb[79].mxu0 }
0x3866   :  { %v6879_v12 = vadd.f32 %v7314_v27, %v6878_v8 }
0x3867   :  { %v6888_v13 = vmax.f32 %v6884_v29, 0.0 }
0x3868   :  { %v6887_v18 = vmax.f32 %v6879_v12, 0.0 }
0x386a   :  { %7992 = vmatprep.mubr.msk.f32.mxu1 %vm2375_vm3, %v6887_v18 }
0x386b   :  { %7993 = vmatmul.mubr.msk.f32.vlgmr.msra.gmra.mrb[78].mxu1 %vm2375_vm3, %v6888_v13 }
0x393e   :  { %v7994_v40 = vpop.f32.mrb[78].mxu1 }
0x393f   :  { %v6976_v16 = vpop.f32.mrb[79].mxu1  ;;  %v6982_v10 = vadd.f32 %v7994_v40, %v7317_v31 }
0x3940   :  { %v6977_v32 = vadd.f32 %v7317_v31, %v6976_v16 }
0x3941   :  { %v6986_v52 = vadd.f32 %v6982_v10, %v6794_v25 }
0x3942   :  { %v6985_v33 = vadd.f32 %v6977_v32, %v6793_v51 }
0x3943   :  { %v6990_v41 = vsel %vm176_vm0, %v6986_v52, 0.0 }
0x3944   :  { %v6987_v23 = vsel %vm176_vm0, %v6985_v33, 0.0 }
0x3945   :  { %6988 = vadd.xlane.f32.xlu1 %v6987_v23 }
0x3949   :  { %6991 = vadd.xlane.f32.xlu1 %v6990_v41 }
0x39d2   :  { %v6989_v14 = vpop.xlane.xlu1 %6988 }
0x39d3   :  { %v6993_v36 = vmul.f32 0.03125, %v6989_v14 }
0x39d5   :  { %v6995_v37 = vsub.f32 %v6985_v33, %v6993_v36 }
0x39d6   :  { %v6992_v45 = vpop.xlane.xlu1 %6991 }
0x39d7   :  { %v6994_v46 = vmul.f32 0.03125, %v6992_v45  ;;  %v6997_v26 = vmul.f32 %v6995_v37, %v6995_v37 }
0x39d9   :  { %v6996_v48 = vsub.f32 %v6986_v52, %v6994_v46  ;;  %v6999_v39 = vsel %vm176_vm0, %v6997_v26, 0.0 }
0x39da   :  { %7000 = vadd.xlane.f32.xlu0 %v6999_v39 }
0x39db   :  { %v6998_v53 = vmul.f32 %v6996_v48, %v6996_v48 }
0x39dd   :  { %v7002_v54 = vsel %vm176_vm0, %v6998_v53, 0.0 }
0x39de   :  { %7003 = vadd.xlane.f32.xlu1 %v7002_v54 }
0x3a67   :  { %v7001_v35 = vpop.xlane.xlu0 %7000 }
0x3a68   :  { %v7005_v60 = vmul.f32 0.03125, %v7001_v35 }
0x3a6a   :  { %v7007_v61 = vadd.f32 1e-05, %v7005_v60 }
0x3a6b   :  { %v7004_v5 = vpop.xlane.xlu1 %7003 }
0x3a6c   :  { %8261 = vrsqrt.f32 %v7007_v61  ;;  %v7006_v62 = vmul.f32 0.03125, %v7004_v5 }
0x3a6e   :  { %v7008_v63 = vadd.f32 1e-05, %v7006_v62 }
0x3a70   :  { %8263 = vrsqrt.f32 %v7008_v63 }
0x3a76   :  { %v8262_v51 = vpop.eup %8261 }
0x3a77   :  { %v7011_v43 = vmul.f32 %v8262_v51, %v6995_v37 }
0x3a79   :  { %v7020_v50 = vmul.f32 %v7320_v59, %v7011_v43 }
0x3a7a   :  { %v8264_v0 = vpop.eup %8263 }
0x3a7b   :  { %v7012_v2 = vmul.f32 %v8264_v0, %v6996_v48  ;;  %v7029_v3 = vadd.f32 %v7321_v22, %v7020_v50 }
0x3a7d   :  { %v7021_v49 = vmul.f32 %v7320_v59, %v7012_v2  ;;  %8003 = vmatprep.mubr.msk.f32.mxu0 %vm176_vm0, %v7029_v3 }
0x3a7f   :  { %v7030_v4 = vadd.f32 %v7321_v22, %v7021_v49 }
0x3a81   :  { %8004 = vmatmul.mubr.msk.f32.vlgmr.msra.gmra.mrb[80].mxu0 %vm176_vm0, %v7030_v4 }
0x3b54   :  { %v8005_v9 = vpop.f32.mrb[80].mxu0 }
0x3b55   :  { %v7120_v15 = vadd.f32 %v8005_v9, %v7322_v11  ;;  %v7114_v44 = vpop.f32.mrb[81].mxu0 }
0x3b56   :  { %v7115_v21 = vadd.f32 %v7322_v11, %v7114_v44 }
0x3b57   :  { %7124 = vst.msk [vmem:[#allocation3 + $0x8] sm:$0xff] %vm2375_vm3, %v7120_v15 }
0x3b58   :  { %7123 = vst.msk [vmem:[#allocation3] sm:$0xff] %vm2375_vm3, %v7115_v21 }
0x3b59   :  { %8276 = shalt.err (!%p8273_p4)
}
0x3b5a   :  { %s8277_s13 = scalar_lea.hbm %s8547_s20, 256 }
0x3b5b   :  { %p8278_p5 = scmp.ne.s32.totalorder %s8547_s20, %s8277_s13  ;;  %p8281_p6 = scmp.lt.u32.totalorder %s8277_s13, %s8547_s20 }
0x3b5d   :  { %p8283_p7 = pnand %p8281_p6, %p8278_p5 }
0x3b5f   :  { %8286 = shalt.err (!%p8283_p7)
}
0x3b60   :  { %s8342_s28 = smov 128   ;;  %s8343_s1 = smov 8  }
0x3b61   :  { %7136 = dma.vmem_to_hbm [thread:$0]  %s7131_s26, 256, %s8547_s20, [#allocation4], %s8342_s28, %s8342_s28, %s8343_s1  }
0x3b62   :  { %8287 = dma.done.wait [#allocation4], 256  }
0x3b63   :  { %8288 = vsyncadd [#allocation4], 4294967040 }
0x3b64   :  { %7140 = vsyncpa [#allocation4], 1 }

</bundles_post_ra>
